<compile_context>
chip_gen: v7x
topology: tpu7x:2x2x1
jax: 0.10.0
libtpu: 0.0.40
codegen_flags: <defaults>
</compile_context>

<pallas_src>
import functools

import jax
import jax.numpy as jnp
from jax.experimental import pallas as pl
from jax.experimental.pallas import tpu as pltpu

EPS = 1e-5
NEG_SLOPE = 0.2
VMEM_LIMIT = 32 * 1024 * 1024


# ----------------------------- Pallas kernels -------------------------------

def _lrelu(y):
    return jnp.where(y >= 0.0, y, NEG_SLOPE * y)


def stage0_kernel(x_ref, w_ref, b_ref, y_ref, sum_ref, m2_ref):
    """1x1 conv (row-tile matmul) + bias + LeakyReLU + per-tile BN partials."""
    x = x_ref[...]                       # (tileM, K)
    w = w_ref[...]                       # (K, C)
    K = w.shape[0]
    if K > 8:
        y = jnp.dot(x, w, preferred_element_type=jnp.float32)
    else:
        # Tiny contraction (K = in_channel): VPU broadcast-FMAs, skip the MXU.
        y = x[:, 0:1] * w[0:1, :]
        for k in range(1, K):
            y = y + x[:, k:k + 1] * w[k:k + 1, :]
    y = _lrelu(y + b_ref[...])
    y_ref[...] = y
    # Per-tile BN partial stats: sum + tile-centered second moment.
    s = jnp.sum(y, axis=0, keepdims=True)
    sum_ref[0] = s
    d = y - s * (1.0 / y.shape[0])
    m2_ref[0] = jnp.sum(d * d, axis=0, keepdims=True)


def stage1_kernel(xp_ref, w_ref, b_ref, y_ref, sum_ref, m2_ref):
    """Reflection-padded 3x3 conv (one image per grid step) as 9 shifted
    matmuls accumulated in f32 (no im2col), + bias + LeakyReLU + BN partials.
    BN of the previous stage is already folded into w/b by the wrapper."""
    H = xp_ref.shape[1] - 2
    W = xp_ref.shape[2] - 2
    C = w_ref.shape[-1]
    HW = H * W
    acc = jnp.zeros((HW, C), jnp.float32)
    for dy in range(3):
        for dx in range(3):
            xs = xp_ref[0, dy:dy + H, dx:dx + W, :].reshape(HW, C)
            acc = acc + jnp.dot(xs, w_ref[dy * 3 + dx],
                                preferred_element_type=jnp.float32)
    y = _lrelu(acc + b_ref[...])
    y_ref[0] = y
    s = jnp.sum(y, axis=0, keepdims=True)
    sum_ref[0] = s
    d = y - s * (1.0 / HW)
    m2_ref[0] = jnp.sum(d * d, axis=0, keepdims=True)


def stage2_kernel(x_ref, w_ref, b_ref, o_ref, *, activation):
    """Final 1x1 conv (+ optional sigmoid/tanh). BN1 is folded into w/b."""
    y = jnp.dot(x_ref[...], w_ref[...], preferred_element_type=jnp.float32)
    y = y + b_ref[...]
    if activation == "sigmoid":
        y = jax.nn.sigmoid(y)
    elif activation == "tanh":
        y = jnp.tanh(y)
    o_ref[...] = y


# ----------------------------- pallas_call glue ------------------------------

def _cparams():
    return pltpu.CompilerParams(
        dimension_semantics=("parallel",),
        vmem_limit_bytes=VMEM_LIMIT)


def _pick_row_tile(M):
    """Largest row tile (mult. of 8) dividing M, preferring >=2 grid steps."""
    for t in (1024, 512, 256, 128, 64, 32, 16, 8):
        if M % t == 0 and M // t >= 2:
            return t
    for t in (1024, 512, 256, 128, 64, 32, 16, 8):
        if M % t == 0:
            return t
    return M


def _stage0_call(x2d, w0, b0, tileM):
    M, K = x2d.shape
    C = w0.shape[1]
    T = M // tileM
    return pl.pallas_call(
        stage0_kernel,
        out_shape=(
            jax.ShapeDtypeStruct((M, C), jnp.float32),
            jax.ShapeDtypeStruct((T, 1, C), jnp.float32),
            jax.ShapeDtypeStruct((T, 1, C), jnp.float32),
        ),
        grid=(T,),
        in_specs=[
            pl.BlockSpec((tileM, K), lambda i: (i, 0)),
            pl.BlockSpec((K, C), lambda i: (0, 0)),
            pl.BlockSpec((1, C), lambda i: (0, 0)),
        ],
        out_specs=(
            pl.BlockSpec((tileM, C), lambda i: (i, 0)),
            pl.BlockSpec((1, 1, C), lambda i: (i, 0, 0)),
            pl.BlockSpec((1, 1, C), lambda i: (i, 0, 0)),
        ),
        compiler_params=_cparams(),
        cost_estimate=pl.CostEstimate(
            flops=2 * M * K * C + 8 * M * C, transcendentals=0,
            bytes_accessed=4 * (M * K + K * C + C + M * C + 2 * T * C)),
    )(x2d, w0, b0)


def _stage1_call(xp, w1, b1):
    N, Hp, Wp, C = xp.shape
    H, W = Hp - 2, Wp - 2
    HW = H * W
    return pl.pallas_call(
        stage1_kernel,
        out_shape=(
            jax.ShapeDtypeStruct((N, HW, C), jnp.float32),
            jax.ShapeDtypeStruct((N, 1, C), jnp.float32),
            jax.ShapeDtypeStruct((N, 1, C), jnp.float32),
        ),
        grid=(N,),
        in_specs=[
            pl.BlockSpec((1, Hp, Wp, C), lambda n: (n, 0, 0, 0)),
            pl.BlockSpec((9, C, C), lambda n: (0, 0, 0)),
            pl.BlockSpec((1, C), lambda n: (0, 0)),
        ],
        out_specs=(
            pl.BlockSpec((1, HW, C), lambda n: (n, 0, 0)),
            pl.BlockSpec((1, 1, C), lambda n: (n, 0, 0)),
            pl.BlockSpec((1, 1, C), lambda n: (n, 0, 0)),
        ),
        compiler_params=_cparams(),
        cost_estimate=pl.CostEstimate(
            flops=2 * N * HW * 9 * C * C + 8 * N * HW * C, transcendentals=0,
            bytes_accessed=4 * (N * Hp * Wp * C + 9 * C * C + C
                                + N * HW * C + 2 * N * C)),
    )(xp, w1, b1)


def _stage2_call(x2d, w2, b2, activation, tileM):
    M, K = x2d.shape
    C = w2.shape[1]
    T = M // tileM
    kernel = functools.partial(stage2_kernel, activation=activation)
    trans = M * C if activation in ("sigmoid", "tanh") else 0
    return pl.pallas_call(
        kernel,
        out_shape=jax.ShapeDtypeStruct((M, C), jnp.float32),
        grid=(T,),
        in_specs=[
            pl.BlockSpec((tileM, K), lambda i: (i, 0)),
            pl.BlockSpec((K, C), lambda i: (0, 0)),
            pl.BlockSpec((1, C), lambda i: (0, 0)),
        ],
        out_specs=pl.BlockSpec((tileM, C), lambda i: (i, 0)),
        compiler_params=_cparams(),
        cost_estimate=pl.CostEstimate(
            flops=2 * M * K * C, transcendentals=trans,
            bytes_accessed=4 * (M * K + K * C + C + M * C)),
    )(x2d, w2, b2)


# --------------------- BN stat combine & affine folding ----------------------

def _bn_scale_shift(sum_t, m2_t, rows_per_group, total_rows, gamma, beta):
    """Combine per-group (sum, centered M2) into BN scale/shift (biased var)."""
    sum_t = sum_t[:, 0, :]                     # (G, C)
    m2_t = m2_t[:, 0, :]                       # (G, C)
    mean = jnp.sum(sum_t, axis=0) / total_rows                     # (C,)
    gmean = sum_t / rows_per_group                                  # (G, C)
    m2 = jnp.sum(m2_t, axis=0) + rows_per_group * jnp.sum(
        (gmean - mean[None, :]) ** 2, axis=0)
    var = jnp.maximum(m2 / total_rows, 0.0)
    scale = gamma * jax.lax.rsqrt(var + EPS)
    shift = beta - mean * scale
    return scale, shift


# ------------------------------- Mask forward --------------------------------

def mask_forward(params, x_nchw, activation=None):
    """x_nchw: (N, Cin, H, W) float32 -> (N, Cout, H, W) float32."""
    N, Cin, H, W = x_nchw.shape
    unit = params["w0"].shape[0]
    Cout = params["w2"].shape[0]
    M = N * H * W
    HW = H * W
    tileM = _pick_row_tile(M)

    # NCHW -> NHWC -> (M, Cin)
    x2d = jnp.transpose(x_nchw, (0, 2, 3, 1)).reshape(M, Cin)

    # ---- stage 0: 1x1 conv + LeakyReLU (+ BN0 partial stats) ----
    w0 = params["w0"][:, :, 0, 0].T                              # (Cin, unit)
    y0, s0, m2_0 = _stage0_call(x2d, w0, params["b0"].reshape(1, unit), tileM)
    scale0, shift0 = _bn_scale_shift(s0, m2_0, tileM, M,
                                     params["bn0_gamma"], params["bn0_beta"])

    # ---- stage 1: ReflectionPad(1) + 3x3 conv + LeakyReLU (+ BN1 stats) ----
    # BN0 (per-channel affine) is folded into the conv weights/bias so the
    # normalized h0 is never materialized in HBM.
    w1_r = jnp.transpose(params["w1"], (2, 3, 1, 0)).reshape(9, unit, unit)
    w1_eff = w1_r * scale0[None, :, None]
    b1_eff = params["b1"] + jnp.sum(w1_r * shift0[None, :, None], axis=(0, 1))
    xp = jnp.pad(y0.reshape(N, H, W, unit),
                 ((0, 0), (1, 1), (1, 1), (0, 0)), mode="reflect")
    y1, s1, m2_1 = _stage1_call(xp, w1_eff, b1_eff.reshape(1, unit))
    scale1, shift1 = _bn_scale_shift(s1, m2_1, HW, M,
                                     params["bn1_gamma"], params["bn1_beta"])

    # ---- stage 2: final 1x1 conv (+ optional activation); BN1 folded in ----
    w2 = params["w2"][:, :, 0, 0].T                              # (unit, Cout)
    w2_eff = scale1[:, None] * w2
    b2_eff = params["b2"] + shift1 @ w2
    out2d = _stage2_call(y1.reshape(M, unit), w2_eff,
                         b2_eff.reshape(1, Cout), activation, tileM)

    return jnp.transpose(out2d.reshape(N, H, W, Cout), (0, 3, 1, 2))


# ------------------------------ parameters -----------------------------------

def init_mask_params(key, in_channel, out_channel, unit):
    """Deterministic synthetic parameters, PyTorch weight layouts."""
    ks = jax.random.split(key, 6)
    p = {}
    p["w0"] = jax.random.normal(ks[0], (unit, in_channel, 1, 1), jnp.float32) * 0.1
    p["b0"] = jax.random.normal(ks[1], (unit,), jnp.float32) * 0.1
    p["bn0_gamma"] = jnp.ones((unit,), jnp.float32)
    p["bn0_beta"] = jnp.zeros((unit,), jnp.float32)
    p["w1"] = jax.random.normal(ks[2], (unit, unit, 3, 3), jnp.float32) * 0.05
    p["b1"] = jax.random.normal(ks[3], (unit,), jnp.float32) * 0.1
    p["bn1_gamma"] = jnp.ones((unit,), jnp.float32)
    p["bn1_beta"] = jnp.zeros((unit,), jnp.float32)
    p["w2"] = jax.random.normal(ks[4], (out_channel, unit, 1, 1), jnp.float32) * 0.1
    p["b2"] = jax.random.normal(ks[5], (out_channel,), jnp.float32) * 0.1
    return p


# ----------------------------- pure-JAX reference ----------------------------

def _ref_forward(params, x_nchw, activation=None):
    def conv_lrelu_bn(x2d, w, b, g, beta):
        y = x2d @ w + b
        y = jnp.where(y >= 0.0, y, NEG_SLOPE * y)
        mean = jnp.mean(y, axis=0, keepdims=True)
        var = jnp.mean((y - mean) ** 2, axis=0, keepdims=True)
        return g * (y - mean) / jnp.sqrt(var + EPS) + beta

    N, Cin, H, W = x_nchw.shape
    unit = params["w0"].shape[0]
    Cout = params["w2"].shape[0]
    M = N * H * W
    x2d = jnp.transpose(x_nchw, (0, 2, 3, 1)).reshape(M, Cin)
    h0 = conv_lrelu_bn(x2d, params["w0"][:, :, 0, 0].T, params["b0"],
                       params["bn0_gamma"], params["bn0_beta"])
    padded = jnp.pad(h0.reshape(N, H, W, unit),
                     ((0, 0), (1, 1), (1, 1), (0, 0)), mode="reflect")
    patches = [padded[:, dy:dy + H, dx:dx + W, :]
               for dy in range(3) for dx in range(3)]
    x_col = jnp.concatenate(patches, axis=-1).reshape(M, 9 * unit)
    w1 = jnp.transpose(params["w1"], (2, 3, 1, 0)).reshape(9 * unit, unit)
    h1 = conv_lrelu_bn(x_col, w1, params["b1"],
                       params["bn1_gamma"], params["bn1_beta"])
    out2d = h1 @ params["w2"][:, :, 0, 0].T + params["b2"]
    if activation == "sigmoid":
        out2d = jax.nn.sigmoid(out2d)
    elif activation == "tanh":
        out2d = jnp.tanh(out2d)
    return jnp.transpose(out2d.reshape(N, H, W, Cout), (0, 3, 1, 2))


# ------------------------------------ main -----------------------------------

if __name__ == "__main__":
    N, in_channel, H, W = 2, 4, 16, 16
    out_channel, unit = 3, 32
    activation = None   # default Mask(..., activation=None)

    key = jax.random.PRNGKey(0)
    k_params, k_x = jax.random.split(key)
    params = init_mask_params(k_params, in_channel, out_channel, unit)
    x = jax.random.normal(k_x, (N, in_channel, H, W), jnp.float32)

    fwd = jax.jit(mask_forward, static_argnames=("activation",))
    out = jax.block_until_ready(fwd(params, x, activation=activation))
    assert out.shape == (N, out_channel, H, W), out.shape

    ref = jax.block_until_ready(_ref_forward(params, x, activation))
    assert jnp.allclose(out, ref, rtol=1e-2, atol=1e-2), \
        float(jnp.max(jnp.abs(out - ref)))

    print("KERNEL_OK")
</pallas_src>

<mosaic_0001>
module attributes {stable_mosaic.version = 11 : i64} {
  func.func @stage0_kernel(%arg0: i32, %arg1: memref<256x4xf32, #tpu.memory_space<vmem>>, %arg2: memref<4x32xf32, #tpu.memory_space<vmem>>, %arg3: memref<1x32xf32, #tpu.memory_space<vmem>>, %arg4: memref<256x32xf32, #tpu.memory_space<vmem>>, %arg5: memref<1x1x32xf32, #tpu.memory_space<vmem>>, %arg6: memref<1x1x32xf32, #tpu.memory_space<vmem>>) attributes {dimension_semantics = [#tpu.dimension_semantics<parallel>], iteration_bounds = array<i64: 2>, scalar_prefetch = 0 : i64, scratch_operands = 0 : i64, tpu.core_type = #tpu.core_type<tc>, window_params = [{transform_indices = @transform_0, window_bounds = array<i64: 256, 4>}, {pipeline_mode = #tpu.pipeline_mode<synchronous>, transform_indices = @transform_1, window_bounds = array<i64: 4, 32>}, {pipeline_mode = #tpu.pipeline_mode<synchronous>, transform_indices = @transform_2, window_bounds = array<i64: 1, 32>}, {transform_indices = @transform_3, window_bounds = array<i64: 256, 32>}, {transform_indices = @transform_4, window_bounds = array<i64: 1, 1, 32>}, {transform_indices = @transform_5, window_bounds = array<i64: 1, 1, 32>}]} {
    %c0 = arith.constant 0 : index
    %c0_0 = arith.constant 0 : index
    %0 = vector.load %arg1[%c0, %c0_0] : memref<256x4xf32, #tpu.memory_space<vmem>>, vector<256x4xf32>
    %c0_1 = arith.constant 0 : index
    %c0_2 = arith.constant 0 : index
    %1 = vector.load %arg2[%c0_1, %c0_2] : memref<4x32xf32, #tpu.memory_space<vmem>>, vector<4x32xf32>
    %2 = vector.extract_strided_slice %0 {offsets = [0, 0], sizes = [256, 1], strides = [1, 1]} : vector<256x4xf32> to vector<256x1xf32>
    %3 = vector.extract_strided_slice %1 {offsets = [0, 0], sizes = [1, 32], strides = [1, 1]} : vector<4x32xf32> to vector<1x32xf32>
    %4 = vector.broadcast %2 : vector<256x1xf32> to vector<256x32xf32>
    %5 = vector.broadcast %3 : vector<1x32xf32> to vector<256x32xf32>
    %6 = arith.mulf %4, %5 : vector<256x32xf32>
    %7 = vector.extract_strided_slice %0 {offsets = [0, 1], sizes = [256, 1], strides = [1, 1]} : vector<256x4xf32> to vector<256x1xf32>
    %8 = vector.extract_strided_slice %1 {offsets = [1, 0], sizes = [1, 32], strides = [1, 1]} : vector<4x32xf32> to vector<1x32xf32>
    %9 = vector.broadcast %7 : vector<256x1xf32> to vector<256x32xf32>
    %10 = vector.broadcast %8 : vector<1x32xf32> to vector<256x32xf32>
    %11 = arith.mulf %9, %10 : vector<256x32xf32>
    %12 = arith.addf %6, %11 : vector<256x32xf32>
    %13 = vector.extract_strided_slice %0 {offsets = [0, 2], sizes = [256, 1], strides = [1, 1]} : vector<256x4xf32> to vector<256x1xf32>
    %14 = vector.extract_strided_slice %1 {offsets = [2, 0], sizes = [1, 32], strides = [1, 1]} : vector<4x32xf32> to vector<1x32xf32>
    %15 = vector.broadcast %13 : vector<256x1xf32> to vector<256x32xf32>
    %16 = vector.broadcast %14 : vector<1x32xf32> to vector<256x32xf32>
    %17 = arith.mulf %15, %16 : vector<256x32xf32>
    %18 = arith.addf %12, %17 : vector<256x32xf32>
    %19 = vector.extract_strided_slice %0 {offsets = [0, 3], sizes = [256, 1], strides = [1, 1]} : vector<256x4xf32> to vector<256x1xf32>
    %20 = vector.extract_strided_slice %1 {offsets = [3, 0], sizes = [1, 32], strides = [1, 1]} : vector<4x32xf32> to vector<1x32xf32>
    %21 = vector.broadcast %19 : vector<256x1xf32> to vector<256x32xf32>
    %22 = vector.broadcast %20 : vector<1x32xf32> to vector<256x32xf32>
    %23 = arith.mulf %21, %22 : vector<256x32xf32>
    %24 = arith.addf %18, %23 : vector<256x32xf32>
    %c0_3 = arith.constant 0 : index
    %c0_4 = arith.constant 0 : index
    %25 = vector.load %arg3[%c0_3, %c0_4] : memref<1x32xf32, #tpu.memory_space<vmem>>, vector<1x32xf32>
    %26 = vector.broadcast %25 : vector<1x32xf32> to vector<256x32xf32>
    %27 = arith.addf %24, %26 : vector<256x32xf32>
    %cst = arith.constant 0.000000e+00 : f32
    %28 = vector.broadcast %cst : f32 to vector<256x32xf32>
    %29 = arith.cmpf oge, %27, %28 : vector<256x32xf32>
    %cst_5 = arith.constant 2.000000e-01 : f32
    %30 = vector.broadcast %cst_5 : f32 to vector<256x32xf32>
    %31 = arith.mulf %30, %27 : vector<256x32xf32>
    %32 = arith.select %29, %27, %31 : vector<256x32xi1>, vector<256x32xf32>
    %c0_6 = arith.constant 0 : index
    %c0_7 = arith.constant 0 : index
    %33 = vector.load %arg4[%c0_6, %c0_7] : memref<256x32xf32, #tpu.memory_space<vmem>>, vector<256x32xf32>
    tpu.vector_store %arg4[%c0_6, %c0_7], %32 {strides = array<i32>} : memref<256x32xf32, #tpu.memory_space<vmem>>, vector<256x32xf32>,
    %cst_8 = arith.constant dense<0.000000e+00> : vector<32xf32>
    %34 = vector.multi_reduction <add>, %32, %cst_8 [0] : vector<256x32xf32> to vector<32xf32>
    %35 = vector.shape_cast %34 : vector<32xf32> to vector<1x32xf32>
    %c0_9 = arith.constant 0 : index
    %c0_10 = arith.constant 0 : index
    %c0_11 = arith.constant 0 : index
    %36 = vector.load %arg5[%c0_9, %c0_10, %c0_11] : memref<1x1x32xf32, #tpu.memory_space<vmem>>, vector<1x1x32xf32>
    %37 = vector.shape_cast %36 : vector<1x1x32xf32> to vector<1x32xf32>
    %38 = vector.shape_cast %35 : vector<1x32xf32> to vector<1x1x32xf32>
    tpu.vector_store %arg5[%c0_9, %c0_10, %c0_11], %38 {strides = array<i32>} : memref<1x1x32xf32, #tpu.memory_space<vmem>>, vector<1x1x32xf32>,
    %cst_12 = arith.constant 3.906250e-03 : f32
    %39 = vector.broadcast %cst_12 : f32 to vector<1x32xf32>
    %40 = arith.mulf %35, %39 : vector<1x32xf32>
    %41 = vector.broadcast %40 : vector<1x32xf32> to vector<256x32xf32>
    %42 = arith.subf %32, %41 : vector<256x32xf32>
    %43 = arith.mulf %42, %42 : vector<256x32xf32>
    %cst_13 = arith.constant dense<0.000000e+00> : vector<32xf32>
    %44 = vector.multi_reduction <add>, %43, %cst_13 [0] : vector<256x32xf32> to vector<32xf32>
    %45 = vector.shape_cast %44 : vector<32xf32> to vector<1x32xf32>
    %c0_14 = arith.constant 0 : index
    %c0_15 = arith.constant 0 : index
    %c0_16 = arith.constant 0 : index
    %46 = vector.load %arg6[%c0_14, %c0_15, %c0_16] : memref<1x1x32xf32, #tpu.memory_space<vmem>>, vector<1x1x32xf32>
    %47 = vector.shape_cast %46 : vector<1x1x32xf32> to vector<1x32xf32>
    %48 = vector.shape_cast %45 : vector<1x32xf32> to vector<1x1x32xf32>
    tpu.vector_store %arg6[%c0_14, %c0_15, %c0_16], %48 {strides = array<i32>} : memref<1x1x32xf32, #tpu.memory_space<vmem>>, vector<1x1x32xf32>,
    return
  }
  func.func @transform_0(%arg0: i32) -> (i32, i32) {
    %c0_i32 = arith.constant 0 : i32
    %c0_i32_0 = arith.constant 0 : i32
    return %arg0, %c0_i32 : i32, i32
  }
  func.func @transform_1(%arg0: i32) -> (i32, i32) {
    %c0_i32 = arith.constant 0 : i32
    %c0_i32_0 = arith.constant 0 : i32
    %c0_i32_1 = arith.constant 0 : i32
    return %c0_i32, %c0_i32_0 : i32, i32
  }
  func.func @transform_2(%arg0: i32) -> (i32, i32) {
    %c0_i32 = arith.constant 0 : i32
    %c0_i32_0 = arith.constant 0 : i32
    %c0_i32_1 = arith.constant 0 : i32
    return %c0_i32, %c0_i32_0 : i32, i32
  }
  func.func @transform_3(%arg0: i32) -> (i32, i32) {
    %c0_i32 = arith.constant 0 : i32
    %c0_i32_0 = arith.constant 0 : i32
    return %arg0, %c0_i32 : i32, i32
  }
  func.func @transform_4(%arg0: i32) -> (i32, i32, i32) {
    %c0_i32 = arith.constant 0 : i32
    %c0_i32_0 = arith.constant 0 : i32
    %c0_i32_1 = arith.constant 0 : i32
    return %arg0, %c0_i32, %c0_i32_0 : i32, i32, i32
  }
  func.func @transform_5(%arg0: i32) -> (i32, i32, i32) {
    %c0_i32 = arith.constant 0 : i32
    %c0_i32_0 = arith.constant 0 : i32
    %c0_i32_1 = arith.constant 0 : i32
    return %arg0, %c0_i32, %c0_i32_0 : i32, i32, i32
  }
}

module attributes {stable_mosaic.version = 11 : i64} {
  func.func @stage1_kernel(%arg0: i32, %arg1: memref<1x18x18x32xf32, #tpu.memory_space<vmem>>, %arg2: memref<9x32x32xf32, #tpu.memory_space<vmem>>, %arg3: memref<1x32xf32, #tpu.memory_space<vmem>>, %arg4: memref<1x256x32xf32, #tpu.memory_space<vmem>>, %arg5: memref<1x1x32xf32, #tpu.memory_space<vmem>>, %arg6: memref<1x1x32xf32, #tpu.memory_space<vmem>>) attributes {dimension_semantics = [#tpu.dimension_semantics<parallel>], iteration_bounds = array<i64: 2>, scalar_prefetch = 0 : i64, scratch_operands = 0 : i64, tpu.core_type = #tpu.core_type<tc>, window_params = [{transform_indices = @transform_0, window_bounds = array<i64: 1, 18, 18, 32>}, {pipeline_mode = #tpu.pipeline_mode<synchronous>, transform_indices = @transform_1, window_bounds = array<i64: 9, 32, 32>}, {pipeline_mode = #tpu.pipeline_mode<synchronous>, transform_indices = @transform_2, window_bounds = array<i64: 1, 32>}, {transform_indices = @transform_3, window_bounds = array<i64: 1, 256, 32>}, {transform_indices = @transform_4, window_bounds = array<i64: 1, 1, 32>}, {transform_indices = @transform_5, window_bounds = array<i64: 1, 1, 32>}]} {
    %cst = arith.constant 0.000000e+00 : f32
    %0 = vector.broadcast %cst : f32 to vector<256x32xf32>
    %c0 = arith.constant 0 : index
    %c0_0 = arith.constant 0 : index
    %c0_1 = arith.constant 0 : index
    %c0_2 = arith.constant 0 : index
    %1 = vector.load %arg1[%c0, %c0_0, %c0_1, %c0_2] : memref<1x18x18x32xf32, #tpu.memory_space<vmem>>, vector<1x16x16x32xf32>
    %2 = vector.shape_cast %1 : vector<1x16x16x32xf32> to vector<16x16x32xf32>
    %3 = vector.shape_cast %2 : vector<16x16x32xf32> to vector<256x32xf32>
    %c0_3 = arith.constant 0 : index
    %c0_4 = arith.constant 0 : index
    %c0_5 = arith.constant 0 : index
    %4 = vector.load %arg2[%c0_3, %c0_4, %c0_5] : memref<9x32x32xf32, #tpu.memory_space<vmem>>, vector<1x32x32xf32>
    %5 = vector.shape_cast %4 : vector<1x32x32xf32> to vector<32x32xf32>
    %cst_6 = arith.constant dense<0.000000e+00> : vector<256x32xf32>
    %6 = tpu.matmul %3, %5, %cst_6 {dimension_numbers = #tpu.dot_dimension_numbers<[1], [0], [0], [1], [0, 0, 1, 1], [], []>} : vector<256x32xf32>, vector<32x32xf32>, vector<256x32xf32> -> vector<256x32xf32>
    %7 = arith.addf %0, %6 : vector<256x32xf32>
    %c0_7 = arith.constant 0 : index
    %c0_8 = arith.constant 0 : index
    %c1 = arith.constant 1 : index
    %c0_9 = arith.constant 0 : index
    %8 = vector.load %arg1[%c0_7, %c0_8, %c1, %c0_9] : memref<1x18x18x32xf32, #tpu.memory_space<vmem>>, vector<1x16x16x32xf32>
    %9 = vector.shape_cast %8 : vector<1x16x16x32xf32> to vector<16x16x32xf32>
    %10 = vector.shape_cast %9 : vector<16x16x32xf32> to vector<256x32xf32>
    %c1_10 = arith.constant 1 : index
    %c0_11 = arith.constant 0 : index
    %c0_12 = arith.constant 0 : index
    %11 = vector.load %arg2[%c1_10, %c0_11, %c0_12] : memref<9x32x32xf32, #tpu.memory_space<vmem>>, vector<1x32x32xf32>
    %12 = vector.shape_cast %11 : vector<1x32x32xf32> to vector<32x32xf32>
    %cst_13 = arith.constant dense<0.000000e+00> : vector<256x32xf32>
    %13 = tpu.matmul %10, %12, %cst_13 {dimension_numbers = #tpu.dot_dimension_numbers<[1], [0], [0], [1], [0, 0, 1, 1], [], []>} : vector<256x32xf32>, vector<32x32xf32>, vector<256x32xf32> -> vector<256x32xf32>
    %14 = arith.addf %7, %13 : vector<256x32xf32>
    %c0_14 = arith.constant 0 : index
    %c0_15 = arith.constant 0 : index
    %c2 = arith.constant 2 : index
    %c0_16 = arith.constant 0 : index
    %15 = vector.load %arg1[%c0_14, %c0_15, %c2, %c0_16] : memref<1x18x18x32xf32, #tpu.memory_space<vmem>>, vector<1x16x16x32xf32>
    %16 = vector.shape_cast %15 : vector<1x16x16x32xf32> to vector<16x16x32xf32>
    %17 = vector.shape_cast %16 : vector<16x16x32xf32> to vector<256x32xf32>
    %c2_17 = arith.constant 2 : index
    %c0_18 = arith.constant 0 : index
    %c0_19 = arith.constant 0 : index
    %18 = vector.load %arg2[%c2_17, %c0_18, %c0_19] : memref<9x32x32xf32, #tpu.memory_space<vmem>>, vector<1x32x32xf32>
    %19 = vector.shape_cast %18 : vector<1x32x32xf32> to vector<32x32xf32>
    %cst_20 = arith.constant dense<0.000000e+00> : vector<256x32xf32>
    %20 = tpu.matmul %17, %19, %cst_20 {dimension_numbers = #tpu.dot_dimension_numbers<[1], [0], [0], [1], [0, 0, 1, 1], [], []>} : vector<256x32xf32>, vector<32x32xf32>, vector<256x32xf32> -> vector<256x32xf32>
    %21 = arith.addf %14, %20 : vector<256x32xf32>
    %c0_21 = arith.constant 0 : index
    %c1_22 = arith.constant 1 : index
    %c0_23 = arith.constant 0 : index
    %c0_24 = arith.constant 0 : index
    %22 = vector.load %arg1[%c0_21, %c1_22, %c0_23, %c0_24] : memref<1x18x18x32xf32, #tpu.memory_space<vmem>>, vector<1x16x16x32xf32>
    %23 = vector.shape_cast %22 : vector<1x16x16x32xf32> to vector<16x16x32xf32>
    %24 = vector.shape_cast %23 : vector<16x16x32xf32> to vector<256x32xf32>
    %c3 = arith.constant 3 : index
    %c0_25 = arith.constant 0 : index
    %c0_26 = arith.constant 0 : index
    %25 = vector.load %arg2[%c3, %c0_25, %c0_26] : memref<9x32x32xf32, #tpu.memory_space<vmem>>, vector<1x32x32xf32>
    %26 = vector.shape_cast %25 : vector<1x32x32xf32> to vector<32x32xf32>
    %cst_27 = arith.constant dense<0.000000e+00> : vector<256x32xf32>
    %27 = tpu.matmul %24, %26, %cst_27 {dimension_numbers = #tpu.dot_dimension_numbers<[1], [0], [0], [1], [0, 0, 1, 1], [], []>} : vector<256x32xf32>, vector<32x32xf32>, vector<256x32xf32> -> vector<256x32xf32>
    %28 = arith.addf %21, %27 : vector<256x32xf32>
    %c0_28 = arith.constant 0 : index
    %c1_29 = arith.constant 1 : index
    %c1_30 = arith.constant 1 : index
    %c0_31 = arith.constant 0 : index
    %29 = vector.load %arg1[%c0_28, %c1_29, %c1_30, %c0_31] : memref<1x18x18x32xf32, #tpu.memory_space<vmem>>, vector<1x16x16x32xf32>
    %30 = vector.shape_cast %29 : vector<1x16x16x32xf32> to vector<16x16x32xf32>
    %31 = vector.shape_cast %30 : vector<16x16x32xf32> to vector<256x32xf32>
    %c4 = arith.constant 4 : index
    %c0_32 = arith.constant 0 : index
    %c0_33 = arith.constant 0 : index
    %32 = vector.load %arg2[%c4, %c0_32, %c0_33] : memref<9x32x32xf32, #tpu.memory_space<vmem>>, vector<1x32x32xf32>
    %33 = vector.shape_cast %32 : vector<1x32x32xf32> to vector<32x32xf32>
    %cst_34 = arith.constant dense<0.000000e+00> : vector<256x32xf32>
    %34 = tpu.matmul %31, %33, %cst_34 {dimension_numbers = #tpu.dot_dimension_numbers<[1], [0], [0], [1], [0, 0, 1, 1], [], []>} : vector<256x32xf32>, vector<32x32xf32>, vector<256x32xf32> -> vector<256x32xf32>
    %35 = arith.addf %28, %34 : vector<256x32xf32>
    %c0_35 = arith.constant 0 : index
    %c1_36 = arith.constant 1 : index
    %c2_37 = arith.constant 2 : index
    %c0_38 = arith.constant 0 : index
    %36 = vector.load %arg1[%c0_35, %c1_36, %c2_37, %c0_38] : memref<1x18x18x32xf32, #tpu.memory_space<vmem>>, vector<1x16x16x32xf32>
    %37 = vector.shape_cast %36 : vector<1x16x16x32xf32> to vector<16x16x32xf32>
    %38 = vector.shape_cast %37 : vector<16x16x32xf32> to vector<256x32xf32>
    %c5 = arith.constant 5 : index
    %c0_39 = arith.constant 0 : index
    %c0_40 = arith.constant 0 : index
    %39 = vector.load %arg2[%c5, %c0_39, %c0_40] : memref<9x32x32xf32, #tpu.memory_space<vmem>>, vector<1x32x32xf32>
    %40 = vector.shape_cast %39 : vector<1x32x32xf32> to vector<32x32xf32>
    %cst_41 = arith.constant dense<0.000000e+00> : vector<256x32xf32>
    %41 = tpu.matmul %38, %40, %cst_41 {dimension_numbers = #tpu.dot_dimension_numbers<[1], [0], [0], [1], [0, 0, 1, 1], [], []>} : vector<256x32xf32>, vector<32x32xf32>, vector<256x32xf32> -> vector<256x32xf32>
    %42 = arith.addf %35, %41 : vector<256x32xf32>
    %c0_42 = arith.constant 0 : index
    %c2_43 = arith.constant 2 : index
    %c0_44 = arith.constant 0 : index
    %c0_45 = arith.constant 0 : index
    %43 = vector.load %arg1[%c0_42, %c2_43, %c0_44, %c0_45] : memref<1x18x18x32xf32, #tpu.memory_space<vmem>>, vector<1x16x16x32xf32>
    %44 = vector.shape_cast %43 : vector<1x16x16x32xf32> to vector<16x16x32xf32>
    %45 = vector.shape_cast %44 : vector<16x16x32xf32> to vector<256x32xf32>
    %c6 = arith.constant 6 : index
    %c0_46 = arith.constant 0 : index
    %c0_47 = arith.constant 0 : index
    %46 = vector.load %arg2[%c6, %c0_46, %c0_47] : memref<9x32x32xf32, #tpu.memory_space<vmem>>, vector<1x32x32xf32>
    %47 = vector.shape_cast %46 : vector<1x32x32xf32> to vector<32x32xf32>
    %cst_48 = arith.constant dense<0.000000e+00> : vector<256x32xf32>
    %48 = tpu.matmul %45, %47, %cst_48 {dimension_numbers = #tpu.dot_dimension_numbers<[1], [0], [0], [1], [0, 0, 1, 1], [], []>} : vector<256x32xf32>, vector<32x32xf32>, vector<256x32xf32> -> vector<256x32xf32>
    %49 = arith.addf %42, %48 : vector<256x32xf32>
    %c0_49 = arith.constant 0 : index
    %c2_50 = arith.constant 2 : index
    %c1_51 = arith.constant 1 : index
    %c0_52 = arith.constant 0 : index
    %50 = vector.load %arg1[%c0_49, %c2_50, %c1_51, %c0_52] : memref<1x18x18x32xf32, #tpu.memory_space<vmem>>, vector<1x16x16x32xf32>
    %51 = vector.shape_cast %50 : vector<1x16x16x32xf32> to vector<16x16x32xf32>
    %52 = vector.shape_cast %51 : vector<16x16x32xf32> to vector<256x32xf32>
    %c7 = arith.constant 7 : index
    %c0_53 = arith.constant 0 : index
    %c0_54 = arith.constant 0 : index
    %53 = vector.load %arg2[%c7, %c0_53, %c0_54] : memref<9x32x32xf32, #tpu.memory_space<vmem>>, vector<1x32x32xf32>
    %54 = vector.shape_cast %53 : vector<1x32x32xf32> to vector<32x32xf32>
    %cst_55 = arith.constant dense<0.000000e+00> : vector<256x32xf32>
    %55 = tpu.matmul %52, %54, %cst_55 {dimension_numbers = #tpu.dot_dimension_numbers<[1], [0], [0], [1], [0, 0, 1, 1], [], []>} : vector<256x32xf32>, vector<32x32xf32>, vector<256x32xf32> -> vector<256x32xf32>
    %56 = arith.addf %49, %55 : vector<256x32xf32>
    %c0_56 = arith.constant 0 : index
    %c2_57 = arith.constant 2 : index
    %c2_58 = arith.constant 2 : index
    %c0_59 = arith.constant 0 : index
    %57 = vector.load %arg1[%c0_56, %c2_57, %c2_58, %c0_59] : memref<1x18x18x32xf32, #tpu.memory_space<vmem>>, vector<1x16x16x32xf32>
    %58 = vector.shape_cast %57 : vector<1x16x16x32xf32> to vector<16x16x32xf32>
    %59 = vector.shape_cast %58 : vector<16x16x32xf32> to vector<256x32xf32>
    %c8 = arith.constant 8 : index
    %c0_60 = arith.constant 0 : index
    %c0_61 = arith.constant 0 : index
    %60 = vector.load %arg2[%c8, %c0_60, %c0_61] : memref<9x32x32xf32, #tpu.memory_space<vmem>>, vector<1x32x32xf32>
    %61 = vector.shape_cast %60 : vector<1x32x32xf32> to vector<32x32xf32>
    %cst_62 = arith.constant dense<0.000000e+00> : vector<256x32xf32>
    %62 = tpu.matmul %59, %61, %cst_62 {dimension_numbers = #tpu.dot_dimension_numbers<[1], [0], [0], [1], [0, 0, 1, 1], [], []>} : vector<256x32xf32>, vector<32x32xf32>, vector<256x32xf32> -> vector<256x32xf32>
    %63 = arith.addf %56, %62 : vector<256x32xf32>
    %c0_63 = arith.constant 0 : index
    %c0_64 = arith.constant 0 : index
    %64 = vector.load %arg3[%c0_63, %c0_64] : memref<1x32xf32, #tpu.memory_space<vmem>>, vector<1x32xf32>
    %65 = vector.broadcast %64 : vector<1x32xf32> to vector<256x32xf32>
    %66 = arith.addf %63, %65 : vector<256x32xf32>
    %cst_65 = arith.constant 0.000000e+00 : f32
    %67 = vector.broadcast %cst_65 : f32 to vector<256x32xf32>
    %68 = arith.cmpf oge, %66, %67 : vector<256x32xf32>
    %cst_66 = arith.constant 2.000000e-01 : f32
    %69 = vector.broadcast %cst_66 : f32 to vector<256x32xf32>
    %70 = arith.mulf %69, %66 : vector<256x32xf32>
    %71 = arith.select %68, %66, %70 : vector<256x32xi1>, vector<256x32xf32>
    %c0_67 = arith.constant 0 : index
    %c0_68 = arith.constant 0 : index
    %c0_69 = arith.constant 0 : index
    %72 = vector.load %arg4[%c0_67, %c0_68, %c0_69] : memref<1x256x32xf32, #tpu.memory_space<vmem>>, vector<1x256x32xf32>
    %73 = vector.shape_cast %72 : vector<1x256x32xf32> to vector<256x32xf32>
    %74 = vector.shape_cast %71 : vector<256x32xf32> to vector<1x256x32xf32>
    tpu.vector_store %arg4[%c0_67, %c0_68, %c0_69], %74 {strides = array<i32>} : memref<1x256x32xf32, #tpu.memory_space<vmem>>, vector<1x256x32xf32>,
    %cst_70 = arith.constant dense<0.000000e+00> : vector<32xf32>
    %75 = vector.multi_reduction <add>, %71, %cst_70 [0] : vector<256x32xf32> to vector<32xf32>
    %76 = vector.shape_cast %75 : vector<32xf32> to vector<1x32xf32>
    %c0_71 = arith.constant 0 : index
    %c0_72 = arith.constant 0 : index
    %c0_73 = arith.constant 0 : index
    %77 = vector.load %arg5[%c0_71, %c0_72, %c0_73] : memref<1x1x32xf32, #tpu.memory_space<vmem>>, vector<1x1x32xf32>
    %78 = vector.shape_cast %77 : vector<1x1x32xf32> to vector<1x32xf32>
    %79 = vector.shape_cast %76 : vector<1x32xf32> to vector<1x1x32xf32>
    tpu.vector_store %arg5[%c0_71, %c0_72, %c0_73], %79 {strides = array<i32>} : memref<1x1x32xf32, #tpu.memory_space<vmem>>, vector<1x1x32xf32>,
    %cst_74 = arith.constant 3.906250e-03 : f32
    %80 = vector.broadcast %cst_74 : f32 to vector<1x32xf32>
    %81 = arith.mulf %76, %80 : vector<1x32xf32>
    %82 = vector.broadcast %81 : vector<1x32xf32> to vector<256x32xf32>
    %83 = arith.subf %71, %82 : vector<256x32xf32>
    %84 = arith.mulf %83, %83 : vector<256x32xf32>
    %cst_75 = arith.constant dense<0.000000e+00> : vector<32xf32>
    %85 = vector.multi_reduction <add>, %84, %cst_75 [0] : vector<256x32xf32> to vector<32xf32>
    %86 = vector.shape_cast %85 : vector<32xf32> to vector<1x32xf32>
    %c0_76 = arith.constant 0 : index
    %c0_77 = arith.constant 0 : index
    %c0_78 = arith.constant 0 : index
    %87 = vector.load %arg6[%c0_76, %c0_77, %c0_78] : memref<1x1x32xf32, #tpu.memory_space<vmem>>, vector<1x1x32xf32>
    %88 = vector.shape_cast %87 : vector<1x1x32xf32> to vector<1x32xf32>
    %89 = vector.shape_cast %86 : vector<1x32xf32> to vector<1x1x32xf32>
    tpu.vector_store %arg6[%c0_76, %c0_77, %c0_78], %89 {strides = array<i32>} : memref<1x1x32xf32, #tpu.memory_space<vmem>>, vector<1x1x32xf32>,
    return
  }
  func.func @transform_0(%arg0: i32) -> (i32, i32, i32, i32) {
    %c0_i32 = arith.constant 0 : i32
    %c0_i32_0 = arith.constant 0 : i32
    %c0_i32_1 = arith.constant 0 : i32
    %c0_i32_2 = arith.constant 0 : i32
    return %arg0, %c0_i32, %c0_i32_0, %c0_i32_1 : i32, i32, i32, i32
  }
  func.func @transform_1(%arg0: i32) -> (i32, i32, i32) {
    %c0_i32 = arith.constant 0 : i32
    %c0_i32_0 = arith.constant 0 : i32
    %c0_i32_1 = arith.constant 0 : i32
    %c0_i32_2 = arith.constant 0 : i32
    return %c0_i32, %c0_i32_0, %c0_i32_1 : i32, i32, i32
  }
  func.func @transform_2(%arg0: i32) -> (i32, i32) {
    %c0_i32 = arith.constant 0 : i32
    %c0_i32_0 = arith.constant 0 : i32
    %c0_i32_1 = arith.constant 0 : i32
    return %c0_i32, %c0_i32_0 : i32, i32
  }
  func.func @transform_3(%arg0: i32) -> (i32, i32, i32) {
    %c0_i32 = arith.constant 0 : i32
    %c0_i32_0 = arith.constant 0 : i32
    %c0_i32_1 = arith.constant 0 : i32
    return %arg0, %c0_i32, %c0_i32_0 : i32, i32, i32
  }
  func.func @transform_4(%arg0: i32) -> (i32, i32, i32) {
    %c0_i32 = arith.constant 0 : i32
    %c0_i32_0 = arith.constant 0 : i32
    %c0_i32_1 = arith.constant 0 : i32
    return %arg0, %c0_i32, %c0_i32_0 : i32, i32, i32
  }
  func.func @transform_5(%arg0: i32) -> (i32, i32, i32) {
    %c0_i32 = arith.constant 0 : i32
    %c0_i32_0 = arith.constant 0 : i32
    %c0_i32_1 = arith.constant 0 : i32
    return %arg0, %c0_i32, %c0_i32_0 : i32, i32, i32
  }
}

module attributes {stable_mosaic.version = 11 : i64} {
  func.func @stage2_kernel(%arg0: i32, %arg1: memref<256x32xf32, #tpu.memory_space<vmem>>, %arg2: memref<32x3xf32, #tpu.memory_space<vmem>>, %arg3: memref<1x3xf32, #tpu.memory_space<vmem>>, %arg4: memref<256x3xf32, #tpu.memory_space<vmem>>) attributes {dimension_semantics = [#tpu.dimension_semantics<parallel>], iteration_bounds = array<i64: 2>, scalar_prefetch = 0 : i64, scratch_operands = 0 : i64, tpu.core_type = #tpu.core_type<tc>, window_params = [{transform_indices = @transform_0, window_bounds = array<i64: 256, 32>}, {pipeline_mode = #tpu.pipeline_mode<synchronous>, transform_indices = @transform_1, window_bounds = array<i64: 32, 3>}, {pipeline_mode = #tpu.pipeline_mode<synchronous>, transform_indices = @transform_2, window_bounds = array<i64: 1, 3>}, {transform_indices = @transform_3, window_bounds = array<i64: 256, 3>}]} {
    %c0 = arith.constant 0 : index
    %c0_0 = arith.constant 0 : index
    %0 = vector.load %arg1[%c0, %c0_0] : memref<256x32xf32, #tpu.memory_space<vmem>>, vector<256x32xf32>
    %c0_1 = arith.constant 0 : index
    %c0_2 = arith.constant 0 : index
    %1 = vector.load %arg2[%c0_1, %c0_2] : memref<32x3xf32, #tpu.memory_space<vmem>>, vector<32x3xf32>
    %cst = arith.constant dense<0.000000e+00> : vector<256x3xf32>
    %2 = tpu.matmul %0, %1, %cst {dimension_numbers = #tpu.dot_dimension_numbers<[1], [0], [0], [1], [0, 0, 1, 1], [], []>} : vector<256x32xf32>, vector<32x3xf32>, vector<256x3xf32> -> vector<256x3xf32>
    %c0_3 = arith.constant 0 : index
    %c0_4 = arith.constant 0 : index
    %3 = vector.load %arg3[%c0_3, %c0_4] : memref<1x3xf32, #tpu.memory_space<vmem>>, vector<1x3xf32>
    %4 = vector.broadcast %3 : vector<1x3xf32> to vector<256x3xf32>
    %5 = arith.addf %2, %4 : vector<256x3xf32>
    %c0_5 = arith.constant 0 : index
    %c0_6 = arith.constant 0 : index
    %6 = vector.load %arg4[%c0_5, %c0_6] : memref<256x3xf32, #tpu.memory_space<vmem>>, vector<256x3xf32>
    tpu.vector_store %arg4[%c0_5, %c0_6], %5 {strides = array<i32>} : memref<256x3xf32, #tpu.memory_space<vmem>>, vector<256x3xf32>,
    return
  }
  func.func @transform_0(%arg0: i32) -> (i32, i32) {
    %c0_i32 = arith.constant 0 : i32
    %c0_i32_0 = arith.constant 0 : i32
    return %arg0, %c0_i32 : i32, i32
  }
  func.func @transform_1(%arg0: i32) -> (i32, i32) {
    %c0_i32 = arith.constant 0 : i32
    %c0_i32_0 = arith.constant 0 : i32
    %c0_i32_1 = arith.constant 0 : i32
    return %c0_i32, %c0_i32_0 : i32, i32
  }
  func.func @transform_2(%arg0: i32) -> (i32, i32) {
    %c0_i32 = arith.constant 0 : i32
    %c0_i32_0 = arith.constant 0 : i32
    %c0_i32_1 = arith.constant 0 : i32
    return %c0_i32, %c0_i32_0 : i32, i32
  }
  func.func @transform_3(%arg0: i32) -> (i32, i32) {
    %c0_i32 = arith.constant 0 : i32
    %c0_i32_0 = arith.constant 0 : i32
    return %arg0, %c0_i32 : i32, i32
  }
}

</mosaic_0001>

<bundles_post_ra>
// kernel: mask_forward.3
= control target key start
LH: loop header
LB: loop body
LE: loop exit
PB: predicated region body
PF: predicated region fallthrough
CT: control target
= control target key end

     0   :  { %s1635_s18 = smov 0   ;;  %s2654_s0 = inlined_call_operand.vmem [shape: f32[512,4], index: 0, kind: input, shape index: {}]   ;;  %s2655_s1 = inlined_call_operand.vmem [shape: f32[4,32], index: 1, kind: input, shape index: {}]   ;;  %s2656_s2 = inlined_call_operand.vmem [shape: f32[1,32], index: 2, kind: input, shape index: {}]   ;;  %s2657_s3 = inlined_call_operand.vmem [shape: f32[512,32], index: 3, kind: output, shape index: {0}]   ;;  %s2658_s4 = inlined_call_operand.vmem [shape: f32[2,1,32], index: 4, kind: output, shape index: {1}]   ;;  %s2659_s5 = inlined_call_operand.vmem [shape: f32[2,1,32], index: 5, kind: output, shape index: {2}]  }
   0x1 LB: > { %s1641_s19 = sadd.s32 4294967295, %s1599_s18   ;;  %p1546_p0 = scmp.ge.s32.totalorder %s1599_s18, 1  ;;  %s1599_s18 = sphi %s1635_s18, %s16_s18  }
   0x2   : > { %p193_p1 = scmp.lt.s32.totalorder %s1599_s18, 3 }
   0x4   : > { %p194_p2 = pnand %p1546_p0, %p193_p1 }
   0x6   : > { %197 = sbr.rel (%p194_p2) target bundleno = 566 (0x236), region = 32 }
   0xd   : > { %s1547_s20 = sshll.u32 %s1641_s19, 5  ;;  %v1601_v0 = vmov 0   ;;  %v1602_v33 = vmov 1   ;;  %v2660_v36 = vmov 2   ;;  %v2662_v37 = vmov 3   ;;  %p239_p4 = scmp.lt.s32.totalorder %s1641_s19, 1 }
   0xe   : > { %1567 = vset.pattern.permute.xlu1 %v1601_v0  ;;  %1566 = vset.pattern.permute.xlu0 %v1601_v0  ;;  %p228_p3 = scmp.lt.s32.totalorder %s1547_s20, 63  ;;  %v438_v44 = vlaneseq  ;;  %v1860_v51 = vld [vmem:[%s2655_s1] sm:$0xf]  ;;  %vm1197_vm0 = vcmask 261120  }
   0xf   : > { %s2700_s19 = smov (!%p239_p4, %s1641_s19), 1 }
  0x10   : > { %s2698_s20 = smov (!%p228_p3, %s1547_s20), 63  ;;  %v1846_v47 = vshrl.u32 %v438_v44, 7  ;;  %s241_s9 = scalar_lea.vmem %s2658_s4, %s2700_s19 }
  0x11   : > { %s1548_s21 = sshll.u32 %s2698_s20, 3  ;;  %s244_s12 = scalar_lea.vmem %s2659_s5, %s2700_s19 }
  0x12   : > { %s1654_s24 = scalar_lea.vmem %s2654_s0, %s1548_s21  ;;  %v440_v50 = vsub.s32 0, %v1846_v47  ;;  %s2131_s6 = scalar_lea.vmem %s2657_s3, %s1548_s21 }
  0x13   : > { %v1657_v1 = vld [vmem:[%s1654_s24 + $0x10] sm:$0xff]  ;;  %v1660_v2 = vld [vmem:[%s1654_s24] sm:$0xff]  ;;  %v1665_v3 = vld [vmem:[%s1654_s24 + $0x18] sm:$0xff] }
  0x14   : > { %290 = vperm.xlu1 %1567, %v1657_v1   ;;  %280 = vperm.xlu0 %1566, %v1660_v2   ;;  %v1668_v4 = vld [vmem:[%s1654_s24 + $0x8] sm:$0xff]  ;;  %v1676_v6 = vld [vmem:[%s1654_s24 + $0x20] sm:$0xff]  ;;  %v1681_v7 = vld [vmem:[%s1654_s24 + $0x38] sm:$0xff]  ;;  %v1868_v54 = vrot.slane %v1860_v51, %v440_v50 }
  0x15   : > { %v1673_v5 = vld [vmem:[%s1654_s24 + $0x28] sm:$0xff]  ;;  %v1684_v8 = vld [vmem:[%s1654_s24 + $0x30] sm:$0xff]  ;;  %v1692_v10 = vld [vmem:[%s1654_s24 + $0x40] sm:$0xff] }
  0x16   : > { %v1689_v9 = vld [vmem:[%s1654_s24 + $0x48] sm:$0xff]  ;;  %v1697_v11 = vld [vmem:[%s1654_s24 + $0x58] sm:$0xff]  ;;  %v1700_v12 = vld [vmem:[%s1654_s24 + $0x50] sm:$0xff] }
  0x17   : > { %v1705_v13 = vld [vmem:[%s1654_s24 + $0x68] sm:$0xff]  ;;  %v1708_v14 = vld [vmem:[%s1654_s24 + $0x60] sm:$0xff]  ;;  %v1713_v15 = vld [vmem:[%s1654_s24 + $0x78] sm:$0xff] }
  0x18   : > { %295 = vperm.xlu1 %1567, %v1665_v3   ;;  %285 = vperm.xlu0 %1566, %v1668_v4   ;;  %v1716_v16 = vld [vmem:[%s1654_s24 + $0x70] sm:$0xff]  ;;  %v1721_v17 = vld [vmem:[%s1654_s24 + $0x88] sm:$0xff]  ;;  %v1724_v18 = vld [vmem:[%s1654_s24 + $0x80] sm:$0xff] }
  0x19   : > { %v1729_v19 = vld [vmem:[%s1654_s24 + $0x98] sm:$0xff]  ;;  %v1732_v20 = vld [vmem:[%s1654_s24 + $0x90] sm:$0xff]  ;;  %v1737_v21 = vld [vmem:[%s1654_s24 + $0xa8] sm:$0xff] }
  0x1a   : > { %v1740_v22 = vld [vmem:[%s1654_s24 + $0xa0] sm:$0xff]  ;;  %v1745_v23 = vld [vmem:[%s1654_s24 + $0xb8] sm:$0xff]  ;;  %v1748_v24 = vld [vmem:[%s1654_s24 + $0xb0] sm:$0xff] }
  0x1b   : > { %v1753_v25 = vld [vmem:[%s1654_s24 + $0xc8] sm:$0xff]  ;;  %v1756_v26 = vld [vmem:[%s1654_s24 + $0xc0] sm:$0xff]  ;;  %v1761_v27 = vld [vmem:[%s1654_s24 + $0xd8] sm:$0xff] }
  0x1c   : > { %305 = vperm.xlu1 %1567, %v1673_v5   ;;  %300 = vperm.xlu0 %1566, %v1676_v6   ;;  %v1764_v28 = vld [vmem:[%s1654_s24 + $0xd0] sm:$0xff]  ;;  %v1769_v29 = vld [vmem:[%s1654_s24 + $0xe8] sm:$0xff]  ;;  %v1772_v30 = vld [vmem:[%s1654_s24 + $0xe0] sm:$0xff] }
  0x1d   : > { %v1777_v31 = vld [vmem:[%s1654_s24 + $0xf8] sm:$0xff]  ;;  %v1780_v32 = vld [vmem:[%s1654_s24 + $0xf0] sm:$0xff] }
  0x1e   : > { %2665 = vst [vmem:[#allocation2_spill] sm:$0xff] %v1777_v31 }
  0x20   : > { %315 = vperm.xlu1 %1567, %v1681_v7   ;;  %310 = vperm.xlu0 %1566, %v1684_v8  }
  0x24   : > { %325 = vperm.xlu1 %1567, %v1689_v9   ;;  %320 = vperm.xlu0 %1566, %v1692_v10  }
  0x28   : > { %335 = vperm.xlu1 %1567, %v1697_v11   ;;  %330 = vperm.xlu0 %1566, %v1700_v12  }
  0x2c   : > { %345 = vperm.xlu1 %1567, %v1705_v13   ;;  %340 = vperm.xlu0 %1566, %v1708_v14  }
  0x30   : > { %355 = vperm.xlu1 %1567, %v1713_v15   ;;  %350 = vperm.xlu0 %1566, %v1716_v16  }
  0x34   : > { %365 = vperm.xlu1 %1567, %v1721_v17   ;;  %360 = vperm.xlu0 %1566, %v1724_v18  }
  0x38   : > { %375 = vperm.xlu1 %1567, %v1729_v19   ;;  %370 = vperm.xlu0 %1566, %v1732_v20  }
  0x3c   : > { %385 = vperm.xlu1 %1567, %v1737_v21   ;;  %380 = vperm.xlu0 %1566, %v1740_v22  }
  0x40   : > { %395 = vperm.xlu1 %1567, %v1745_v23   ;;  %390 = vperm.xlu0 %1566, %v1748_v24  }
  0x44   : > { %405 = vperm.xlu1 %1567, %v1753_v25   ;;  %400 = vperm.xlu0 %1566, %v1756_v26  }
  0x48   : > { %415 = vperm.xlu1 %1567, %v1761_v27   ;;  %410 = vperm.xlu0 %1566, %v1764_v28  }
  0x4c   : > { %425 = vperm.xlu1 %1567, %v1769_v29   ;;  %420 = vperm.xlu0 %1566, %v1772_v30  }
  0x50   : > { %435 = vperm.xlu1 %1567, %v1777_v31   ;;  %430 = vperm.xlu0 %1566, %v1780_v32  }
  0x54   : > { %1569 = vset.pattern.permute.xlu1 %v1602_v33  ;;  %1568 = vset.pattern.permute.xlu0 %v1602_v33 }
  0x55   : > { %479 = vperm.xlu1 %1569, %v1668_v4   ;;  %475 = vperm.xlu0 %1568, %v1660_v2  }
  0x59   : > { %483 = vperm.xlu1 %1569, %v1657_v1   ;;  %487 = vperm.xlu0 %1568, %v1665_v3  }
  0x5d   : > { %491 = vperm.xlu1 %1569, %v1676_v6   ;;  %495 = vperm.xlu0 %1568, %v1673_v5  }
  0x61   : > { %499 = vperm.xlu1 %1569, %v1684_v8   ;;  %503 = vperm.xlu0 %1568, %v1681_v7  }
  0x65   : > { %507 = vperm.xlu1 %1569, %v1692_v10   ;;  %511 = vperm.xlu0 %1568, %v1689_v9  }
  0x69   : > { %515 = vperm.xlu1 %1569, %v1700_v12   ;;  %519 = vperm.xlu0 %1568, %v1697_v11  }
  0x6d   : > { %523 = vperm.xlu1 %1569, %v1708_v14   ;;  %527 = vperm.xlu0 %1568, %v1705_v13  }
  0x71   : > { %531 = vperm.xlu1 %1569, %v1716_v16   ;;  %535 = vperm.xlu0 %1568, %v1713_v15  }
  0x75   : > { %539 = vperm.xlu1 %1569, %v1724_v18   ;;  %543 = vperm.xlu0 %1568, %v1721_v17  }
  0x79   : > { %547 = vperm.xlu1 %1569, %v1732_v20   ;;  %551 = vperm.xlu0 %1568, %v1729_v19  }
  0x7d   : > { %555 = vperm.xlu1 %1569, %v1740_v22   ;;  %559 = vperm.xlu0 %1568, %v1737_v21  }
  0x81   : > { %563 = vperm.xlu1 %1569, %v1748_v24   ;;  %567 = vperm.xlu0 %1568, %v1745_v23  }
  0x85   : > { %571 = vperm.xlu1 %1569, %v1756_v26   ;;  %575 = vperm.xlu0 %1568, %v1753_v25  }
  0x89   : > { %579 = vperm.xlu1 %1569, %v1764_v28   ;;  %583 = vperm.xlu0 %1568, %v1761_v27  }
  0x8d   : > { %587 = vperm.xlu1 %1569, %v1772_v30   ;;  %591 = vperm.xlu0 %1568, %v1769_v29  }
  0x91   : > { %595 = vperm.xlu1 %1569, %v1780_v32   ;;  %599 = vperm.xlu0 %1568, %v1777_v31  }
  0x93   : > { %v1816_v34 = vpop.permute.xlu1 %290  ;;  %v1818_v35 = vpop.permute.xlu0 %280 }
  0x95   : > { %1570 = vset.pattern.permute.xlu1 %v2660_v36  ;;  %1572 = vset.pattern.permute.xlu0 %v2662_v37 }
  0x96   : > { %671 = vperm.xlu1 %1570, %v1660_v2   ;;  %871 = vperm.xlu0 %1572, %v1668_v4  }
  0x97   : > { %v1824_v38 = vpop.permute.xlu1 %295  ;;  %v1826_v39 = vpop.permute.xlu0 %285 }
  0x9a   : > { %679 = vperm.xlu1 %1570, %v1657_v1   ;;  %883 = vperm.xlu0 %1572, %v1676_v6  }
  0x9b   : > { %v1830_v40 = vpop.permute.xlu1 %305  ;;  %v1832_v41 = vpop.permute.xlu0 %300 }
  0x9e   : > { %683 = vperm.xlu1 %1570, %v1665_v3   ;;  %895 = vperm.xlu0 %1572, %v1681_v7  }
  0x9f   : > { %v1836_v42 = vpop.permute.xlu1 %315  ;;  %v1838_v43 = vpop.permute.xlu0 %310 }
  0xa2   : > { %691 = vperm.xlu1 %1570, %v1673_v5   ;;  %907 = vperm.xlu0 %1572, %v1700_v12  }
  0xa3   : > { %v1842_v45 = vpop.permute.xlu1 %325  ;;  %v1844_v46 = vpop.permute.xlu0 %320 }
  0xa4   : > { %2666 = vst [vmem:[#allocation3_spill] sm:$0xff] %v1842_v45 }
  0xa6   : > { %1571 = vset.pattern.permute.xlu1 %v2662_v37  ;;  %919 = vperm.xlu0 %1572, %v1705_v13  }
  0xa7   : > { %v1850_v48 = vpop.permute.xlu1 %335  ;;  %867 = vperm.xlu1 %1571, %v1660_v2   ;;  %v1853_v49 = vpop.permute.xlu0 %330 }
  0xa8   : > { %2667 = vst [vmem:[#allocation4_spill] sm:$0xff] %v1850_v48 }
  0xaa   : > { %931 = vperm.xlu0 %1572, %v1724_v18  }
  0xab   : > { %v1862_v52 = vpop.permute.xlu1 %345  ;;  %875 = vperm.xlu1 %1571, %v1657_v1   ;;  %v1865_v53 = vpop.permute.xlu0 %340 }
  0xac   : > { %2668 = vst [vmem:[#allocation5_spill] sm:$0xff] %v1862_v52  ;;  %2669 = vst [vmem:[#allocation6_spill] sm:$0xff] %v1865_v53  ;;  %v2675_v53 = vmov 2  }
  0xae   : > { %943 = vperm.xlu0 %1572, %v1729_v19  }
  0xaf   : > { %v1871_v55 = vpop.permute.xlu1 %355  ;;  %879 = vperm.xlu1 %1571, %v1665_v3   ;;  %v351_v56 = vpop.permute.xlu0 %350 }
  0xb0   : > { %v1875_v57 = vmul.f32 %v1868_v54, %v351_v56 }
  0xb2   : > { %1582 = vset.pattern.permute.xlu0 %v2660_v36 }
  0xb3   : > { %v1878_v58 = vpop.permute.xlu1 %365  ;;  %887 = vperm.xlu1 %1571, %v1673_v5   ;;  %675 = vperm.xlu0 %1582, %v1668_v4   ;;  %v1882_v59 = vpop.permute.xlu0 %360 }
  0xb4   : > { %2670 = vst [vmem:[#allocation7_spill] sm:$0xff] %v1882_v59 }
  0xb7   : > { %v1884_v60 = vpop.permute.xlu1 %375  ;;  %891 = vperm.xlu1 %1571, %v1684_v8   ;;  %687 = vperm.xlu0 %1582, %v1676_v6   ;;  %v371_v61 = vpop.permute.xlu0 %370 }
  0xb8   : > { %2671 = vst [vmem:[#allocation8_spill] sm:$0xff] %v1884_v60  ;;  %v1889_v62 = vmul.f32 %v1868_v54, %v371_v61  ;;  %v2676_v60 = vmov 3  }
  0xbb   : > { %v1891_v63 = vpop.permute.xlu1 %385  ;;  %1573 = vset.pattern.permute.xlu1 %v2660_v36  ;;  %695 = vperm.xlu0 %1582, %v1684_v8   ;;  %v381_v0 = vpop.permute.xlu0 %380 }
  0xbc   : > { %703 = vperm.xlu1 %1573, %v1692_v10   ;;  %v1897_v1 = vmul.f32 %v1868_v54, %v381_v0 }
  0xbf   : > { %v1899_v2 = vpop.permute.xlu1 %395  ;;  %699 = vperm.xlu0 %1582, %v1681_v7   ;;  %v1902_v3 = vpop.permute.xlu0 %390 }
  0xc0   : > { %707 = vperm.xlu1 %1573, %v1689_v9  }
  0xc3   : > { %v1905_v4 = vpop.permute.xlu1 %405  ;;  %711 = vperm.xlu0 %1582, %v1700_v12   ;;  %v401_v5 = vpop.permute.xlu0 %400 }
  0xc4   : > { %2672 = vst [vmem:[#allocation9_spill] sm:$0xff] %v1905_v4  ;;  %1574 = vset.pattern.permute.xlu1 %v2662_v37  ;;  %v1910_v6 = vmul.f32 %v1868_v54, %v401_v5 }
  0xc5   : > { %899 = vperm.xlu1 %1574, %v1692_v10  }
  0xc7   : > { %v1913_v8 = vpop.permute.xlu1 %415  ;;  %723 = vperm.xlu0 %1582, %v1705_v13   ;;  %v411_v7 = vpop.permute.xlu0 %410 }
  0xc8   : > { %v1917_v33 = vmul.f32 %v1868_v54, %v411_v7 }
  0xc9   : > { %903 = vperm.xlu1 %1574, %v1689_v9  }
  0xcb   : > { %v1920_v44 = vpop.permute.xlu1 %425  ;;  %735 = vperm.xlu0 %1582, %v1724_v18   ;;  %v421_v12 = vpop.permute.xlu0 %420 }
  0xcc   : > { %v1924_v50 = vmul.f32 %v1868_v54, %v421_v12 }
  0xcd   : > { %1575 = vset.pattern.permute.xlu1 %v2660_v36 }
  0xce   : > { %715 = vperm.xlu1 %1575, %v1697_v11  }
  0xcf   : > { %v1928_v10 = vpop.permute.xlu1 %435  ;;  %747 = vperm.xlu0 %1582, %v1729_v19   ;;  %v431_v13 = vpop.permute.xlu0 %430 }
  0xd0   : > { %v1932_v56 = vmul.f32 %v1868_v54, %v431_v13 }
  0xd2   : > { %719 = vperm.xlu1 %1575, %v1708_v14  }
  0xd3   : > { %759 = vperm.xlu0 %1582, %v1748_v24  }
  0xd4   : > { %v1936_v9 = vpop.permute.xlu1 %479  ;;  %v1938_v18 = vpop.permute.xlu0 %475 }
  0xd6   : > { %1576 = vset.pattern.permute.xlu1 %v2662_v37 }
  0xd7   : > { %911 = vperm.xlu1 %1576, %v1697_v11   ;;  %771 = vperm.xlu0 %1582, %v1753_v25  }
  0xd8   : > { %v1943_v61 = vpop.permute.xlu1 %483  ;;  %v1945_v19 = vpop.permute.xlu0 %487 }
  0xdb   : > { %915 = vperm.xlu1 %1576, %v1708_v14   ;;  %783 = vperm.xlu0 %1582, %v1772_v30  }
  0xdc   : > { %v1949_v0 = vpop.permute.xlu1 %491  ;;  %v1951_v5 = vpop.permute.xlu0 %495 }
  0xdf   : > { %1577 = vset.pattern.permute.xlu1 %v2660_v36  ;;  %1588 = vset.pattern.permute.xlu0 %v2662_v37 }
  0xe0   : > { %v1955_v7 = vpop.permute.xlu1 %499  ;;  %727 = vperm.xlu1 %1577, %v1716_v16   ;;  %955 = vperm.xlu0 %1588, %v1748_v24   ;;  %v1959_v11 = vpop.permute.xlu0 %503  ;;  %v604_v24 = vsub.s32 1, %v1846_v47 }
  0xe4   : > { %v1961_v12 = vpop.permute.xlu1 %507  ;;  %731 = vperm.xlu1 %1577, %v1713_v15   ;;  %967 = vperm.xlu0 %1588, %v1753_v25   ;;  %v1965_v14 = vpop.permute.xlu0 %511  ;;  %v1983_v25 = vrot.slane %v1860_v51, %v604_v24 }
  0xe8   : > { %v1967_v13 = vpop.permute.xlu1 %515  ;;  %1578 = vset.pattern.permute.xlu1 %v2662_v37  ;;  %979 = vperm.xlu0 %1588, %v1772_v30   ;;  %v1971_v36 = vpop.permute.xlu0 %519 }
  0xe9   : > { %2673 = vst [vmem:[#allocation10_spill] sm:$0xff] %v1971_v36  ;;  %923 = vperm.xlu1 %1578, %v1716_v16   ;;  %v457_v16 = vmul.f32 %v1868_v54, %v1871_v55  ;;  %v459_v55 = vmul.f32 %v1868_v54, %v1878_v58 }
  0xec   : > { %v1975_v4 = vpop.permute.xlu1 %523  ;;  %1591 = vset.pattern.permute.xlu0 %v2675_v53  ;;  %v1978_v48 = vpop.permute.xlu0 %527 }
  0xed   : > { %2674 = vst [vmem:[#allocation11_spill] sm:$0xff] %v1975_v4  ;;  %927 = vperm.xlu1 %1578, %v1713_v15   ;;  %795 = vperm.xlu0 %1591, %v1777_v31  }
  0xf0   : > { %v532_v30 = vpop.permute.xlu1 %531  ;;  %v536_v37 = vpop.permute.xlu0 %535 }
  0xf1   : > { %v620_v36 = vmul.f32 %v1983_v25, %v532_v30  ;;  %v621_v4 = vmul.f32 %v1983_v25, %v536_v37  ;;  %1579 = vset.pattern.permute.xlu1 %v2675_v53  ;;  %1592 = vset.pattern.permute.xlu0 %v2676_v60 }
  0xf2   : > { %739 = vperm.xlu1 %1579, %v1721_v17  }
  0xf3   : > { %v1993_v15 = vadd.f32 %v620_v36, %v1875_v57  ;;  %v1995_v24 = vadd.f32 %v621_v4, %v457_v16 }
  0xf4   : > { %v1997_v59 = vpop.permute.xlu1 %539  ;;  %v544_v31 = vpop.permute.xlu0 %543 }
  0xf5   : > { %v623_v30 = vmul.f32 %v1983_v25, %v544_v31  ;;  %v463_v31 = vmul.f32 %v1868_v54, %v1891_v63 }
  0xf6   : > { %743 = vperm.xlu1 %1579, %v1732_v20  }
  0xf7   : > { %v2003_v37 = vadd.f32 %v623_v30, %v459_v55 }
  0xf8   : > { %v548_v45 = vpop.permute.xlu1 %547  ;;  %v2005_v52 = vpop.permute.xlu0 %551 }
  0xf9   : > { %v624_v36 = vmul.f32 %v1983_v25, %v548_v45 }
  0xfa   : > { %1580 = vset.pattern.permute.xlu1 %v2676_v60 }
  0xfb   : > { %v2010_v57 = vadd.f32 %v624_v36, %v1889_v62  ;;  %935 = vperm.xlu1 %1580, %v1721_v17   ;;  %v465_v17 = vmul.f32 %v1868_v54, %v1899_v2 }
  0xfc   : > { %v556_v4 = vpop.permute.xlu1 %555  ;;  %v560_v58 = vpop.permute.xlu0 %559 }
  0xfd   : > { %2677 = vst [vmem:[#allocation12_spill] sm:$0xff] %v2010_v57  ;;  %v626_v16 = vmul.f32 %v1983_v25, %v556_v4  ;;  %v627_v55 = vmul.f32 %v1983_v25, %v560_v58  ;;  %v464_v57 = vmul.f32 %v1868_v54, %v1902_v3 }
  0xff   : > { %v2018_v30 = vadd.f32 %v626_v16, %v1897_v1  ;;  %v2020_v45 = vadd.f32 %v627_v55, %v463_v31  ;;  %939 = vperm.xlu1 %1580, %v1732_v20  }
 0x100   : > { %v564_v62 = vpop.permute.xlu1 %563  ;;  %v568_v36 = vpop.permute.xlu0 %567 }
 0x101   : > { %v628_v63 = vmul.f32 %v1983_v25, %v564_v62  ;;  %v629_v4 = vmul.f32 %v1983_v25, %v568_v36 }
 0x103   : > { %v2029_v58 = vadd.f32 %v628_v63, %v464_v57  ;;  %v2031_v1 = vadd.f32 %v629_v4, %v465_v17  ;;  %1581 = vset.pattern.permute.xlu1 %v2675_v53  ;;  %v469_v57 = vmul.f32 %v1868_v54, %v1913_v8 }
 0x104   : > { %v572_v31 = vpop.permute.xlu1 %571  ;;  %751 = vperm.xlu1 %1581, %v1740_v22   ;;  %v2035_v20 = vpop.permute.xlu0 %575 }
 0x105   : > { %v630_v2 = vmul.f32 %v1983_v25, %v572_v31  ;;  %v471_v31 = vmul.f32 %v1868_v54, %v1920_v44 }
 0x107   : > { %v2039_v16 = vadd.f32 %v630_v2, %v1910_v6 }
 0x108   : > { %v580_v3 = vpop.permute.xlu1 %579  ;;  %755 = vperm.xlu1 %1581, %v1737_v21   ;;  %v584_v55 = vpop.permute.xlu0 %583 }
 0x109   : > { %v632_v62 = vmul.f32 %v1983_v25, %v580_v3  ;;  %v633_v36 = vmul.f32 %v1983_v25, %v584_v55 }
 0x10b   : > { %v2047_v17 = vadd.f32 %v632_v62, %v1917_v33  ;;  %v2049_v63 = vadd.f32 %v633_v36, %v469_v57  ;;  %v473_v62 = vmul.f32 %v1868_v54, %v1928_v10 }
 0x10c   : > { %v588_v4 = vpop.permute.xlu1 %587  ;;  %1583 = vset.pattern.permute.xlu1 %v2676_v60  ;;  %v592_v6 = vpop.permute.xlu0 %591 }
 0x10d   : > { %2678 = vst [vmem:[#allocation13_spill] sm:$0xff] %v2049_v63  ;;  %v634_v2 = vmul.f32 %v1983_v25, %v588_v4  ;;  %v635_v8 = vmul.f32 %v1983_v25, %v592_v6  ;;  %947 = vperm.xlu1 %1583, %v1740_v22  }
 0x10f   : > { %v2058_v3 = vadd.f32 %v634_v2, %v1924_v50  ;;  %v2060_v33 = vadd.f32 %v635_v8, %v471_v31  ;;  %v800_v2 = vsub.s32 2, %v1846_v47 }
 0x110   : > { %v596_v55 = vpop.permute.xlu1 %595  ;;  %v600_v57 = vpop.permute.xlu0 %599 }
 0x111   : > { %2679 = vst [vmem:[#allocation14_spill] sm:$0xff] %v2060_v33  ;;  %v636_v36 = vmul.f32 %v1983_v25, %v596_v55  ;;  %v637_v44 = vmul.f32 %v1983_v25, %v600_v57  ;;  %951 = vperm.xlu1 %1583, %v1737_v21   ;;  %v996_v55 = vsub.s32 3, %v1846_v47  ;;  %v442_v57 = vmul.f32 %v1868_v54, %v1818_v35 }
 0x113   : > { %v2068_v4 = vadd.f32 %v636_v36, %v1932_v56  ;;  %v2070_v22 = vadd.f32 %v637_v44, %v473_v62  ;;  %v2084_v56 = vrot.slane %v1860_v51, %v800_v2  ;;  %v606_v62 = vmul.f32 %v1983_v25, %v1938_v18 }
 0x114   : > { %v444_v18 = vmul.f32 %v1868_v54, %v1816_v34 }
 0x115   : > { %2680 = vst [vmem:[#allocation15_spill] sm:$0xff] %v2068_v4  ;;  %2681 = vst [vmem:[#allocation16_spill] sm:$0xff] %v2070_v22  ;;  %1584 = vset.pattern.permute.xlu1 %v2675_v53  ;;  %v672_v50 = vpop.permute.xlu1 %671  ;;  %v2073_v6 = vpop.permute.xlu0 %871  ;;  %v2096_v4 = vrot.slane %v1860_v51, %v996_v55  ;;  %v638_v2 = vadd.f32 %v606_v62, %v442_v57 }
 0x116   : > { %763 = vperm.xlu1 %1584, %v1745_v23   ;;  %v802_v22 = vmul.f32 %v2084_v56, %v672_v50 }
 0x118   : > { %v834_v33 = vadd.f32 %v802_v22, %v638_v2 }
 0x119   : > { %v680_v31 = vpop.permute.xlu1 %679  ;;  %v2076_v10 = vpop.permute.xlu0 %883 }
 0x11a   : > { %767 = vperm.xlu1 %1584, %v1756_v26   ;;  %v804_v63 = vmul.f32 %v2084_v56, %v680_v31  ;;  %v445_v31 = vmul.f32 %v1868_v54, %v1824_v38 }
 0x11d   : > { %v684_v21 = vpop.permute.xlu1 %683  ;;  %v2080_v8 = vpop.permute.xlu0 %895 }
 0x11e   : > { %1585 = vset.pattern.permute.xlu1 %v2676_v60  ;;  %v805_v62 = vmul.f32 %v2084_v56, %v684_v21  ;;  %v443_v21 = vmul.f32 %v1868_v54, %v1826_v39 }
 0x11f   : > { %959 = vperm.xlu1 %1585, %v1745_v23   ;;  %v608_v23 = vmul.f32 %v1983_v25, %v1943_v61  ;;  %v609_v61 = vmul.f32 %v1983_v25, %v1945_v19 }
 0x121   : > { %v692_v36 = vpop.permute.xlu1 %691  ;;  %v2092_v44 = vpop.permute.xlu0 %907  ;;  %v640_v51 = vadd.f32 %v608_v23, %v444_v18  ;;  %v611_v23 = vmul.f32 %v1983_v25, %v1951_v5  ;;  %v641_v38 = vadd.f32 %v609_v61, %v445_v31  ;;  %v447_v5 = vmul.f32 %v1868_v54, %v1830_v40 }
 0x122   : > { %v607_v18 = vmul.f32 %v1983_v25, %v1936_v9 }
 0x123   : > { %963 = vperm.xlu1 %1585, %v1756_v26   ;;  %v2111_v26 = vld [vmem:[%s2656_s2] ss:$0 sm:$0xff]  ;;  %v836_v57 = vadd.f32 %v804_v63, %v640_v51 }
 0x124   : > { %v639_v9 = vadd.f32 %v607_v18, %v443_v21 }
 0x125   : > { %v2101_v47 = vpop.permute.xlu0 %919 }
 0x126   : > { %v868_v35 = vpop.permute.xlu1 %867 }
 0x127   : > { %v998_v50 = vmul.f32 %v2096_v4, %v868_v35  ;;  %1586 = vset.pattern.permute.xlu1 %v2675_v53 }
 0x128   : > { %775 = vperm.xlu1 %1586, %v1764_v28  }
 0x129   : > { %v1030_v34 = vadd.f32 %v998_v50, %v834_v33  ;;  %v2116_v22 = vpop.permute.xlu0 %931  ;;  %v807_v50 = vmul.f32 %v2084_v56, %v692_v36  ;;  %v999_v36 = vmul.f32 %v2096_v4, %v2073_v6 }
 0x12a   : > { %v876_v55 = vpop.permute.xlu1 %875 }
 0x12b   : > { %v1069_v2 = vadd.f32 %v2111_v26, %v1030_v34  ;;  %v1000_v35 = vmul.f32 %v2096_v4, %v876_v55  ;;  %v837_v34 = vadd.f32 %v805_v62, %v641_v38 }
 0x12c   : > { %779 = vperm.xlu1 %1586, %v1761_v27  }
 0x12d   : > { %vm1101_vm1 = vcmp.ge.f32.partialorder %v1069_v2, 0.0  ;;  %v1133_v19 = vmul.f32 0.2, %v1069_v2  ;;  %v1032_v63 = vadd.f32 %v1000_v35, %v836_v57  ;;  %v2133_v33 = vpop.permute.xlu0 %943  ;;  %v643_v57 = vadd.f32 %v611_v23, %v447_v5 }
 0x12e   : > { %v880_v51 = vpop.permute.xlu1 %879  ;;  %v446_v5 = vmul.f32 %v1868_v54, %v1832_v41 }
 0x12f   : > { %v2142_v55 = vsel %vm1101_vm1, %v1069_v2, %v1133_v19  ;;  %v1071_v61 = vadd.f32 %v2111_v26, %v1032_v63  ;;  %v1001_v31 = vmul.f32 %v2096_v4, %v880_v51  ;;  %v839_v62 = vadd.f32 %v807_v50, %v643_v57 }
 0x130   : > { %1198 = vst.msk [vmem:[%s2131_s6] sm:$0xff] %vm1197_vm0, %v2142_v55  ;;  %1587 = vset.pattern.permute.xlu1 %v2676_v60  ;;  %v448_v50 = vmul.f32 %v1868_v54, %v1838_v43  ;;  %v612_v51 = vmul.f32 %v1983_v25, %v1955_v7 }
 0x131   : > { %vm1103_vm2 = vcmp.ge.f32.partialorder %v1071_v61, 0.0  ;;  %v1135_v39 = vmul.f32 0.2, %v1071_v61  ;;  %v1033_v40 = vadd.f32 %v1001_v31, %v837_v34  ;;  %971 = vperm.xlu1 %1587, %v1764_v28   ;;  %v610_v28 = vmul.f32 %v1983_v25, %v1949_v0 }
 0x132   : > { %v888_v2 = vpop.permute.xlu1 %887  ;;  %v676_v35 = vpop.permute.xlu0 %675 }
 0x133   : > { %v2153_v38 = vsel %vm1103_vm2, %v1071_v61, %v1135_v39  ;;  %v1072_v23 = vadd.f32 %v2111_v26, %v1033_v40  ;;  %v1003_v19 = vmul.f32 %v2096_v4, %v888_v2  ;;  %v803_v63 = vmul.f32 %v2084_v56, %v676_v35 }
 0x134   : > { %1200 = vst.msk [vmem:[%s2131_s6 + $0x10] sm:$0xff] %vm1197_vm0, %v2153_v38  ;;  %v642_v57 = vadd.f32 %v610_v28, %v446_v5  ;;  %v1002_v39 = vmul.f32 %v2096_v4, %v2076_v10  ;;  %v644_v40 = vadd.f32 %v612_v51, %v448_v50  ;;  %v450_v28 = vmul.f32 %v1868_v54, %v1844_v46 }
 0x135   : > { %vm1104_vm3 = vcmp.ge.f32.partialorder %v1072_v23, 0.0  ;;  %v1136_v6 = vmul.f32 0.2, %v1072_v23  ;;  %v1035_v21 = vadd.f32 %v1003_v19, %v839_v62  ;;  %v835_v18 = vadd.f32 %v803_v63, %v639_v9  ;;  %975 = vperm.xlu1 %1587, %v1761_v27  }
 0x136   : > { %v892_v41 = vpop.permute.xlu1 %891  ;;  %v688_v34 = vpop.permute.xlu0 %687  ;;  %v613_v9 = vmul.f32 %v1983_v25, %v1959_v11  ;;  %v449_v19 = vmul.f32 %v1868_v54, %v1836_v42  ;;  %v614_v50 = vmul.f32 %v1983_v25, %v1961_v12  ;;  %v615_v12 = vmul.f32 %v1983_v25, %v1965_v14 }
 0x137   : > { %v2170_v61 = vsel %vm1104_vm3, %v1072_v23, %v1136_v6  ;;  %v1074_v0 = vadd.f32 %v2111_v26, %v1035_v21  ;;  %v1031_v31 = vadd.f32 %v999_v36, %v835_v18  ;;  %v806_v27 = vmul.f32 %v2084_v56, %v688_v34 }
 0x138   : > { %1201 = vst.msk [vmem:[%s2131_s6 + $0x18] sm:$0xff] %vm1197_vm0, %v2170_v61  ;;  %v1004_v63 = vmul.f32 %v2096_v4, %v892_v41  ;;  %v452_v6 = vmul.f32 %v1868_v54, %v1853_v49  ;;  %v645_v42 = vadd.f32 %v613_v9, %v449_v19  ;;  %v616_v49 = vmul.f32 %v1983_v25, %v1967_v13 }
 0x139   : > { %vm1106_vm4 = vcmp.ge.f32.partialorder %v1074_v0, 0.0  ;;  %v1138_v43 = vmul.f32 0.2, %v1074_v0  ;;  %v1070_v7 = vadd.f32 %v2111_v26, %v1031_v31  ;;  %1589 = vset.pattern.permute.xlu1 %v2675_v53  ;;  %v838_v36 = vadd.f32 %v806_v27, %v642_v57 }
 0x13a   : > { %787 = vperm.xlu1 %1589, %v1769_v29   ;;  %v696_v10 = vpop.permute.xlu0 %695  ;;  %v1005_v34 = vmul.f32 %v2096_v4, %v2080_v8  ;;  %v619_v13 = vmul.f32 %v1983_v25, %v1978_v48  ;;  %v1008_v14 = vmul.f32 %v2096_v4, %v2092_v44 }
 0x13b   : > { %v2184_v62 = vsel %vm1106_vm4, %v1074_v0, %v1138_v43  ;;  %vm1102_vm5 = vcmp.ge.f32.partialorder %v1070_v7, 0.0  ;;  %v1134_v2 = vmul.f32 0.2, %v1070_v7  ;;  %v808_v35 = vmul.f32 %v2084_v56, %v696_v10  ;;  %v704_v23 = vpop.permute.xlu1 %703  ;;  %v2682_v10 = vld [vmem:[#allocation5_spill] sm:$0xff] }
 0x13c   : > { %1203 = vst.msk [vmem:[%s2131_s6 + $0x28] sm:$0xff] %vm1197_vm0, %v2184_v62  ;;  %v1034_v53 = vadd.f32 %v1002_v39, %v838_v36  ;;  %v810_v57 = vmul.f32 %v2084_v56, %v704_v23 }
 0x13d   : > { %v2192_v11 = vsel %vm1102_vm5, %v1070_v7, %v1134_v2  ;;  %v840_v5 = vadd.f32 %v808_v35, %v644_v40  ;;  %v646_v7 = vadd.f32 %v614_v50, %v450_v28  ;;  %v648_v40 = vadd.f32 %v616_v49, %v452_v6 }
 0x13e   : > { %1199 = vst.msk [vmem:[%s2131_s6 + $0x8] sm:$0xff] %vm1197_vm0, %v2192_v11  ;;  %v1073_v21 = vadd.f32 %v2111_v26, %v1034_v53  ;;  %791 = vperm.xlu1 %1589, %v1780_v32   ;;  %v700_v18 = vpop.permute.xlu0 %699  ;;  %v455_v2 = vmul.f32 %v1868_v54, %v2682_v10  ;;  %v2683_v53 = vld [vmem:[#allocation3_spill] sm:$0xff]  ;;  %v1011_v6 = vmul.f32 %v2096_v4, %v2101_v47 }
 0x13f   : > { %v1036_v51 = vadd.f32 %v1004_v63, %v840_v5  ;;  %v809_v41 = vmul.f32 %v2084_v56, %v700_v18  ;;  %v708_v46 = vpop.permute.xlu1 %707  ;;  %v842_v48 = vadd.f32 %v810_v57, %v646_v7  ;;  %v451_v19 = vmul.f32 %v1868_v54, %v2683_v53  ;;  %v2685_v7 = vld [vmem:[#allocation7_spill] sm:$0xff]  ;;  %v2686_v53 = vld [vmem:[#allocation8_spill] sm:$0xff] }
 0x140   : > { %vm1105_vm6 = vcmp.ge.f32.partialorder %v1073_v21, 0.0  ;;  %v1137_v0 = vmul.f32 0.2, %v1073_v21  ;;  %v811_v44 = vmul.f32 %v2084_v56, %v708_v46  ;;  %v651_v28 = vadd.f32 %v619_v13, %v455_v2 }
 0x141   : > { %v1075_v31 = vadd.f32 %v2111_v26, %v1036_v51  ;;  %v841_v39 = vadd.f32 %v809_v41, %v645_v42  ;;  %v647_v42 = vadd.f32 %v615_v12, %v451_v19  ;;  %v458_v13 = vmul.f32 %v1868_v54, %v2685_v7 }
 0x142   : > { %v2215_v27 = vsel %vm1105_vm6, %v1073_v21, %v1137_v0  ;;  %1590 = vset.pattern.permute.xlu1 %v2676_v60  ;;  %v712_v43 = vpop.permute.xlu0 %711  ;;  %v622_v0 = vmul.f32 %v1983_v25, %v1997_v59  ;;  %v1014_v2 = vmul.f32 %v2096_v4, %v2116_v22  ;;  %v461_v19 = vmul.f32 %v1868_v54, %v2686_v53 }
 0x143   : > { %1202 = vst.msk [vmem:[%s2131_s6 + $0x20] sm:$0xff] %vm1197_vm0, %v2215_v27  ;;  %vm1107_vm7 = vcmp.ge.f32.partialorder %v1075_v31, 0.0  ;;  %v1139_v8 = vmul.f32 0.2, %v1075_v31  ;;  %983 = vperm.xlu1 %1590, %v1769_v29   ;;  %v1037_v9 = vadd.f32 %v1005_v34, %v841_v39  ;;  %v812_v60 = vmul.f32 %v2084_v56, %v712_v43  ;;  %v2684_v43 = vld [vmem:[#allocation2_spill] sm:$0xff] }
 0x144   : > { %v900_v36 = vpop.permute.xlu1 %899  ;;  %v654_v10 = vadd.f32 %v622_v0, %v458_v13 }
 0x145   : > { %v2229_v35 = vsel %vm1107_vm7, %v1075_v31, %v1139_v8  ;;  %v1006_v23 = vmul.f32 %v2096_v4, %v900_v36  ;;  %v1076_v29 = vadd.f32 %v2111_v26, %v1037_v9  ;;  %v844_v63 = vadd.f32 %v812_v60, %v648_v40 }
 0x146   : > { %1204 = vst.msk [vmem:[%s2131_s6 + $0x30] sm:$0xff] %vm1197_vm0, %v2229_v35  ;;  %v724_v5 = vpop.permute.xlu0 %723  ;;  %v843_v31 = vadd.f32 %v811_v44, %v647_v42  ;;  %v625_v40 = vmul.f32 %v1983_v25, %v2005_v52  ;;  %v2687_v44 = vld [vmem:[#allocation10_spill] sm:$0xff] }
 0x147   : > { %v1038_v21 = vadd.f32 %v1006_v23, %v842_v48  ;;  %v815_v18 = vmul.f32 %v2084_v56, %v724_v5  ;;  %987 = vperm.xlu1 %1590, %v1780_v32   ;;  %vm1108_vm8 = vcmp.ge.f32.partialorder %v1076_v29, 0.0  ;;  %v1140_v50 = vmul.f32 0.2, %v1076_v29 }
 0x148   : > { %v1040_v51 = vadd.f32 %v1008_v14, %v844_v63  ;;  %v904_v41 = vpop.permute.xlu1 %903  ;;  %v617_v22 = vmul.f32 %v1983_v25, %v2687_v44 }
 0x149   : > { %v1077_v49 = vadd.f32 %v2111_v26, %v1038_v21  ;;  %v847_v46 = vadd.f32 %v815_v18, %v651_v28  ;;  %v1007_v34 = vmul.f32 %v2096_v4, %v904_v41  ;;  %v2247_v47 = vsel %vm1108_vm8, %v1076_v29, %v1140_v50 }
 0x14a   : > { %v1079_v57 = vadd.f32 %v2111_v26, %v1040_v51  ;;  %v736_v39 = vpop.permute.xlu0 %735  ;;  %1205 = vst.msk [vmem:[%s2131_s6 + $0x38] sm:$0xff] %vm1197_vm0, %v2247_v47  ;;  %v657_v28 = vadd.f32 %v625_v40, %v461_v19 }
 0x14b   : > { %vm1109_vm9 = vcmp.ge.f32.partialorder %v1077_v49, 0.0  ;;  %v1141_v32 = vmul.f32 0.2, %v1077_v49  ;;  %v1043_v12 = vadd.f32 %v1011_v6, %v847_v46  ;;  %991 = vperm.xlu1 %1590, %v2684_v43   ;;  %v1039_v8 = vadd.f32 %v1007_v34, %v843_v31  ;;  %v2689_v31 = vld [vmem:[#allocation6_spill] sm:$0xff] }
 0x14c   : > { %vm1111_vm10 = vcmp.ge.f32.partialorder %v1079_v57, 0.0  ;;  %v1143_v59 = vmul.f32 0.2, %v1079_v57  ;;  %v818_v60 = vmul.f32 %v2084_v56, %v736_v39  ;;  %v1017_v6 = vmul.f32 %v2096_v4, %v2133_v33 }
 0x14d   : > { %v2258_v14 = vsel %vm1109_vm9, %v1077_v49, %v1141_v32  ;;  %v1082_v9 = vadd.f32 %v2111_v26, %v1043_v12  ;;  %v716_v36 = vpop.permute.xlu1 %715  ;;  %v1078_v23 = vadd.f32 %v2111_v26, %v1039_v8  ;;  %v2688_v49 = vld [vmem:[#allocation4_spill] sm:$0xff]  ;;  %v2690_v32 = vld [vmem:[#allocation11_spill] sm:$0xff] }
 0x14e   : > { %v2264_v48 = vsel %vm1111_vm10, %v1079_v57, %v1143_v59  ;;  %1206 = vst.msk [vmem:[%s2131_s6 + $0x40] sm:$0xff] %vm1197_vm0, %v2258_v14  ;;  %v748_v52 = vpop.permute.xlu0 %747  ;;  %v850_v5 = vadd.f32 %v818_v60, %v654_v10  ;;  %v453_v46 = vmul.f32 %v1868_v54, %v2688_v49  ;;  %v813_v33 = vmul.f32 %v2084_v56, %v716_v36 }
 0x14f   : > { %1208 = vst.msk [vmem:[%s2131_s6 + $0x50] sm:$0xff] %vm1197_vm0, %v2264_v48  ;;  %vm1114_vm11 = vcmp.ge.f32.partialorder %v1082_v9, 0.0  ;;  %v1146_v29 = vmul.f32 0.2, %v1082_v9  ;;  %vm1110_vm12 = vcmp.ge.f32.partialorder %v1078_v23, 0.0  ;;  %v821_v18 = vmul.f32 %v2084_v56, %v748_v52 }
 0x150   : > { %v1142_v63 = vmul.f32 0.2, %v1078_v23  ;;  %v1046_v51 = vadd.f32 %v1014_v2, %v850_v5  ;;  %v454_v57 = vmul.f32 %v1868_v54, %v2689_v31  ;;  %v649_v39 = vadd.f32 %v617_v22, %v453_v46  ;;  %v2691_v46 = vld [vmem:[#allocation9_spill] sm:$0xff] }
 0x151   : > { %v2279_v21 = vsel %vm1114_vm11, %v1082_v9, %v1146_v29  ;;  %v720_v42 = vpop.permute.xlu1 %719  ;;  %v853_v34 = vadd.f32 %v821_v18, %v657_v28  ;;  %v618_v12 = vmul.f32 %v1983_v25, %v2690_v32 }
 0x152   : > { %1211 = vst.msk [vmem:[%s2131_s6 + $0x68] sm:$0xff] %vm1197_vm0, %v2279_v21  ;;  %v2285_v50 = vsel %vm1110_vm12, %v1078_v23, %v1142_v63  ;;  %v760_v41 = vpop.permute.xlu0 %759  ;;  %v1085_v0 = vadd.f32 %v2111_v26, %v1046_v51  ;;  %v845_v8 = vadd.f32 %v813_v33, %v649_v39  ;;  %v814_v9 = vmul.f32 %v2084_v56, %v720_v42 }
 0x153   : > { %1207 = vst.msk [vmem:[%s2131_s6 + $0x48] sm:$0xff] %vm1197_vm0, %v2285_v50  ;;  %v1049_v43 = vadd.f32 %v1017_v6, %v853_v34  ;;  %v650_v10 = vadd.f32 %v618_v12, %v454_v57  ;;  %v824_v63 = vmul.f32 %v2084_v56, %v760_v41  ;;  %v631_v6 = vmul.f32 %v1983_v25, %v2035_v20 }
 0x154   : > { %vm1117_vm13 = vcmp.ge.f32.partialorder %v1085_v0, 0.0  ;;  %v1149_v7 = vmul.f32 0.2, %v1085_v0  ;;  %v467_v33 = vmul.f32 %v1868_v54, %v2691_v46 }
 0x155   : > { %v1088_v40 = vadd.f32 %v2111_v26, %v1049_v43  ;;  %v846_v29 = vadd.f32 %v814_v9, %v650_v10  ;;  %v856_v34 = vadd.f32 %v824_v63, %v2029_v58 }
 0x156   : > { %v912_v13 = vpop.permute.xlu1 %911  ;;  %v772_v59 = vpop.permute.xlu0 %771  ;;  %v2301_v36 = vsel %vm1117_vm13, %v1085_v0, %v1149_v7  ;;  %v663_v20 = vadd.f32 %v631_v6, %v467_v33 }
 0x157   : > { %v1009_v60 = vmul.f32 %v2096_v4, %v912_v13  ;;  %1214 = vst.msk [vmem:[%s2131_s6 + $0x80] sm:$0xff] %vm1197_vm0, %v2301_v36  ;;  %vm1120_vm14 = vcmp.ge.f32.partialorder %v1088_v40, 0.0  ;;  %v1152_v2 = vmul.f32 0.2, %v1088_v40  ;;  %v827_v41 = vmul.f32 %v2084_v56, %v772_v59 }
 0x159   : > { %v1041_v23 = vadd.f32 %v1009_v60, %v845_v8  ;;  %v2306_v19 = vsel %vm1120_vm14, %v1088_v40, %v1152_v2  ;;  %v859_v12 = vadd.f32 %v827_v41, %v663_v20 }
 0x15a   : > { %v916_v52 = vpop.permute.xlu1 %915  ;;  %v784_v53 = vpop.permute.xlu0 %783  ;;  %1217 = vst.msk [vmem:[%s2131_s6 + $0x98] sm:$0xff] %vm1197_vm0, %v2306_v19 }
 0x15b   : > { %v1080_v44 = vadd.f32 %v2111_v26, %v1041_v23  ;;  %v1010_v22 = vmul.f32 %v2096_v4, %v916_v52  ;;  %v830_v54 = vmul.f32 %v2084_v56, %v784_v53 }
 0x15d   : > { %vm1112_vm15 = vcmp.ge.f32.partialorder %v1080_v44, 0.0  ;;  %v1144_v5 = vmul.f32 0.2, %v1080_v44  ;;  %v1042_v28 = vadd.f32 %v1010_v22, %v846_v29  ;;  %v862_v40 = vadd.f32 %v830_v54, %v2058_v3 }
 0x15f   : > { %v2316_v18 = vsel %vm1112_vm15, %v1080_v44, %v1144_v5  ;;  %v1081_v42 = vadd.f32 %v2111_v26, %v1042_v28  ;;  %v728_v51 = vpop.permute.xlu1 %727  ;;  %v956_v49 = vpop.permute.xlu0 %955 }
 0x160   : > { %1209 = vst.msk [vmem:[%s2131_s6 + $0x58] sm:$0xff] %vm1197_vm0, %v2316_v18  ;;  %v1020_v0 = vmul.f32 %v2096_v4, %v956_v49  ;;  %v816_v7 = vmul.f32 %v2084_v56, %v728_v51 }
 0x161   : > { %vm1113_vm1 = vcmp.ge.f32.partialorder %v1081_v42, 0.0  ;;  %v1145_v25 = vmul.f32 0.2, %v1081_v42 }
 0x162   : > { %v1052_v31 = vadd.f32 %v1020_v0, %v856_v34  ;;  %v848_v23 = vadd.f32 %v816_v7, %v1993_v15 }
 0x163   : > { %v2327_v57 = vsel %vm1113_vm1, %v1081_v42, %v1145_v25  ;;  %v732_v39 = vpop.permute.xlu1 %731  ;;  %v968_v32 = vpop.permute.xlu0 %967  ;;  %v1231_v42 = vsel %vm1197_vm0, %v2192_v11, 0.0 }
 0x164   : > { %1210 = vst.msk [vmem:[%s2131_s6 + $0x60] sm:$0xff] %vm1197_vm0, %v2327_v57  ;;  %v1091_v58 = vadd.f32 %v2111_v26, %v1052_v31  ;;  %v1023_v43 = vmul.f32 %v2096_v4, %v968_v32  ;;  %v817_v52 = vmul.f32 %v2084_v56, %v732_v39  ;;  %v1233_v31 = vsel %vm1197_vm0, %v2153_v38, 0.0 }
 0x166   : > { %vm1123_vm2 = vcmp.ge.f32.partialorder %v1091_v58, 0.0  ;;  %v1155_v13 = vmul.f32 0.2, %v1091_v58  ;;  %v1055_v59 = vadd.f32 %v1023_v43, %v859_v12  ;;  %v849_v28 = vadd.f32 %v817_v52, %v1995_v24 }
 0x167   : > { %v980_v8 = vpop.permute.xlu0 %979  ;;  %v1230_v24 = vsel %vm1197_vm0, %v2142_v55, 0.0 }
 0x168   : > { %v2337_v9 = vsel %vm1123_vm2, %v1091_v58, %v1155_v13  ;;  %v1094_v60 = vadd.f32 %v2111_v26, %v1055_v59  ;;  %v1026_v10 = vmul.f32 %v2096_v4, %v980_v8  ;;  %v924_v2 = vpop.permute.xlu1 %923  ;;  %v1232_v34 = vadd.f32 %v1231_v42, %v1230_v24 }
 0x169   : > { %1220 = vst.msk [vmem:[%s2131_s6 + $0xb0] sm:$0xff] %vm1197_vm0, %v2337_v9  ;;  %v1012_v53 = vmul.f32 %v2096_v4, %v924_v2  ;;  %v1235_v58 = vsel %vm1197_vm0, %v2170_v61, 0.0 }
 0x16a   : > { %vm1126_vm3 = vcmp.ge.f32.partialorder %v1094_v60, 0.0  ;;  %v1158_v29 = vmul.f32 0.2, %v1094_v60  ;;  %v1058_v3 = vadd.f32 %v1026_v10, %v862_v40  ;;  %v1234_v39 = vadd.f32 %v1233_v31, %v1232_v34 }
 0x16b   : > { %v1044_v44 = vadd.f32 %v1012_v53, %v848_v23  ;;  %v1237_v40 = vsel %vm1197_vm0, %v2215_v27, 0.0  ;;  %v2692_v23 = vld [vmem:[#allocation12_spill] sm:$0xff]  ;;  %v1245_v34 = vsel %vm1197_vm0, %v2258_v14, 0.0 }
 0x16c   : > { %v2347_v22 = vsel %vm1126_vm3, %v1094_v60, %v1158_v29  ;;  %v1097_v63 = vadd.f32 %v2111_v26, %v1058_v3  ;;  %v928_v5 = vpop.permute.xlu1 %927  ;;  %v1236_v43 = vadd.f32 %v1235_v58, %v1234_v39  ;;  %vm1299_vm3 = vcmask 253952  }
 0x16d   : > { %1223 = vst.msk [vmem:[%s2131_s6 + $0xc8] sm:$0xff] %vm1197_vm0, %v2347_v22  ;;  %v1083_v15 = vadd.f32 %v2111_v26, %v1044_v44  ;;  %v1013_v6 = vmul.f32 %v2096_v4, %v928_v5 }
 0x16e   : > { %vm1129_vm4 = vcmp.ge.f32.partialorder %v1097_v63, 0.0  ;;  %v1161_v51 = vmul.f32 0.2, %v1097_v63  ;;  %v1238_v60 = vadd.f32 %v1237_v40, %v1236_v43 }
 0x16f   : > { %vm1115_vm5 = vcmp.ge.f32.partialorder %v1083_v15, 0.0  ;;  %v1147_v49 = vmul.f32 0.2, %v1083_v15  ;;  %v1045_v46 = vadd.f32 %v1013_v6, %v849_v28  ;;  %v1241_v6 = vsel %vm1197_vm0, %v2229_v35, 0.0 }
 0x170   : > { %v2360_v33 = vsel %vm1129_vm4, %v1097_v63, %v1161_v51 }
 0x171   : > { %1226 = vst.msk [vmem:[%s2131_s6 + $0xe0] sm:$0xff] %vm1197_vm0, %v2360_v33  ;;  %v2365_v41 = vsel %vm1115_vm5, %v1083_v15, %v1147_v49  ;;  %v1084_v0 = vadd.f32 %v2111_v26, %v1045_v46  ;;  %v740_v25 = vpop.permute.xlu1 %739  ;;  %v1243_v49 = vsel %vm1197_vm0, %v2247_v47, 0.0 }
 0x172   : > { %1212 = vst.msk [vmem:[%s2131_s6 + $0x70] sm:$0xff] %vm1197_vm0, %v2365_v41  ;;  %v819_v54 = vmul.f32 %v2084_v56, %v740_v25 }
 0x173   : > { %vm1116_vm6 = vcmp.ge.f32.partialorder %v1084_v0, 0.0  ;;  %v1148_v20 = vmul.f32 0.2, %v1084_v0 }
 0x174   : > { %v851_v13 = vadd.f32 %v819_v54, %v2003_v37  ;;  %v1239_v37 = vsel %vm1197_vm0, %v2184_v62, 0.0 }
 0x175   : > { %v2373_v32 = vsel %vm1116_vm6, %v1084_v0, %v1148_v20  ;;  %v744_v12 = vpop.permute.xlu1 %743  ;;  %v1240_v3 = vadd.f32 %v1239_v37, %v1238_v60  ;;  %v1247_v20 = vsel %vm1197_vm0, %v2285_v50, 0.0 }
 0x176   : > { %1213 = vst.msk [vmem:[%s2131_s6 + $0x78] sm:$0xff] %vm1197_vm0, %v2373_v32  ;;  %v820_v59 = vmul.f32 %v2084_v56, %v744_v12 }
 0x177   : > { %v1242_v42 = vadd.f32 %v1241_v6, %v1240_v3 }
 0x178   : > { %v852_v52 = vadd.f32 %v820_v59, %v2692_v23  ;;  %v1251_v59 = vsel %vm1197_vm0, %v2316_v18, 0.0 }
 0x179   : > { %v1244_v0 = vadd.f32 %v1243_v49, %v1242_v42 }
 0x17a   : > { %v936_v7 = vpop.permute.xlu1 %935 }
 0x17b   : > { %v1015_v8 = vmul.f32 %v2096_v4, %v936_v7  ;;  %v1246_v31 = vadd.f32 %v1245_v34, %v1244_v0 }
 0x17d   : > { %v1047_v10 = vadd.f32 %v1015_v8, %v851_v13  ;;  %v1248_v12 = vadd.f32 %v1247_v20, %v1246_v31  ;;  %v1249_v13 = vsel %vm1197_vm0, %v2264_v48, 0.0 }
 0x17e   : > { %v940_v2 = vpop.permute.xlu1 %939 }
 0x17f   : > { %v1086_v53 = vadd.f32 %v2111_v26, %v1047_v10  ;;  %v1016_v29 = vmul.f32 %v2096_v4, %v940_v2  ;;  %v1250_v40 = vadd.f32 %v1249_v13, %v1248_v12  ;;  %v1253_v2 = vsel %vm1197_vm0, %v2327_v57, 0.0 }
 0x181   : > { %vm1118_vm7 = vcmp.ge.f32.partialorder %v1086_v53, 0.0  ;;  %v1150_v44 = vmul.f32 0.2, %v1086_v53  ;;  %v1048_v63 = vadd.f32 %v1016_v29, %v852_v52  ;;  %v1252_v23 = vadd.f32 %v1251_v59, %v1250_v40 }
 0x183   : > { %v2391_v5 = vsel %vm1118_vm7, %v1086_v53, %v1150_v44  ;;  %v1087_v28 = vadd.f32 %v2111_v26, %v1048_v63  ;;  %v752_v15 = vpop.permute.xlu1 %751  ;;  %v1254_v29 = vadd.f32 %v1253_v2, %v1252_v23  ;;  %v1255_v63 = vsel %vm1197_vm0, %v2279_v21, 0.0 }
 0x184   : > { %1215 = vst.msk [vmem:[%s2131_s6 + $0x88] sm:$0xff] %vm1197_vm0, %v2391_v5  ;;  %v822_v25 = vmul.f32 %v2084_v56, %v752_v15  ;;  %v1263_v12 = vsel %vm1197_vm0, %v2391_v5, 0.0 }
 0x185   : > { %vm1119_vm8 = vcmp.ge.f32.partialorder %v1087_v28, 0.0  ;;  %v1151_v51 = vmul.f32 0.2, %v1087_v28  ;;  %v1256_v15 = vadd.f32 %v1255_v63, %v1254_v29 }
 0x186   : > { %v854_v54 = vadd.f32 %v822_v25, %v2018_v30 }
 0x187   : > { %v2401_v46 = vsel %vm1119_vm8, %v1087_v28, %v1151_v51  ;;  %v756_v24 = vpop.permute.xlu1 %755  ;;  %v1257_v28 = vsel %vm1197_vm0, %v2365_v41, 0.0  ;;  %v1259_v51 = vsel %vm1197_vm0, %v2373_v32, 0.0 }
 0x188   : > { %1216 = vst.msk [vmem:[%s2131_s6 + $0x90] sm:$0xff] %vm1197_vm0, %v2401_v46  ;;  %v823_v58 = vmul.f32 %v2084_v56, %v756_v24  ;;  %v1258_v49 = vadd.f32 %v1257_v28, %v1256_v15 }
 0x18a   : > { %v855_v60 = vadd.f32 %v823_v58, %v2020_v45  ;;  %v1260_v34 = vadd.f32 %v1259_v51, %v1258_v49 }
 0x18c   : > { %v948_v39 = vpop.permute.xlu1 %947 }
 0x18d   : > { %v1018_v43 = vmul.f32 %v2096_v4, %v948_v39  ;;  %v1261_v39 = vsel %vm1197_vm0, %v2301_v36, 0.0 }
 0x18f   : > { %v1050_v7 = vadd.f32 %v1018_v43, %v854_v54  ;;  %v1262_v54 = vadd.f32 %v1261_v39, %v1260_v34  ;;  %v1265_v43 = vsel %vm1197_vm0, %v2401_v46, 0.0 }
 0x190   : > { %v952_v8 = vpop.permute.xlu1 %951 }
 0x191   : > { %v1089_v10 = vadd.f32 %v2111_v26, %v1050_v7  ;;  %v1019_v30 = vmul.f32 %v2096_v4, %v952_v8  ;;  %v1264_v13 = vadd.f32 %v1263_v12, %v1262_v54 }
 0x193   : > { %vm1121_vm9 = vcmp.ge.f32.partialorder %v1089_v10, 0.0  ;;  %v1153_v52 = vmul.f32 0.2, %v1089_v10  ;;  %v1051_v53 = vadd.f32 %v1019_v30, %v855_v60  ;;  %v1266_v40 = vadd.f32 %v1265_v43, %v1264_v13 }
 0x195   : > { %v2423_v37 = vsel %vm1121_vm9, %v1089_v10, %v1153_v52  ;;  %v1090_v3 = vadd.f32 %v2111_v26, %v1051_v53  ;;  %v764_v44 = vpop.permute.xlu1 %763  ;;  %v1267_v52 = vsel %vm1197_vm0, %v2306_v19, 0.0 }
 0x196   : > { %1218 = vst.msk [vmem:[%s2131_s6 + $0xa0] sm:$0xff] %vm1197_vm0, %v2423_v37  ;;  %v825_v24 = vmul.f32 %v2084_v56, %v764_v44  ;;  %v1268_v53 = vadd.f32 %v1267_v52, %v1266_v40 }
 0x197   : > { %vm1122_vm10 = vcmp.ge.f32.partialorder %v1090_v3, 0.0  ;;  %v1154_v45 = vmul.f32 0.2, %v1090_v3 }
 0x198   : > { %v857_v25 = vadd.f32 %v825_v24, %v2031_v1 }
 0x199   : > { %v2433_v6 = vsel %vm1122_vm10, %v1090_v3, %v1154_v45  ;;  %v768_v42 = vpop.permute.xlu1 %767 }
 0x19a   : > { %1219 = vst.msk [vmem:[%s2131_s6 + $0xa8] sm:$0xff] %vm1197_vm0, %v2433_v6  ;;  %v826_v20 = vmul.f32 %v2084_v56, %v768_v42  ;;  %v1271_v3 = vsel %vm1197_vm0, %v2433_v6, 0.0  ;;  %v1273_v42 = vsel %vm1197_vm0, %v2337_v9, 0.0 }
 0x19c   : > { %v858_v1 = vadd.f32 %v826_v20, %v2039_v16  ;;  %v1269_v16 = vsel %vm1197_vm0, %v2423_v37, 0.0 }
 0x19d   : > { %v1270_v44 = vadd.f32 %v1269_v16, %v1268_v53 }
 0x19e   : > { %v960_v0 = vpop.permute.xlu1 %959 }
 0x19f   : > { %v1021_v31 = vmul.f32 %v2096_v4, %v960_v0  ;;  %v1272_v28 = vadd.f32 %v1271_v3, %v1270_v44 }
 0x1a1   : > { %v1053_v58 = vadd.f32 %v1021_v31, %v857_v25  ;;  %v1274_v24 = vadd.f32 %v1273_v42, %v1272_v28  ;;  %v796_v28 = vpop.permute.xlu0 %795 }
 0x1a2   : > { %v964_v7 = vpop.permute.xlu1 %963 }
 0x1a3   : > { %v1092_v59 = vadd.f32 %v2111_v26, %v1053_v58  ;;  %v1022_v8 = vmul.f32 %v2096_v4, %v964_v7  ;;  %v2693_v58 = vld [vmem:[#allocation13_spill] sm:$0xff] }
 0x1a5   : > { %vm1124_vm11 = vcmp.ge.f32.partialorder %v1092_v59, 0.0  ;;  %v1156_v60 = vmul.f32 0.2, %v1092_v59  ;;  %v1054_v10 = vadd.f32 %v1022_v8, %v858_v1 }
 0x1a7   : > { %v2453_v30 = vsel %vm1124_vm11, %v1092_v59, %v1156_v60  ;;  %v1093_v2 = vadd.f32 %v2111_v26, %v1054_v10  ;;  %v776_v23 = vpop.permute.xlu1 %775  ;;  %v1279_v59 = vsel %vm1197_vm0, %v2347_v22, 0.0 }
 0x1a8   : > { %1221 = vst.msk [vmem:[%s2131_s6 + $0xb8] sm:$0xff] %vm1197_vm0, %v2453_v30  ;;  %v828_v15 = vmul.f32 %v2084_v56, %v776_v23  ;;  %v1275_v51 = vsel %vm1197_vm0, %v2453_v30, 0.0 }
 0x1a9   : > { %vm1125_vm12 = vcmp.ge.f32.partialorder %v1093_v2, 0.0  ;;  %v1157_v29 = vmul.f32 0.2, %v1093_v2  ;;  %v1276_v31 = vadd.f32 %v1275_v51, %v1274_v24 }
 0x1aa   : > { %v860_v34 = vadd.f32 %v828_v15, %v2047_v17  ;;  %v2694_v15 = vld [vmem:[#allocation14_spill] sm:$0xff] }
 0x1ab   : > { %v2465_v45 = vsel %vm1125_vm12, %v1093_v2, %v1157_v29  ;;  %v780_v63 = vpop.permute.xlu1 %779 }
 0x1ac   : > { %1222 = vst.msk [vmem:[%s2131_s6 + $0xc0] sm:$0xff] %vm1197_vm0, %v2465_v45  ;;  %v829_v0 = vmul.f32 %v2084_v56, %v780_v63  ;;  %v1277_v20 = vsel %vm1197_vm0, %v2465_v45, 0.0 }
 0x1ad   : > { %v1278_v54 = vadd.f32 %v1277_v20, %v1276_v31 }
 0x1ae   : > { %v861_v43 = vadd.f32 %v829_v0, %v2693_v58  ;;  %v1285_v58 = vsel %vm1197_vm0, %v2360_v33, 0.0 }
 0x1af   : > { %v1280_v40 = vadd.f32 %v1279_v59, %v1278_v54 }
 0x1b0   : > { %v972_v49 = vpop.permute.xlu1 %971 }
 0x1b1   : > { %v1024_v25 = vmul.f32 %v2096_v4, %v972_v49 }
 0x1b3   : > { %v1056_v39 = vadd.f32 %v1024_v25, %v860_v34  ;;  %v833_v34 = vmul.f32 %v2084_v56, %v796_v28  ;;  %v2695_v25 = vld [vmem:[#allocation15_spill] sm:$0xff] }
 0x1b4   : > { %v976_v12 = vpop.permute.xlu1 %975 }
 0x1b5   : > { %v1095_v7 = vadd.f32 %v2111_v26, %v1056_v39  ;;  %v1025_v13 = vmul.f32 %v2096_v4, %v976_v12 }
 0x1b7   : > { %vm1127_vm13 = vcmp.ge.f32.partialorder %v1095_v7, 0.0  ;;  %v1159_v17 = vmul.f32 0.2, %v1095_v7  ;;  %v1057_v1 = vadd.f32 %v1025_v13, %v861_v43  ;;  %v2696_v43 = vld [vmem:[#allocation16_spill] sm:$0xff] }
 0x1b9   : > { %v2485_v8 = vsel %vm1127_vm13, %v1095_v7, %v1159_v17  ;;  %v1096_v60 = vadd.f32 %v2111_v26, %v1057_v1  ;;  %v788_v10 = vpop.permute.xlu1 %787  ;;  %v865_v7 = vadd.f32 %v833_v34, %v2696_v43 }
 0x1ba   : > { %1224 = vst.msk [vmem:[%s2131_s6 + $0xd0] sm:$0xff] %vm1197_vm0, %v2485_v8  ;;  %v1281_v2 = vsel %vm1197_vm0, %v2485_v8, 0.0  ;;  %v831_v44 = vmul.f32 %v2084_v56, %v788_v10 }
 0x1bb   : > { %v1282_v23 = vadd.f32 %v1281_v2, %v1280_v40  ;;  %vm1128_vm14 = vcmp.ge.f32.partialorder %v1096_v60, 0.0  ;;  %v1160_v52 = vmul.f32 0.2, %v1096_v60 }
 0x1bc   : > { %v863_v42 = vadd.f32 %v831_v44, %v2694_v15 }
 0x1bd   : > { %v1192_v16 = vsel %vm1128_vm14, %v1096_v60, %v1160_v52  ;;  %v792_v53 = vpop.permute.xlu1 %791 }
 0x1be   : > { %1225 = vst.msk [vmem:[%s2131_s6 + $0xd8] sm:$0xff] %vm1197_vm0, %v1192_v16  ;;  %v1283_v29 = vsel %vm1197_vm0, %v1192_v16, 0.0  ;;  %v832_v51 = vmul.f32 %v2084_v56, %v792_v53 }
 0x1bf   : > { %v1284_v3 = vadd.f32 %v1283_v29, %v1282_v23 }
 0x1c0   : > { %v864_v20 = vadd.f32 %v832_v51, %v2695_v25 }
 0x1c1   : > { %v1286_v1 = vadd.f32 %v1285_v58, %v1284_v3 }
 0x1c2   : > { %v984_v63 = vpop.permute.xlu1 %983 }
 0x1c3   : > { %v1027_v49 = vmul.f32 %v2096_v4, %v984_v63 }
 0x1c5   : > { %v1059_v24 = vadd.f32 %v1027_v49, %v863_v42 }
 0x1c6   : > { %v988_v0 = vpop.permute.xlu1 %987 }
 0x1c7   : > { %v1098_v31 = vadd.f32 %v2111_v26, %v1059_v24  ;;  %v1028_v39 = vmul.f32 %v2096_v4, %v988_v0 }
 0x1c9   : > { %vm1130_vm15 = vcmp.ge.f32.partialorder %v1098_v31, 0.0  ;;  %v1162_v12 = vmul.f32 0.2, %v1098_v31  ;;  %v1060_v54 = vadd.f32 %v1028_v39, %v864_v20 }
 0x1ca   : > { %v992_v13 = vpop.permute.xlu1 %991 }
 0x1cb   : > { %v1194_v17 = vsel %vm1130_vm15, %v1098_v31, %v1162_v12  ;;  %v1099_v56 = vadd.f32 %v2111_v26, %v1060_v54  ;;  %v1029_v59 = vmul.f32 %v2096_v4, %v992_v13 }
 0x1cc   : > { %1227 = vst.msk [vmem:[%s2131_s6 + $0xe8] sm:$0xff] %vm1197_vm0, %v1194_v17  ;;  %v1287_v40 = vsel %vm1197_vm0, %v1194_v17, 0.0 }
 0x1cd   : > { %v1288_v60 = vadd.f32 %v1287_v40, %v1286_v1  ;;  %vm1131_vm1 = vcmp.ge.f32.partialorder %v1099_v56, 0.0  ;;  %v1163_v10 = vmul.f32 0.2, %v1099_v56  ;;  %v1061_v2 = vadd.f32 %v1029_v59, %v865_v7 }
 0x1cf   : > { %v1195_v23 = vsel %vm1131_vm1, %v1099_v56, %v1163_v10  ;;  %v1100_v52 = vadd.f32 %v2111_v26, %v1061_v2 }
 0x1d0   : > { %1228 = vst.msk [vmem:[%s2131_s6 + $0xf0] sm:$0xff] %vm1197_vm0, %v1195_v23  ;;  %v1289_v53 = vsel %vm1197_vm0, %v1195_v23, 0.0 }
 0x1d1   : > { %v1290_v29 = vadd.f32 %v1289_v53, %v1288_v60  ;;  %vm1132_vm2 = vcmp.ge.f32.partialorder %v1100_v52, 0.0  ;;  %v1164_v4 = vmul.f32 0.2, %v1100_v52 }
 0x1d3   : > { %v1196_v3 = vsel %vm1132_vm2, %v1100_v52, %v1164_v4 }
 0x1d4   : > { %1229 = vst.msk [vmem:[%s2131_s6 + $0xf8] sm:$0xff] %vm1197_vm0, %v1196_v3  ;;  %v1291_v44 = vsel %vm1197_vm0, %v1196_v3, 0.0 }
 0x1d5   : > { %v1292_v63 = vadd.f32 %v1291_v44, %v1290_v29 }
 0x1d7   : > { %v1293_v28 = vrot.slane %v1292_v63, 4 }
 0x1d9   : > { %v1294_v15 = vadd.f32 %v1293_v28, %v1292_v63 }
 0x1db   : > { %v1295_v42 = vrot.slane %v1294_v15, 2 }
 0x1dd   : > { %v1296_v26 = vadd.f32 %v1295_v42, %v1294_v15 }
 0x1df   : > { %v1297_v51 = vrot.slane %v1296_v26, 1 }
 0x1e1   : > { %v1298_v49 = vadd.f32 %v1297_v51, %v1296_v26 }
 0x1e3   : > { %1300 = vst.msk [vmem:[%s241_s9] sm:$0x1] %vm1299_vm3, %v1298_v49  ;;  %v2528_v24 = vmul.f32 0.00390625, %v1298_v49 }
 0x1e5   : > { %v2532_v34 = vsub.f32 %v2465_v45, %v2528_v24  ;;  %v2536_v0 = vsub.f32 %v2485_v8, %v2528_v24  ;;  %v2539_v25 = vsub.f32 %v1192_v16, %v2528_v24  ;;  %v2542_v20 = vsub.f32 %v1194_v17, %v2528_v24 }
 0x1e6   : > { %v2545_v31 = vsub.f32 %v1195_v23, %v2528_v24  ;;  %v2548_v39 = vsub.f32 %v1196_v3, %v2528_v24  ;;  %v1302_v45 = vsub.f32 %v2142_v55, %v2528_v24  ;;  %v1303_v12 = vsub.f32 %v2192_v11, %v2528_v24 }
 0x1e7   : > { %v1304_v8 = vsub.f32 %v2153_v38, %v2528_v24  ;;  %v1305_v16 = vsub.f32 %v2170_v61, %v2528_v24  ;;  %v1306_v43 = vsub.f32 %v2215_v27, %v2528_v24  ;;  %v1307_v13 = vsub.f32 %v2184_v62, %v2528_v24 }
 0x1e8   : > { %v1334_v54 = vmul.f32 %v1302_v45, %v1302_v45  ;;  %v1335_v58 = vmul.f32 %v1303_v12, %v1303_v12  ;;  %v1308_v38 = vsub.f32 %v2229_v35, %v2528_v24  ;;  %v1309_v27 = vsub.f32 %v2247_v47, %v2528_v24 }
 0x1e9   : > { %v1336_v7 = vmul.f32 %v1304_v8, %v1304_v8  ;;  %v1337_v17 = vmul.f32 %v1305_v16, %v1305_v16  ;;  %v1338_v56 = vmul.f32 %v1306_v43, %v1306_v43  ;;  %v1339_v40 = vmul.f32 %v1307_v13, %v1307_v13 }
 0x1ea   : > { %v1366_v55 = vsel %vm1197_vm0, %v1334_v54, 0.0  ;;  %v1367_v11 = vsel %vm1197_vm0, %v1335_v58, 0.0  ;;  %v1310_v10 = vsub.f32 %v2258_v14, %v2528_v24  ;;  %v1340_v2 = vmul.f32 %v1308_v38, %v1308_v38 }
 0x1eb   : > { %v1368_v1 = vadd.f32 %v1367_v11, %v1366_v55  ;;  %v1369_v61 = vsel %vm1197_vm0, %v1336_v7, 0.0  ;;  %v1371_v60 = vsel %vm1197_vm0, %v1337_v17, 0.0  ;;  %v1373_v23 = vsel %vm1197_vm0, %v1338_v56, 0.0 }
 0x1ec   : > { %v1311_v35 = vsub.f32 %v2285_v50, %v2528_v24  ;;  %v1341_v53 = vmul.f32 %v1309_v27, %v1309_v27  ;;  %v1375_v29 = vsel %vm1197_vm0, %v1339_v40, 0.0  ;;  %v1312_v47 = vsub.f32 %v2264_v48, %v2528_v24 }
 0x1ed   : > { %v1370_v59 = vadd.f32 %v1369_v61, %v1368_v1  ;;  %v1342_v3 = vmul.f32 %v1310_v10, %v1310_v10  ;;  %v1377_v44 = vsel %vm1197_vm0, %v1340_v2, 0.0  ;;  %v1313_v14 = vsub.f32 %v2316_v18, %v2528_v24 }
 0x1ee   : > { %v1343_v28 = vmul.f32 %v1311_v35, %v1311_v35  ;;  %v1379_v15 = vsel %vm1197_vm0, %v1341_v53, 0.0  ;;  %v1314_v50 = vsub.f32 %v2327_v57, %v2528_v24  ;;  %v1344_v26 = vmul.f32 %v1312_v47, %v1312_v47 }
 0x1ef   : > { %v1372_v62 = vadd.f32 %v1371_v60, %v1370_v59  ;;  %v1381_v51 = vsel %vm1197_vm0, %v1342_v3, 0.0  ;;  %v1315_v48 = vsub.f32 %v2279_v21, %v2528_v24  ;;  %v1345_v45 = vmul.f32 %v1313_v14, %v1313_v14 }
 0x1f0   : > { %v1383_v12 = vsel %vm1197_vm0, %v1343_v28, 0.0  ;;  %v1316_v18 = vsub.f32 %v2365_v41, %v2528_v24  ;;  %v1346_v16 = vmul.f32 %v1314_v50, %v1314_v50  ;;  %v1385_v54 = vsel %vm1197_vm0, %v1344_v26, 0.0 }
 0x1f1   : > { %v1374_v52 = vadd.f32 %v1373_v23, %v1372_v62  ;;  %v1317_v57 = vsub.f32 %v2373_v32, %v2528_v24  ;;  %v1347_v43 = vmul.f32 %v1315_v48, %v1315_v48  ;;  %v1387_v7 = vsel %vm1197_vm0, %v1345_v45, 0.0 }
 0x1f2   : > { %v1318_v21 = vsub.f32 %v2301_v36, %v2528_v24  ;;  %v1348_v17 = vmul.f32 %v1316_v18, %v1316_v18  ;;  %v1389_v55 = vsel %vm1197_vm0, %v1346_v16, 0.0  ;;  %v1319_v41 = vsub.f32 %v2391_v5, %v2528_v24 }
 0x1f3   : > { %v1376_v4 = vadd.f32 %v1375_v29, %v1374_v52  ;;  %v1349_v1 = vmul.f32 %v1317_v57, %v1317_v57  ;;  %v1391_v38 = vsel %vm1197_vm0, %v1347_v43, 0.0  ;;  %v1320_v32 = vsub.f32 %v2401_v46, %v2528_v24 }
 0x1f4   : > { %v1350_v61 = vmul.f32 %v1318_v21, %v1318_v21  ;;  %v1393_v59 = vsel %vm1197_vm0, %v1348_v17, 0.0  ;;  %v1321_v36 = vsub.f32 %v2306_v19, %v2528_v24  ;;  %v1351_v40 = vmul.f32 %v1319_v41, %v1319_v41 }
 0x1f5   : > { %v1378_v63 = vadd.f32 %v1377_v44, %v1376_v4  ;;  %v1395_v60 = vsel %vm1197_vm0, %v1349_v1, 0.0  ;;  %v1322_v5 = vsub.f32 %v2423_v37, %v2528_v24  ;;  %v1352_v10 = vmul.f32 %v1320_v32, %v1320_v32 }
 0x1f6   : > { %v1397_v2 = vsel %vm1197_vm0, %v1350_v61, 0.0  ;;  %v1323_v46 = vsub.f32 %v2433_v6, %v2528_v24  ;;  %v1353_v52 = vmul.f32 %v1321_v36, %v1321_v36  ;;  %v1399_v35 = vsel %vm1197_vm0, %v1351_v40, 0.0 }
 0x1f7   : > { %v1380_v42 = vadd.f32 %v1379_v15, %v1378_v63  ;;  %v1324_v19 = vsub.f32 %v2337_v9, %v2528_v24  ;;  %v1354_v29 = vmul.f32 %v1322_v5, %v1322_v5  ;;  %v1401_v4 = vsel %vm1197_vm0, %v1352_v10, 0.0 }
 0x1f8   : > { %v1325_v37 = vsub.f32 %v2453_v30, %v2528_v24  ;;  %v1355_v3 = vmul.f32 %v1323_v46, %v1323_v46  ;;  %v1403_v44 = vsel %vm1197_vm0, %v1353_v52, 0.0  ;;  %v1327_v15 = vsub.f32 %v2347_v22, %v2528_v24 }
 0x1f9   : > { %v1382_v49 = vadd.f32 %v1381_v51, %v1380_v42  ;;  %v1356_v14 = vmul.f32 %v1324_v19, %v1324_v19  ;;  %v1405_v6 = vsel %vm1197_vm0, %v1354_v29, 0.0  ;;  %v1358_v26 = vmul.f32 %v2532_v34, %v2532_v34 }
 0x1fa   : > { %v1357_v42 = vmul.f32 %v1325_v37, %v1325_v37  ;;  %v1407_v9 = vsel %vm1197_vm0, %v1355_v3, 0.0  ;;  %v1360_v22 = vmul.f32 %v2536_v0, %v2536_v0  ;;  %v1361_v16 = vmul.f32 %v2539_v25, %v2539_v25 }
 0x1fb   : > { %v1384_v8 = vadd.f32 %v1383_v12, %v1382_v49  ;;  %v1409_v30 = vsel %vm1197_vm0, %v1356_v14, 0.0  ;;  %v1359_v49 = vmul.f32 %v1327_v15, %v1327_v15  ;;  %v1330_v12 = vsub.f32 %v2360_v33, %v2528_v24 }
 0x1fc   : > { %v1411_v48 = vsel %vm1197_vm0, %v1357_v42, 0.0  ;;  %v1417_v57 = vsel %vm1197_vm0, %v1360_v22, 0.0  ;;  %v1419_v33 = vsel %vm1197_vm0, %v1361_v16, 0.0  ;;  %v1364_v0 = vmul.f32 %v2545_v31, %v2545_v31 }
 0x1fd   : > { %v1386_v58 = vadd.f32 %v1385_v54, %v1384_v8  ;;  %v1413_v8 = vsel %vm1197_vm0, %v1358_v26, 0.0  ;;  %v1415_v34 = vsel %vm1197_vm0, %v1359_v49, 0.0  ;;  %v1365_v21 = vmul.f32 %v2548_v39, %v2548_v39 }
 0x1ff   : > { %v1388_v13 = vadd.f32 %v1387_v7, %v1386_v58  ;;  %v1362_v58 = vmul.f32 %v1330_v12, %v1330_v12  ;;  %v1363_v7 = vmul.f32 %v2542_v20, %v2542_v20  ;;  %v1427_v20 = vsel %vm1197_vm0, %v1365_v21, 0.0 }
 0x201   : > { %v1390_v11 = vadd.f32 %v1389_v55, %v1388_v13  ;;  %v1421_v13 = vsel %vm1197_vm0, %v1362_v58, 0.0  ;;  %v1423_v17 = vsel %vm1197_vm0, %v1363_v7, 0.0 }
 0x203   : > { %v1392_v56 = vadd.f32 %v1391_v38, %v1390_v11  ;;  %v1425_v11 = vsel %vm1197_vm0, %v1364_v0, 0.0 }
 0x205   : > { %v1394_v27 = vadd.f32 %v1393_v59, %v1392_v56 }
 0x207   : > { %v1396_v62 = vadd.f32 %v1395_v60, %v1394_v27 }
 0x209   : > { %v1398_v23 = vadd.f32 %v1397_v2, %v1396_v62 }
 0x20b   : > { %v1400_v53 = vadd.f32 %v1399_v35, %v1398_v23 }
 0x20d   : > { %v1402_v47 = vadd.f32 %v1401_v4, %v1400_v53 }
 0x20f   : > { %v1404_v63 = vadd.f32 %v1403_v44, %v1402_v47 }
 0x211   : > { %v1406_v28 = vadd.f32 %v1405_v6, %v1404_v63 }
 0x213   : > { %v1408_v50 = vadd.f32 %v1407_v9, %v1406_v28 }
 0x215   : > { %v1410_v51 = vadd.f32 %v1409_v30, %v1408_v50 }
 0x217   : > { %v1412_v45 = vadd.f32 %v1411_v48, %v1410_v51 }
 0x219   : > { %v1414_v18 = vadd.f32 %v1413_v8, %v1412_v45 }
 0x21b   : > { %v1416_v54 = vadd.f32 %v1415_v34, %v1414_v18 }
 0x21d   : > { %v1418_v43 = vadd.f32 %v1417_v57, %v1416_v54 }
 0x21f   : > { %v1420_v24 = vadd.f32 %v1419_v33, %v1418_v43 }
 0x221   : > { %v1422_v25 = vadd.f32 %v1421_v13, %v1420_v24 }
 0x223   : > { %v1424_v55 = vadd.f32 %v1423_v17, %v1422_v25 }
 0x225   : > { %v1426_v41 = vadd.f32 %v1425_v11, %v1424_v55 }
 0x227   : > { %v1428_v1 = vadd.f32 %v1427_v20, %v1426_v41 }
 0x229   : > { %v1429_v38 = vrot.slane %v1428_v1, 4 }
 0x22b   : > { %v1430_v56 = vadd.f32 %v1429_v38, %v1428_v1 }
 0x22d   : > { %v1431_v32 = vrot.slane %v1430_v56, 2 }
 0x22f   : > { %v1432_v61 = vadd.f32 %v1431_v32, %v1430_v56 }
 0x231   : > { %v1433_v31 = vrot.slane %v1432_v61, 1 }
 0x233   : > { %v1434_v59 = vadd.f32 %v1433_v31, %v1432_v61 }
 0x235   : > { %1435 = vst.msk [vmem:[%s244_s12] sm:$0x1] %vm1299_vm3, %v1434_v59 }
 0x236 PF: > { %s16_s18 = sadd.s32 1, %s1599_s18  }
 0x237   : > { %p13_p5 = scmp.ge.s32.totalorder %s16_s18, 4  }
 0x239   :  { %15 = sbr.rel (!%p13_p5) target bundleno = 1 (0x1), region = 86 }

// kernel: mask_forward.5
= control target key start
LH: loop header
LB: loop body
LE: loop exit
PB: predicated region body
PF: predicated region fallthrough
CT: control target
= control target key end

     0   :  { %s812_s12 = smov 0   ;;  %s1017_s0 = inlined_call_operand.vmem [shape: f32[512,32], index: 0, kind: input, shape index: {}]   ;;  %s1018_s1 = inlined_call_operand.vmem [shape: f32[32,3], index: 1, kind: input, shape index: {}]   ;;  %s1019_s2 = inlined_call_operand.vmem [shape: f32[1,3], index: 2, kind: input, shape index: {}]   ;;  %s1020_s3 = inlined_call_operand.vmem [shape: f32[512,3], index: 3, kind: output, shape index: {}]  }
   0x1 LB: > { %s628_s13 = sadd.s32 4294967295, %s790_s12   ;;  %p632_p0 = scmp.ge.s32.totalorder %s790_s12, 1  ;;  %s790_s12 = sphi %s812_s12, %s13_s12  }
   0x2   : > { %p138_p1 = scmp.lt.s32.totalorder %s790_s12, 3 }
   0x4   : > { %p139_p2 = pnand %p632_p0, %p138_p1 }
   0x5   : > { %v206_v0 = vld [vmem:[%s1018_s1] sm:$0xff] (!%p139_p2)  ;;  %v207_v1 = vld [vmem:[%s1018_s1 + $0x8] sm:$0xff] (!%p139_p2)  ;;  %v208_v2 = vld [vmem:[%s1018_s1 + $0x10] sm:$0xff] (!%p139_p2)  ;;  %s633_s20 = sshll.u32 (!%p139_p2), %s628_s13, 5  ;;  %vm217_vm0 = vcmask (!%p139_p2), 261120   ;;  %vm539_vm1 = vcmask (!%p139_p2), 23552  }
   0x6   : > { %142 = sbr.rel (%p139_p2) target bundleno = 263 (0x107), region = 32  ;;  %v764_v3 = vpack.c.bf16 (!%p139_p2), %v207_v1, %v206_v0  ;;  %v209_v4 = vld [vmem:[%s1018_s1 + $0x18] sm:$0xff] (!%p139_p2)  ;;  %p163_p3 = scmp.lt.s32.totalorder (!%p139_p2), %s633_s20, 63  ;;  %v909_v38 = vld [vmem:[%s1019_s2] ss:$0 sm:$0xff] (!%p139_p2) }
   0x7   : > { %v768_v5 = vpack.c.bf16 (!%p139_p2), %v209_v4, %v208_v2 }
   0x8   : > { %765 = vmatprep.subr.bf16.mxu0 (!%p139_p2), %v764_v3  ;;  %772 = vmatprep.subr.bf16.mxu1 (!%p139_p2), %v764_v3 }
   0x9   : > { %767 = vmatpush3.bf16.msra.mxu0 (!%p139_p2), %v764_v3  ;;  %774 = vmatpush3.bf16.msra.mxu1 (!%p139_p2), %v764_v3 }
   0xa   : > { %769 = vmatprep.subr.bf16.mxu0 (!%p139_p2), %v768_v5  ;;  %773 = vmatprep.subr.bf16.mxu1 (!%p139_p2), %v768_v5 }
   0xd   : > { %s1022_s20 = smov (!%p163_p3, %s633_s20), 63  ;;  %771 = vmatpush3.bf16.msra.mxu0 %v768_v5  ;;  %775 = vmatpush3.bf16.msra.mxu1 %v768_v5 }
   0xe   : > { %s634_s23 = sshll.u32 %s1022_s20, 3 }
   0xf   : > { %s840_s26 = scalar_lea.vmem %s1017_s0, %s634_s23  ;;  %s916_s4 = scalar_lea.vmem %s1020_s3, %s634_s23 }
  0x10   : > { %v174_v6 = vld [vmem:[%s840_s26] sm:$0xff]  ;;  %v175_v8 = vld [vmem:[%s840_s26 + $0x8] sm:$0xff]  ;;  %v176_v10 = vld [vmem:[%s840_s26 + $0x10] sm:$0xff] }
  0x11   : > { %v190_v7 = vld [vmem:[%s840_s26 + $0x80] sm:$0xff]  ;;  %v191_v9 = vld [vmem:[%s840_s26 + $0x88] sm:$0xff]  ;;  %716 = vmatprep.mubr.msk.f32.mxu0 %vm217_vm0, %v174_v6  ;;  %v192_v11 = vld [vmem:[%s840_s26 + $0x90] sm:$0xff] }
  0x12   : > { %740 = vmatprep.mubr.msk.f32.mxu1 %vm217_vm0, %v190_v7  ;;  %717 = vmatmul.mubr.msk.f32.vlgmr.msra.gmra.mrb[0].mxu0 %vm217_vm0, %v175_v8  ;;  %v177_v12 = vld [vmem:[%s840_s26 + $0x18] sm:$0xff]  ;;  %v178_v14 = vld [vmem:[%s840_s26 + $0x20] sm:$0xff]  ;;  %v179_v16 = vld [vmem:[%s840_s26 + $0x28] sm:$0xff] }
  0x13   : > { %741 = vmatmul.mubr.msk.f32.vlgmr.msra.gmra.mrb[0].mxu1 %vm217_vm0, %v191_v9  ;;  %719 = vmatprep.mubr.msk.f32.mxu0 %vm217_vm0, %v176_v10  ;;  %v193_v13 = vld [vmem:[%s840_s26 + $0x98] sm:$0xff]  ;;  %v194_v15 = vld [vmem:[%s840_s26 + $0xa0] sm:$0xff]  ;;  %v195_v17 = vld [vmem:[%s840_s26 + $0xa8] sm:$0xff] }
  0x14   : > { %743 = vmatprep.mubr.msk.f32.mxu1 %vm217_vm0, %v192_v11  ;;  %v180_v18 = vld [vmem:[%s840_s26 + $0x30] sm:$0xff]  ;;  %v181_v20 = vld [vmem:[%s840_s26 + $0x38] sm:$0xff]  ;;  %v182_v22 = vld [vmem:[%s840_s26 + $0x40] sm:$0xff] }
  0x15   : > { %v196_v19 = vld [vmem:[%s840_s26 + $0xb0] sm:$0xff]  ;;  %v197_v21 = vld [vmem:[%s840_s26 + $0xb8] sm:$0xff]  ;;  %v198_v23 = vld [vmem:[%s840_s26 + $0xc0] sm:$0xff] }
  0x16   : > { %720 = vmatmul.mubr.msk.f32.gmra.mrb[2].mxu0 %vm217_vm0, %v177_v12  ;;  %v183_v24 = vld [vmem:[%s840_s26 + $0x48] sm:$0xff]  ;;  %v184_v26 = vld [vmem:[%s840_s26 + $0x50] sm:$0xff]  ;;  %v185_v28 = vld [vmem:[%s840_s26 + $0x58] sm:$0xff] }
  0x17   : > { %744 = vmatmul.mubr.msk.f32.gmra.mrb[2].mxu1 %vm217_vm0, %v193_v13  ;;  %722 = vmatprep.mubr.msk.f32.mxu0 %vm217_vm0, %v178_v14  ;;  %v199_v25 = vld [vmem:[%s840_s26 + $0xc8] sm:$0xff]  ;;  %v200_v27 = vld [vmem:[%s840_s26 + $0xd0] sm:$0xff]  ;;  %v201_v29 = vld [vmem:[%s840_s26 + $0xd8] sm:$0xff] }
  0x18   : > { %746 = vmatprep.mubr.msk.f32.mxu1 %vm217_vm0, %v194_v15  ;;  %v186_v30 = vld [vmem:[%s840_s26 + $0x60] sm:$0xff]  ;;  %v187_v32 = vld [vmem:[%s840_s26 + $0x68] sm:$0xff]  ;;  %v188_v34 = vld [vmem:[%s840_s26 + $0x70] sm:$0xff] }
  0x19   : > { %v202_v31 = vld [vmem:[%s840_s26 + $0xe0] sm:$0xff]  ;;  %v203_v33 = vld [vmem:[%s840_s26 + $0xe8] sm:$0xff]  ;;  %v204_v35 = vld [vmem:[%s840_s26 + $0xf0] sm:$0xff] }
  0x1a   : > { %723 = vmatmul.mubr.msk.f32.gmra.mrb[4].mxu0 %vm217_vm0, %v179_v16  ;;  %v189_v36 = vld [vmem:[%s840_s26 + $0x78] sm:$0xff] }
  0x1b   : > { %747 = vmatmul.mubr.msk.f32.gmra.mrb[4].mxu1 %vm217_vm0, %v195_v17  ;;  %725 = vmatprep.mubr.msk.f32.mxu0 %vm217_vm0, %v180_v18  ;;  %v205_v37 = vld [vmem:[%s840_s26 + $0xf8] sm:$0xff] }
  0x1c   : > { %749 = vmatprep.mubr.msk.f32.mxu1 %vm217_vm0, %v196_v19 }
  0x1e   : > { %726 = vmatmul.mubr.msk.f32.gmra.mrb[6].mxu0 %vm217_vm0, %v181_v20 }
  0x1f   : > { %750 = vmatmul.mubr.msk.f32.gmra.mrb[6].mxu1 %vm217_vm0, %v197_v21  ;;  %728 = vmatprep.mubr.msk.f32.mxu0 %vm217_vm0, %v182_v22 }
  0x20   : > { %752 = vmatprep.mubr.msk.f32.mxu1 %vm217_vm0, %v198_v23 }
  0x22   : > { %729 = vmatmul.mubr.msk.f32.gmra.mrb[8].mxu0 %vm217_vm0, %v183_v24 }
  0x23   : > { %753 = vmatmul.mubr.msk.f32.gmra.mrb[8].mxu1 %vm217_vm0, %v199_v25  ;;  %731 = vmatprep.mubr.msk.f32.mxu0 %vm217_vm0, %v184_v26 }
  0x24   : > { %755 = vmatprep.mubr.msk.f32.mxu1 %vm217_vm0, %v200_v27 }
  0x26   : > { %732 = vmatmul.mubr.msk.f32.gmra.mrb[10].mxu0 %vm217_vm0, %v185_v28 }
  0x27   : > { %756 = vmatmul.mubr.msk.f32.gmra.mrb[10].mxu1 %vm217_vm0, %v201_v29  ;;  %734 = vmatprep.mubr.msk.f32.mxu0 %vm217_vm0, %v186_v30 }
  0x28   : > { %758 = vmatprep.mubr.msk.f32.mxu1 %vm217_vm0, %v202_v31 }
  0x2a   : > { %735 = vmatmul.mubr.msk.f32.gmra.mrb[12].mxu0 %vm217_vm0, %v187_v32 }
  0x2b   : > { %759 = vmatmul.mubr.msk.f32.gmra.mrb[12].mxu1 %vm217_vm0, %v203_v33  ;;  %737 = vmatprep.mubr.msk.f32.mxu0 %vm217_vm0, %v188_v34 }
  0x2c   : > { %761 = vmatprep.mubr.msk.f32.mxu1 %vm217_vm0, %v204_v35 }
  0x2e   : > { %738 = vmatmul.mubr.msk.f32.gmra.mrb[14].mxu0 %vm217_vm0, %v189_v36 }
  0x2f   : > { %762 = vmatmul.mubr.msk.f32.gmra.mrb[14].mxu1 %vm217_vm0, %v205_v37 }
  0xe5   : > { %v718_v39 = vpop.f32.mrb[0].mxu0 }
  0xe6   : > { %v742_v40 = vpop.f32.mrb[0].mxu1  ;;  %v386_v41 = vadd.f32 %v718_v39, %v909_v38  ;;  %v380_v43 = vpop.f32.mrb[1].mxu0 }
  0xe7   : > { %v466_v42 = vadd.f32 %v742_v40, %v909_v38  ;;  %v460_v44 = vpop.f32.mrb[1].mxu1  ;;  %v381_v45 = vadd.f32 %v909_v38, %v380_v43 }
  0xe8   : > { %v461_v46 = vadd.f32 %v909_v38, %v460_v44  ;;  %541 = vst.msk [vmem:[%s916_s4 + $0x8] sm:$0xff] %vm539_vm1, %v386_v41 }
  0xe9   : > { %557 = vst.msk [vmem:[%s916_s4 + $0x88] sm:$0xff] %vm539_vm1, %v466_v42  ;;  %540 = vst.msk [vmem:[%s916_s4] sm:$0xff] %vm539_vm1, %v381_v45  ;;  %v721_v47 = vpop.f32.mrb[2].mxu0 }
  0xea   : > { %556 = vst.msk [vmem:[%s916_s4 + $0x80] sm:$0xff] %vm539_vm1, %v461_v46  ;;  %v745_v48 = vpop.f32.mrb[2].mxu1  ;;  %v396_v49 = vadd.f32 %v721_v47, %v909_v38  ;;  %v390_v51 = vpop.f32.mrb[3].mxu0 }
  0xeb   : > { %v476_v50 = vadd.f32 %v745_v48, %v909_v38  ;;  %v470_v52 = vpop.f32.mrb[3].mxu1  ;;  %v391_v53 = vadd.f32 %v909_v38, %v390_v51 }
  0xec   : > { %v471_v54 = vadd.f32 %v909_v38, %v470_v52  ;;  %543 = vst.msk [vmem:[%s916_s4 + $0x18] sm:$0xff] %vm539_vm1, %v396_v49 }
  0xed   : > { %559 = vst.msk [vmem:[%s916_s4 + $0x98] sm:$0xff] %vm539_vm1, %v476_v50  ;;  %542 = vst.msk [vmem:[%s916_s4 + $0x10] sm:$0xff] %vm539_vm1, %v391_v53  ;;  %v724_v55 = vpop.f32.mrb[4].mxu0 }
  0xee   : > { %558 = vst.msk [vmem:[%s916_s4 + $0x90] sm:$0xff] %vm539_vm1, %v471_v54  ;;  %v748_v56 = vpop.f32.mrb[4].mxu1  ;;  %v406_v57 = vadd.f32 %v724_v55, %v909_v38  ;;  %v400_v59 = vpop.f32.mrb[5].mxu0 }
  0xef   : > { %v486_v58 = vadd.f32 %v748_v56, %v909_v38  ;;  %v480_v60 = vpop.f32.mrb[5].mxu1  ;;  %v401_v61 = vadd.f32 %v909_v38, %v400_v59 }
  0xf0   : > { %v481_v62 = vadd.f32 %v909_v38, %v480_v60  ;;  %545 = vst.msk [vmem:[%s916_s4 + $0x28] sm:$0xff] %vm539_vm1, %v406_v57 }
  0xf1   : > { %561 = vst.msk [vmem:[%s916_s4 + $0xa8] sm:$0xff] %vm539_vm1, %v486_v58  ;;  %544 = vst.msk [vmem:[%s916_s4 + $0x20] sm:$0xff] %vm539_vm1, %v401_v61  ;;  %v727_v63 = vpop.f32.mrb[6].mxu0 }
  0xf2   : > { %560 = vst.msk [vmem:[%s916_s4 + $0xa0] sm:$0xff] %vm539_vm1, %v481_v62  ;;  %v751_v0 = vpop.f32.mrb[6].mxu1  ;;  %v416_v1 = vadd.f32 %v727_v63, %v909_v38  ;;  %v410_v3 = vpop.f32.mrb[7].mxu0 }
  0xf3   : > { %v496_v2 = vadd.f32 %v751_v0, %v909_v38  ;;  %v490_v4 = vpop.f32.mrb[7].mxu1  ;;  %v411_v5 = vadd.f32 %v909_v38, %v410_v3 }
  0xf4   : > { %v491_v6 = vadd.f32 %v909_v38, %v490_v4  ;;  %547 = vst.msk [vmem:[%s916_s4 + $0x38] sm:$0xff] %vm539_vm1, %v416_v1 }
  0xf5   : > { %563 = vst.msk [vmem:[%s916_s4 + $0xb8] sm:$0xff] %vm539_vm1, %v496_v2  ;;  %546 = vst.msk [vmem:[%s916_s4 + $0x30] sm:$0xff] %vm539_vm1, %v411_v5  ;;  %v730_v7 = vpop.f32.mrb[8].mxu0 }
  0xf6   : > { %562 = vst.msk [vmem:[%s916_s4 + $0xb0] sm:$0xff] %vm539_vm1, %v491_v6  ;;  %v754_v8 = vpop.f32.mrb[8].mxu1  ;;  %v426_v9 = vadd.f32 %v730_v7, %v909_v38  ;;  %v420_v11 = vpop.f32.mrb[9].mxu0 }
  0xf7   : > { %v506_v10 = vadd.f32 %v754_v8, %v909_v38  ;;  %v500_v12 = vpop.f32.mrb[9].mxu1  ;;  %v421_v13 = vadd.f32 %v909_v38, %v420_v11 }
  0xf8   : > { %v501_v14 = vadd.f32 %v909_v38, %v500_v12  ;;  %549 = vst.msk [vmem:[%s916_s4 + $0x48] sm:$0xff] %vm539_vm1, %v426_v9 }
  0xf9   : > { %565 = vst.msk [vmem:[%s916_s4 + $0xc8] sm:$0xff] %vm539_vm1, %v506_v10  ;;  %548 = vst.msk [vmem:[%s916_s4 + $0x40] sm:$0xff] %vm539_vm1, %v421_v13  ;;  %v733_v15 = vpop.f32.mrb[10].mxu0 }
  0xfa   : > { %564 = vst.msk [vmem:[%s916_s4 + $0xc0] sm:$0xff] %vm539_vm1, %v501_v14  ;;  %v757_v16 = vpop.f32.mrb[10].mxu1  ;;  %v436_v17 = vadd.f32 %v733_v15, %v909_v38  ;;  %v430_v19 = vpop.f32.mrb[11].mxu0 }
  0xfb   : > { %v516_v18 = vadd.f32 %v757_v16, %v909_v38  ;;  %v510_v20 = vpop.f32.mrb[11].mxu1  ;;  %v431_v21 = vadd.f32 %v909_v38, %v430_v19 }
  0xfc   : > { %v511_v22 = vadd.f32 %v909_v38, %v510_v20  ;;  %551 = vst.msk [vmem:[%s916_s4 + $0x58] sm:$0xff] %vm539_vm1, %v436_v17 }
  0xfd   : > { %567 = vst.msk [vmem:[%s916_s4 + $0xd8] sm:$0xff] %vm539_vm1, %v516_v18  ;;  %550 = vst.msk [vmem:[%s916_s4 + $0x50] sm:$0xff] %vm539_vm1, %v431_v21  ;;  %v736_v23 = vpop.f32.mrb[12].mxu0 }
  0xfe   : > { %566 = vst.msk [vmem:[%s916_s4 + $0xd0] sm:$0xff] %vm539_vm1, %v511_v22  ;;  %v760_v24 = vpop.f32.mrb[12].mxu1  ;;  %v446_v25 = vadd.f32 %v736_v23, %v909_v38  ;;  %v440_v27 = vpop.f32.mrb[13].mxu0 }
  0xff   : > { %v526_v26 = vadd.f32 %v760_v24, %v909_v38  ;;  %v520_v28 = vpop.f32.mrb[13].mxu1  ;;  %v441_v29 = vadd.f32 %v909_v38, %v440_v27 }
 0x100   : > { %v521_v30 = vadd.f32 %v909_v38, %v520_v28  ;;  %553 = vst.msk [vmem:[%s916_s4 + $0x68] sm:$0xff] %vm539_vm1, %v446_v25 }
 0x101   : > { %569 = vst.msk [vmem:[%s916_s4 + $0xe8] sm:$0xff] %vm539_vm1, %v526_v26  ;;  %552 = vst.msk [vmem:[%s916_s4 + $0x60] sm:$0xff] %vm539_vm1, %v441_v29  ;;  %v739_v31 = vpop.f32.mrb[14].mxu0 }
 0x102   : > { %568 = vst.msk [vmem:[%s916_s4 + $0xe0] sm:$0xff] %vm539_vm1, %v521_v30  ;;  %v763_v32 = vpop.f32.mrb[14].mxu1  ;;  %v456_v33 = vadd.f32 %v739_v31, %v909_v38  ;;  %v450_v35 = vpop.f32.mrb[15].mxu0 }
 0x103   : > { %v536_v34 = vadd.f32 %v763_v32, %v909_v38  ;;  %v530_v36 = vpop.f32.mrb[15].mxu1  ;;  %v451_v37 = vadd.f32 %v909_v38, %v450_v35 }
 0x104   : > { %v531_v39 = vadd.f32 %v909_v38, %v530_v36  ;;  %555 = vst.msk [vmem:[%s916_s4 + $0x78] sm:$0xff] %vm539_vm1, %v456_v33 }
 0x105   : > { %571 = vst.msk [vmem:[%s916_s4 + $0xf8] sm:$0xff] %vm539_vm1, %v536_v34  ;;  %554 = vst.msk [vmem:[%s916_s4 + $0x70] sm:$0xff] %vm539_vm1, %v451_v37 }
 0x106   : > { %570 = vst.msk [vmem:[%s916_s4 + $0xf0] sm:$0xff] %vm539_vm1, %v531_v39 }
 0x107 PF: > { %s13_s12 = sadd.s32 1, %s790_s12  }
 0x108   : > { %p10_p4 = scmp.ge.s32.totalorder %s13_s12, 4  }
 0x10a   :  { %12 = sbr.rel (!%p10_p4) target bundleno = 1 (0x1), region = 62 }

// kernel: mask_forward.4
= control target key start
LH: loop header
LB: loop body
LE: loop exit
PB: predicated region body
PF: predicated region fallthrough
CT: control target
= control target key end

     0   :  { %s5899_s18 = smov 0   ;;  %s7331_s0 = inlined_call_operand.vmem [shape: f32[2,18,18,32], index: 0, kind: input, shape index: {}]   ;;  %s7332_s1 = inlined_call_operand.vmem [shape: f32[9,32,32], index: 1, kind: input, shape index: {}]   ;;  %s7333_s2 = inlined_call_operand.vmem [shape: f32[1,32], index: 2, kind: input, shape index: {}]   ;;  %s7334_s3 = inlined_call_operand.vmem [shape: f32[2,256,32], index: 3, kind: output, shape index: {0}]   ;;  %s7335_s4 = inlined_call_operand.vmem [shape: f32[2,1,32], index: 4, kind: output, shape index: {1}]   ;;  %s7336_s5 = inlined_call_operand.vmem [shape: f32[2,1,32], index: 5, kind: output, shape index: {2}]  }
   0x1 LB: > { %s4168_s19 = sadd.s32 4294967295, %s5867_s18   ;;  %p4172_p0 = scmp.ge.s32.totalorder %s5867_s18, 1  ;;  %s5867_s18 = sphi %s5899_s18, %s16_s18  }
   0x2   : > { %p192_p1 = scmp.lt.s32.totalorder %s5867_s18, 3 }
   0x4   : > { %p193_p2 = pnand %p4172_p0, %p192_p1 }
   0x6   : > { %196 = sbr.rel (%p193_p2) target bundleno = 633 (0x279), region = 32 }
   0xd   : > { %v4176_v0 = vld [vmem:[%s7332_s1 + $0x20] sm:$0xff]  ;;  %v4177_v1 = vld [vmem:[%s7332_s1 + $0x28] sm:$0xff]  ;;  %p226_p3 = scmp.lt.s32.totalorder %s4168_s19, 1  ;;  %v4178_v5 = vld [vmem:[%s7332_s1 + $0x30] sm:$0xff]  ;;  %vm315_vm0 = vcmask 261120  }
   0xe   : > { %v4380_v2 = vld [vmem:[%s7332_s1 + $0x80] sm:$0xff]  ;;  %v5520_v3 = vpack.c.bf16 %v4177_v1, %v4176_v0  ;;  %v4381_v4 = vld [vmem:[%s7332_s1 + $0x88] sm:$0xff]  ;;  %v4179_v6 = vld [vmem:[%s7332_s1 + $0x38] sm:$0xff] }
   0xf   : > { %v5925_v7 = vpack.c.bf16 %v4381_v4, %v4380_v2  ;;  %v5524_v8 = vpack.c.bf16 %v4179_v6, %v4178_v5  ;;  %v4382_v9 = vld [vmem:[%s7332_s1 + $0x90] sm:$0xff]  ;;  %v4383_v10 = vld [vmem:[%s7332_s1 + $0x98] sm:$0xff]  ;;  %s7461_s19 = smov (!%p226_p3, %s4168_s19), 1  ;;  %v274_v11 = vld [vmem:[%s7332_s1] sm:$0xff] }
  0x10   : > { %5521 = vmatprep.subr.bf16.mxu1 %v5520_v3  ;;  %v5938_v12 = vpack.c.bf16 %v4383_v10, %v4382_v9  ;;  %v275_v13 = vld [vmem:[%s7332_s1 + $0x8] sm:$0xff]  ;;  %v4448_v14 = vld [vmem:[%s7332_s1 + $0xa0] sm:$0xff]  ;;  %s5852_s21 = smul.u32 432, %s7461_s19  ;;  %v4450_v18 = vld [vmem:[%s7332_s1 + $0xb0] sm:$0xff]  ;;  %s4691_s30 = sshll.u32 %s7461_s19, 8 }
  0x11   : > { %v4449_v15 = vld [vmem:[%s7332_s1 + $0xa8] sm:$0xff]  ;;  %5553 = vmatprep.subr.bf16.mxu0 %v5925_v7  ;;  %5523 = vmatpush3.bf16.msra.mxu1 %v5520_v3  ;;  %v5528_v16 = vpack.c.bf16 %v275_v13, %v274_v11  ;;  %v4451_v21 = vld [vmem:[%s7332_s1 + $0xb8] sm:$0xff]  ;;  %v276_v23 = vld [vmem:[%s7332_s1 + $0x10] sm:$0xff]  ;;  %s6934_s8 = scalar_lea.vmem %s7334_s3, %s4691_s30  ;;  %s238_s11 = scalar_lea.vmem %s7335_s4, %s7461_s19 }
  0x12   : > { %7389 = vst [vmem:[#allocation2_spill] sm:$0xff] %v5938_v12  ;;  %5555 = vmatpush3.bf16.msra.mxu0 %v5925_v7  ;;  %5525 = vmatprep.subr.bf16.mxu1 %v5524_v8  ;;  %s5956_s24 = scalar_lea.vmem %s7331_s0, %s5852_s21  ;;  %v5560_v17 = vpack.c.bf16 %v4449_v15, %v4448_v14  ;;  %v277_v24 = vld [vmem:[%s7332_s1 + $0x18] sm:$0xff]  ;;  %v5564_v26 = vpack.c.bf16 %v4451_v21, %v4450_v18  ;;  %v4516_v29 = vld [vmem:[%s7332_s1 + $0xc0] sm:$0xff]  ;;  %v4517_v30 = vld [vmem:[%s7332_s1 + $0xc8] sm:$0xff]  ;;  %s241_s14 = scalar_lea.vmem %s7336_s5, %s7461_s19 }
  0x13   : > { %5557 = vmatprep.subr.bf16.mxu0 %v5938_v12  ;;  %v278_v19 = vld [vmem:[%s5956_s24 + $0x1] sm:$0xff]  ;;  %v4348_v20 = vld [vmem:[%s5956_s24 + $0x19] sm:$0xff]  ;;  %v279_v22 = vld [vmem:[%s5956_s24 + $0x9] sm:$0xff]  ;;  %v5532_v28 = vpack.c.bf16 %v277_v24, %v276_v23  ;;  %v5568_v35 = vpack.c.bf16 %v4517_v30, %v4516_v29 }
  0x14   : > { %5024 = vmatprep.mubr.msk.f32.mxu1 %vm315_vm0, %v278_v19  ;;  %5248 = vmatprep.mubr.msk.f32.mxu0 %vm315_vm0, %v4348_v20  ;;  %v4349_v25 = vld [vmem:[%s5956_s24 + $0x21] sm:$0xff]  ;;  %v5979_v27 = vld [vmem:[%s5956_s24 + $0x31] sm:$0xff]  ;;  %v5996_v33 = vld [vmem:[%s5956_s24 + $0x39] sm:$0xff] }
  0x15   : > { %5527 = vmatpush3.bf16.msra.mxu1 %v5524_v8  ;;  %v4244_v31 = vld [vmem:[%s7332_s1 + $0x40] sm:$0xff]  ;;  %v4245_v32 = vld [vmem:[%s7332_s1 + $0x48] sm:$0xff]  ;;  %v6013_v37 = vld [vmem:[%s5956_s24 + $0x51] sm:$0xff] }
  0x16   : > { %5559 = vmatpush3.bf16.msra.mxu0 %v5938_v12  ;;  %5529 = vmatprep.subr.bf16.mxu1 %v5528_v16  ;;  %v6001_v34 = vld [vmem:[%s5956_s24 + $0x49] sm:$0xff]  ;;  %v6004_v36 = vpack.c.bf16 %v4245_v32, %v4244_v31  ;;  %v6016_v38 = vld [vmem:[%s5956_s24 + $0x61] sm:$0xff]  ;;  %v6031_v40 = vld [vmem:[%s5956_s24 + $0x79] sm:$0xff] }
  0x17   : > { %5561 = vmatprep.subr.bf16.mxu0 %v5560_v17  ;;  %v6028_v39 = vld [vmem:[%s5956_s24 + $0x69] sm:$0xff]  ;;  %v6042_v41 = vld [vmem:[%s5956_s24 + $0x81] sm:$0xff]  ;;  %v6045_v42 = vld [vmem:[%s5956_s24 + $0x91] sm:$0xff] }
  0x18   : > { %5025 = vmatmul.mubr.msk.f32.vlgmr.msra.gmra.mrb[0].mxu1 %vm315_vm0, %v279_v22  ;;  %v6056_v43 = vld [vmem:[%s5956_s24 + $0x99] sm:$0xff]  ;;  %v6059_v44 = vld [vmem:[%s5956_s24 + $0xa9] sm:$0xff]  ;;  %v6070_v45 = vld [vmem:[%s5956_s24 + $0xb1] sm:$0xff] }
  0x19   : > { %5249 = vmatmul.mubr.msk.f32.vlgmr.msra.gmra.mrb[0].mxu0 %vm315_vm0, %v4349_v25  ;;  %5531 = vmatpush3.bf16.msra.mxu1 %v5528_v16  ;;  %v6073_v46 = vld [vmem:[%s5956_s24 + $0xc1] sm:$0xff]  ;;  %v6084_v47 = vld [vmem:[%s5956_s24 + $0xc9] sm:$0xff]  ;;  %v4519_v50 = vld [vmem:[%s7332_s1 + $0xd8] sm:$0xff] }
  0x1a   : > { %5563 = vmatpush3.bf16.msra.mxu0 %v5560_v17  ;;  %5027 = vmatprep.mubr.msk.f32.mxu1 %vm315_vm0, %v4348_v20  ;;  %7390 = vst [vmem:[#allocation3_spill] sm:$0xff] %v6084_v47  ;;  %v6087_v48 = vld [vmem:[%s5956_s24 + $0x1a] sm:$0xff]  ;;  %v4518_v49 = vld [vmem:[%s7332_s1 + $0xd0] sm:$0xff]  ;;  %v6104_v51 = vld [vmem:[%s5956_s24 + $0x22] sm:$0xff] }
  0x1b   : > { %5251 = vmatprep.mubr.msk.f32.mxu0 %vm315_vm0, %v5979_v27  ;;  %5565 = vmatprep.subr.bf16.mxu0 %v5564_v26  ;;  %v6107_v52 = vld [vmem:[%s5956_s24 + $0xd9] sm:$0xff]  ;;  %v5572_v54 = vpack.c.bf16 %v4519_v50, %v4518_v49  ;;  %v4585_v56 = vld [vmem:[%s7332_s1 + $0xe8] sm:$0xff]  ;;  %v6133_v59 = vld [vmem:[%s5956_s24 + $0xf1] sm:$0xff] }
  0x1c   : > { %5028 = vmatmul.mubr.msk.f32.gmra.mrb[2].mxu1 %vm315_vm0, %v4349_v25  ;;  %5533 = vmatprep.subr.bf16.mxu1 %v5532_v28  ;;  %7391 = vst [vmem:[#allocation4_spill] sm:$0xff] %v6107_v52  ;;  %v6110_v53 = vld [vmem:[%s5956_s24 + $0x32] sm:$0xff]  ;;  %v4584_v55 = vld [vmem:[%s7332_s1 + $0xe0] sm:$0xff]  ;;  %7393 = vst [vmem:[#allocation6_spill] sm:$0xff] %v6133_v59 }
  0x1d   : > { %5252 = vmatmul.mubr.msk.f32.gmra.mrb[2].mxu0 %vm315_vm0, %v5996_v33  ;;  %5030 = vmatprep.mubr.msk.f32.mxu1 %vm315_vm0, %v5979_v27  ;;  %v6125_v57 = vld [vmem:[%s5956_s24 + $0xe1] sm:$0xff]  ;;  %v6136_v60 = vld [vmem:[%s5956_s24 + $0x4a] sm:$0xff]  ;;  %v6138_v61 = vpack.c.bf16 %v4585_v56, %v4584_v55  ;;  %v6147_v62 = vld [vmem:[%s5956_s24 + $0xf9] sm:$0xff] }
  0x1e   : > { %5254 = vmatprep.mubr.msk.f32.mxu0 %vm315_vm0, %v6001_v34  ;;  %5567 = vmatpush3.bf16.msra.mxu0 %v5564_v26  ;;  %7392 = vst [vmem:[#allocation5_spill] sm:$0xff] %v6125_v57  ;;  %v6130_v58 = vld [vmem:[%s5956_s24 + $0x3a] sm:$0xff]  ;;  %7394 = vst [vmem:[#allocation7_spill] sm:$0xff] %v6147_v62  ;;  %v6152_v63 = vld [vmem:[%s5956_s24 + $0x52] sm:$0xff] }
  0x1f   : > { %5569 = vmatprep.subr.bf16.mxu0 %v5568_v35  ;;  %5535 = vmatpush3.bf16.msra.mxu1 %v5532_v28  ;;  %v6155_v0 = vld [vmem:[%s5956_s24 + $0x109] sm:$0xff]  ;;  %v6168_v2 = vld [vmem:[%s5956_s24 + $0x111] sm:$0xff]  ;;  %v6176_v4 = vld [vmem:[%s5956_s24 + $0x121] sm:$0xff] }
  0x20   : > { %5031 = vmatmul.mubr.msk.f32.gmra.mrb[4].mxu1 %vm315_vm0, %v5996_v33  ;;  %5537 = vmatprep.subr.bf16.mxu1 %v6004_v36  ;;  %7395 = vst [vmem:[#allocation8_spill] sm:$0xff] %v6155_v0  ;;  %v6158_v1 = vld [vmem:[%s5956_s24 + $0x62] sm:$0xff]  ;;  %7396 = vst [vmem:[#allocation9_spill] sm:$0xff] %v6168_v2  ;;  %v6173_v3 = vld [vmem:[%s5956_s24 + $0x6a] sm:$0xff] }
  0x21   : > { %5255 = vmatmul.mubr.msk.f32.gmra.mrb[4].mxu0 %vm315_vm0, %v6013_v37  ;;  %5033 = vmatprep.mubr.msk.f32.mxu1 %vm315_vm0, %v6001_v34  ;;  %7397 = vst [vmem:[#allocation10_spill] sm:$0xff] %v6176_v4  ;;  %v6179_v5 = vld [vmem:[%s5956_s24 + $0x7a] sm:$0xff]  ;;  %v6188_v6 = vld [vmem:[%s5956_s24 + $0x129] sm:$0xff]  ;;  %v6199_v10 = vld [vmem:[%s5956_s24 + $0x92] sm:$0xff] }
  0x22   : > { %5257 = vmatprep.mubr.msk.f32.mxu0 %vm315_vm0, %v6016_v38  ;;  %7398 = vst [vmem:[#allocation11_spill] sm:$0xff] %v6188_v6  ;;  %v6193_v8 = vld [vmem:[%s5956_s24 + $0x82] sm:$0xff]  ;;  %v6196_v9 = vld [vmem:[%s5956_s24 + $0x139] sm:$0xff]  ;;  %v6216_v14 = vld [vmem:[%s5956_s24 + $0x151] sm:$0xff] }
  0x23   : > { %7399 = vst [vmem:[#allocation12_spill] sm:$0xff] %v6196_v9  ;;  %v6208_v11 = vld [vmem:[%s5956_s24 + $0x141] sm:$0xff]  ;;  %7401 = vst [vmem:[#allocation14_spill] sm:$0xff] %v6216_v14  ;;  %v6219_v15 = vld [vmem:[%s5956_s24 + $0xaa] sm:$0xff] }
  0x24   : > { %5034 = vmatmul.mubr.msk.f32.gmra.mrb[6].mxu1 %vm315_vm0, %v6013_v37  ;;  %7400 = vst [vmem:[#allocation13_spill] sm:$0xff] %v6208_v11  ;;  %v6213_v13 = vld [vmem:[%s5956_s24 + $0x9a] sm:$0xff]  ;;  %v6233_v17 = vld [vmem:[%s5956_s24 + $0xb2] sm:$0xff]  ;;  %v6236_v18 = vld [vmem:[%s5956_s24 + $0x169] sm:$0xff] }
  0x25   : > { %5258 = vmatmul.mubr.msk.f32.gmra.mrb[6].mxu0 %vm315_vm0, %v6028_v39  ;;  %5036 = vmatprep.mubr.msk.f32.mxu1 %vm315_vm0, %v6016_v38  ;;  %v6228_v16 = vld [vmem:[%s5956_s24 + $0x159] sm:$0xff]  ;;  %7403 = vst [vmem:[#allocation16_spill] sm:$0xff] %v6236_v18  ;;  %v6239_v19 = vld [vmem:[%s5956_s24 + $0xc2] sm:$0xff]  ;;  %v6248_v20 = vld [vmem:[%s5956_s24 + $0x171] sm:$0xff] }
  0x26   : > { %5260 = vmatprep.mubr.msk.f32.mxu0 %vm315_vm0, %v6031_v40  ;;  %7402 = vst [vmem:[#allocation15_spill] sm:$0xff] %v6228_v16  ;;  %7404 = vst [vmem:[#allocation17_spill] sm:$0xff] %v6248_v20  ;;  %v6253_v21 = vld [vmem:[%s5956_s24 + $0xca] sm:$0xff]  ;;  %v242_v22 = vld [vmem:[%s5956_s24] sm:$0xff] }
  0x27   : > { %v6257_v23 = vld [vmem:[%s5956_s24 + $0xda] sm:$0xff]  ;;  %v4246_v24 = vld [vmem:[%s7332_s1 + $0x50] sm:$0xff]  ;;  %v243_v26 = vld [vmem:[%s5956_s24 + $0x8] sm:$0xff] }
  0x28   : > { %5037 = vmatmul.mubr.msk.f32.gmra.mrb[8].mxu1 %vm315_vm0, %v6028_v39  ;;  %v4247_v25 = vld [vmem:[%s7332_s1 + $0x58] sm:$0xff]  ;;  %v6274_v28 = vld [vmem:[%s5956_s24 + $0xe2] sm:$0xff]  ;;  %v6306_v55 = vld [vmem:[%s5956_s24 + $0x10a] sm:$0xff] }
  0x29   : > { %5261 = vmatmul.mubr.msk.f32.gmra.mrb[8].mxu0 %vm315_vm0, %v6042_v41  ;;  %5039 = vmatprep.mubr.msk.f32.mxu1 %vm315_vm0, %v6031_v40  ;;  %v6277_v29 = vld [vmem:[%s5956_s24 + $0x18] sm:$0xff]  ;;  %v5540_v31 = vpack.c.bf16 %v4247_v25, %v4246_v24  ;;  %v4312_v32 = vld [vmem:[%s7332_s1 + $0x60] sm:$0xff]  ;;  %v6325_v24 = vld [vmem:[%s5956_s24 + $0x48] sm:$0xff] }
  0x2a   : > { %5263 = vmatprep.mubr.msk.f32.mxu0 %vm315_vm0, %v6045_v42  ;;  %7405 = vst [vmem:[#allocation18_spill] sm:$0xff] %v6277_v29  ;;  %v6280_v30 = vld [vmem:[%s5956_s24 + $0xf2] sm:$0xff]  ;;  %v6293_v49 = vld [vmem:[%s5956_s24 + $0x20] sm:$0xff]  ;;  %7408 = vst [vmem:[#allocation21_spill] sm:$0xff] %v6325_v24 }
  0x2b   : > { %7406 = vst [vmem:[#allocation19_spill] sm:$0xff] %v6293_v49  ;;  %v6300_v50 = vld [vmem:[%s5956_s24 + $0xfa] sm:$0xff]  ;;  %v6328_v25 = vld [vmem:[%s5956_s24 + $0x122] sm:$0xff]  ;;  %v6403_v12 = vld [vmem:[%s5956_s24 + $0x172] sm:$0xff] }
  0x2c   : > { %5040 = vmatmul.mubr.msk.f32.gmra.mrb[10].mxu1 %vm315_vm0, %v6042_v41  ;;  %7416 = vst [vmem:[#allocation29_spill] sm:$0xff] %v6403_v12 }
  0x2d   : > { %5264 = vmatmul.mubr.msk.f32.gmra.mrb[10].mxu0 %vm315_vm0, %v6056_v43  ;;  %5042 = vmatprep.mubr.msk.f32.mxu1 %vm315_vm0, %v6045_v42 }
  0x2e   : > { %5266 = vmatprep.mubr.msk.f32.mxu0 %vm315_vm0, %v6059_v44 }
  0x30   : > { %5043 = vmatmul.mubr.msk.f32.gmra.mrb[12].mxu1 %vm315_vm0, %v6056_v43 }
  0x31   : > { %5267 = vmatmul.mubr.msk.f32.gmra.mrb[12].mxu0 %vm315_vm0, %v6070_v45  ;;  %5045 = vmatprep.mubr.msk.f32.mxu1 %vm315_vm0, %v6059_v44 }
  0x32   : > { %5269 = vmatprep.mubr.msk.f32.mxu0 %vm315_vm0, %v6073_v46 }
  0x34   : > { %5046 = vmatmul.mubr.msk.f32.gmra.mrb[14].mxu1 %vm315_vm0, %v6070_v45 }
  0x35   : > { %5270 = vmatmul.mubr.msk.f32.gmra.mrb[14].mxu0 %vm315_vm0, %v6084_v47  ;;  %5048 = vmatprep.mubr.msk.f32.mxu1 %vm315_vm0, %v6073_v46 }
  0x36   : > { %5304 = vmatprep.mubr.msk.f32.mxu0 %vm315_vm0, %v6087_v48 }
  0x38   : > { %5049 = vmatmul.mubr.msk.f32.gmra.mrb[16].mxu1 %vm315_vm0, %v6084_v47  ;;  %v4653_v47 = vld [vmem:[%s7332_s1 + $0x108] sm:$0xff] }
  0x39   : > { %5305 = vmatmul.mubr.msk.f32.vlgmr.msra.gmra.mrb[0].mxu0 %vm315_vm0, %v6104_v51  ;;  %5051 = vmatprep.mubr.msk.f32.mxu1 %vm315_vm0, %v6107_v52  ;;  %v6446_v52 = vld [vmem:[%s5956_s24 + $0xd8] sm:$0xff] }
  0x3a   : > { %5571 = vmatpush3.bf16.msra.mxu0 %v5568_v35  ;;  %5307 = vmatprep.mubr.msk.f32.mxu0 %vm315_vm0, %v6110_v53  ;;  %v4313_v35 = vld [vmem:[%s7332_s1 + $0x68] sm:$0xff]  ;;  %7423 = vst [vmem:[#allocation36_spill] sm:$0xff] %v6446_v52 }
  0x3b   : > { %5573 = vmatprep.subr.bf16.mxu0 %v5572_v54  ;;  %v6308_v56 = vpack.c.bf16 %v4313_v35, %v4312_v32  ;;  %v6346_v32 = vld [vmem:[%s5956_s24 + $0x60] sm:$0xff] }
  0x3c   : > { %5052 = vmatmul.mubr.msk.f32.gmra.mrb[18].mxu1 %vm315_vm0, %v6125_v57  ;;  %7409 = vst [vmem:[#allocation22_spill] sm:$0xff] %v6346_v32  ;;  %v6349_v35 = vld [vmem:[%s5956_s24 + $0x13a] sm:$0xff]  ;;  %v4586_v57 = vld [vmem:[%s7332_s1 + $0xf0] sm:$0xff] }
  0x3d   : > { %5308 = vmatmul.mubr.msk.f32.gmra.mrb[2].mxu0 %vm315_vm0, %v6130_v58  ;;  %5054 = vmatprep.mubr.msk.f32.mxu1 %vm315_vm0, %v6133_v59  ;;  %v6423_v59 = vld [vmem:[%s5956_s24 + $0x18a] sm:$0xff] }
  0x3e   : > { %5310 = vmatprep.mubr.msk.f32.mxu0 %vm315_vm0, %v6136_v60  ;;  %5575 = vmatpush3.bf16.msra.mxu0 %v5572_v54  ;;  %v6303_v54 = vld [vmem:[%s5956_s24 + $0x30] sm:$0xff]  ;;  %7420 = vst [vmem:[#allocation33_spill] sm:$0xff] %v6423_v59 }
  0x3f   : > { %5577 = vmatprep.subr.bf16.mxu0 %v6138_v61  ;;  %7407 = vst [vmem:[#allocation20_spill] sm:$0xff] %v6303_v54 }
  0x40   : > { %5055 = vmatmul.mubr.msk.f32.gmra.mrb[20].mxu1 %vm315_vm0, %v6147_v62  ;;  %v6409_v62 = vld [vmem:[%s5956_s24 + $0x182] sm:$0xff] }
  0x41   : > { %5311 = vmatmul.mubr.msk.f32.gmra.mrb[4].mxu0 %vm315_vm0, %v6152_v63  ;;  %5057 = vmatprep.mubr.msk.f32.mxu1 %vm315_vm0, %v6155_v0  ;;  %v6406_v0 = vld [vmem:[%s5956_s24 + $0xa8] sm:$0xff]  ;;  %7418 = vst [vmem:[#allocation31_spill] sm:$0xff] %v6409_v62 }
  0x42   : > { %5313 = vmatprep.mubr.msk.f32.mxu0 %vm315_vm0, %v6158_v1  ;;  %7417 = vst [vmem:[#allocation30_spill] sm:$0xff] %v6406_v0 }
  0x44   : > { %5058 = vmatmul.mubr.msk.f32.gmra.mrb[22].mxu1 %vm315_vm0, %v6168_v2  ;;  %v6398_v2 = vld [vmem:[%s5956_s24 + $0x98] sm:$0xff] }
  0x45   : > { %5314 = vmatmul.mubr.msk.f32.gmra.mrb[6].mxu0 %vm315_vm0, %v6173_v3  ;;  %5060 = vmatprep.mubr.msk.f32.mxu1 %vm315_vm0, %v6176_v4  ;;  %v6389_v4 = vld [vmem:[%s5956_s24 + $0x16a] sm:$0xff]  ;;  %7415 = vst [vmem:[#allocation28_spill] sm:$0xff] %v6398_v2 }
  0x46   : > { %5316 = vmatprep.mubr.msk.f32.mxu0 %vm315_vm0, %v6179_v5  ;;  %7414 = vst [vmem:[#allocation27_spill] sm:$0xff] %v6389_v4 }
  0x48   : > { %5061 = vmatmul.mubr.msk.f32.gmra.mrb[24].mxu1 %vm315_vm0, %v6188_v6  ;;  %v6386_v6 = vld [vmem:[%s5956_s24 + $0x90] sm:$0xff] }
  0x49   : > { %5317 = vmatmul.mubr.msk.f32.gmra.mrb[8].mxu0 %vm315_vm0, %v6193_v8  ;;  %5063 = vmatprep.mubr.msk.f32.mxu1 %vm315_vm0, %v6196_v9  ;;  %v6383_v9 = vld [vmem:[%s5956_s24 + $0x15a] sm:$0xff]  ;;  %7413 = vst [vmem:[#allocation26_spill] sm:$0xff] %v6386_v6 }
  0x4a   : > { %5319 = vmatprep.mubr.msk.f32.mxu0 %vm315_vm0, %v6199_v10 }
  0x4c   : > { %5064 = vmatmul.mubr.msk.f32.gmra.mrb[26].mxu1 %vm315_vm0, %v6208_v11  ;;  %v6378_v11 = vld [vmem:[%s5956_s24 + $0x80] sm:$0xff] }
  0x4d   : > { %5320 = vmatmul.mubr.msk.f32.gmra.mrb[10].mxu0 %vm315_vm0, %v6213_v13  ;;  %5066 = vmatprep.mubr.msk.f32.mxu1 %vm315_vm0, %v6216_v14  ;;  %v6369_v14 = vld [vmem:[%s5956_s24 + $0x152] sm:$0xff]  ;;  %7412 = vst [vmem:[#allocation25_spill] sm:$0xff] %v6378_v11 }
  0x4e   : > { %5322 = vmatprep.mubr.msk.f32.mxu0 %vm315_vm0, %v6219_v15 }
  0x50   : > { %5067 = vmatmul.mubr.msk.f32.gmra.mrb[28].mxu1 %vm315_vm0, %v6228_v16  ;;  %v6366_v16 = vld [vmem:[%s5956_s24 + $0x78] sm:$0xff] }
  0x51   : > { %5323 = vmatmul.mubr.msk.f32.gmra.mrb[12].mxu0 %vm315_vm0, %v6233_v17  ;;  %5069 = vmatprep.mubr.msk.f32.mxu1 %vm315_vm0, %v6236_v18  ;;  %v6363_v18 = vld [vmem:[%s5956_s24 + $0x142] sm:$0xff]  ;;  %7411 = vst [vmem:[#allocation24_spill] sm:$0xff] %v6366_v16 }
  0x52   : > { %5325 = vmatprep.mubr.msk.f32.mxu0 %vm315_vm0, %v6239_v19 }
  0x54   : > { %5070 = vmatmul.mubr.msk.f32.gmra.mrb[30].mxu1 %vm315_vm0, %v6248_v20  ;;  %v6358_v20 = vld [vmem:[%s5956_s24 + $0x68] sm:$0xff] }
  0x55   : > { %5326 = vmatmul.mubr.msk.f32.gmra.mrb[14].mxu0 %vm315_vm0, %v6253_v21  ;;  %5080 = vmatprep.mubr.msk.f32.mxu1 %vm315_vm0, %v242_v22  ;;  %v6322_v22 = vld [vmem:[%s5956_s24 + $0x112] sm:$0xff]  ;;  %7410 = vst [vmem:[#allocation23_spill] sm:$0xff] %v6358_v20 }
  0x56   : > { %5328 = vmatprep.mubr.msk.f32.mxu0 %vm315_vm0, %v6257_v23 }
  0x58   : > { %5081 = vmatmul.mubr.msk.f32.vlgmr.msra.gmra.mrb[0].mxu1 %vm315_vm0, %v243_v26  ;;  %v6338_v26 = vld [vmem:[%s5956_s24 + $0x50] sm:$0xff] }
  0x59   : > { %5329 = vmatmul.mubr.msk.f32.gmra.mrb[16].mxu0 %vm315_vm0, %v6274_v28  ;;  %5539 = vmatpush3.bf16.msra.mxu1 %v6004_v36  ;;  %v6317_v36 = vld [vmem:[%s5956_s24 + $0x38] sm:$0xff] }
  0x5a   : > { %5083 = vmatprep.mubr.msk.f32.mxu1 %vm315_vm0, %v6277_v29  ;;  %5331 = vmatprep.mubr.msk.f32.mxu0 %vm315_vm0, %v6280_v30  ;;  %v6426_v29 = vld [vmem:[%s5956_s24 + $0xc0] sm:$0xff] }
  0x5b   : > { %5541 = vmatprep.subr.bf16.mxu1 %v5540_v31  ;;  %7421 = vst [vmem:[#allocation34_spill] sm:$0xff] %v6426_v29 }
  0x5c   : > { %5084 = vmatmul.mubr.msk.f32.gmra.mrb[2].mxu1 %vm315_vm0, %v6293_v49  ;;  %v6418_v49 = vld [vmem:[%s5956_s24 + $0xb0] sm:$0xff] }
  0x5d   : > { %5332 = vmatmul.mubr.msk.f32.gmra.mrb[18].mxu0 %vm315_vm0, %v6300_v50  ;;  %5086 = vmatprep.mubr.msk.f32.mxu1 %vm315_vm0, %v6303_v54  ;;  %7419 = vst [vmem:[#allocation32_spill] sm:$0xff] %v6418_v49 }
  0x5e   : > { %5334 = vmatprep.mubr.msk.f32.mxu0 %vm315_vm0, %v6306_v55  ;;  %5543 = vmatpush3.bf16.msra.mxu1 %v5540_v31  ;;  %v6343_v31 = vld [vmem:[%s5956_s24 + $0x12a] sm:$0xff] }
  0x5f   : > { %5545 = vmatprep.subr.bf16.mxu1 %v6308_v56 }
  0x60   : > { %5087 = vmatmul.mubr.msk.f32.gmra.mrb[4].mxu1 %vm315_vm0, %v6317_v36 }
  0x61   : > { %5335 = vmatmul.mubr.msk.f32.gmra.mrb[20].mxu0 %vm315_vm0, %v6322_v22  ;;  %5089 = vmatprep.mubr.msk.f32.mxu1 %vm315_vm0, %v6325_v24 }
  0x62   : > { %5337 = vmatprep.mubr.msk.f32.mxu0 %vm315_vm0, %v6328_v25 }
  0x64   : > { %5090 = vmatmul.mubr.msk.f32.gmra.mrb[6].mxu1 %vm315_vm0, %v6338_v26 }
  0x65   : > { %5338 = vmatmul.mubr.msk.f32.gmra.mrb[22].mxu0 %vm315_vm0, %v6343_v31  ;;  %5092 = vmatprep.mubr.msk.f32.mxu1 %vm315_vm0, %v6346_v32 }
  0x66   : > { %5340 = vmatprep.mubr.msk.f32.mxu0 %vm315_vm0, %v6349_v35 }
  0x68   : > { %5093 = vmatmul.mubr.msk.f32.gmra.mrb[8].mxu1 %vm315_vm0, %v6358_v20 }
  0x69   : > { %5341 = vmatmul.mubr.msk.f32.gmra.mrb[24].mxu0 %vm315_vm0, %v6363_v18  ;;  %5095 = vmatprep.mubr.msk.f32.mxu1 %vm315_vm0, %v6366_v16 }
  0x6a   : > { %5343 = vmatprep.mubr.msk.f32.mxu0 %vm315_vm0, %v6369_v14 }
  0x6c   : > { %5096 = vmatmul.mubr.msk.f32.gmra.mrb[10].mxu1 %vm315_vm0, %v6378_v11 }
  0x6d   : > { %5344 = vmatmul.mubr.msk.f32.gmra.mrb[26].mxu0 %vm315_vm0, %v6383_v9  ;;  %5098 = vmatprep.mubr.msk.f32.mxu1 %vm315_vm0, %v6386_v6 }
  0x6e   : > { %5346 = vmatprep.mubr.msk.f32.mxu0 %vm315_vm0, %v6389_v4 }
  0x70   : > { %5099 = vmatmul.mubr.msk.f32.gmra.mrb[12].mxu1 %vm315_vm0, %v6398_v2 }
  0x71   : > { %5347 = vmatmul.mubr.msk.f32.gmra.mrb[28].mxu0 %vm315_vm0, %v6403_v12  ;;  %5101 = vmatprep.mubr.msk.f32.mxu1 %vm315_vm0, %v6406_v0  ;;  %v4587_v12 = vld [vmem:[%s7332_s1 + $0xf8] sm:$0xff] }
  0x72   : > { %5349 = vmatprep.mubr.msk.f32.mxu0 %vm315_vm0, %v6409_v62  ;;  %v6441_v62 = vld [vmem:[%s5956_s24 + $0xc8] sm:$0xff]  ;;  %v5580_v4 = vpack.c.bf16 %v4587_v12, %v4586_v57  ;;  %v6467_v12 = vld [vmem:[%s5956_s24 + $0xf0] sm:$0xff] }
  0x73   : > { %7422 = vst [vmem:[#allocation35_spill] sm:$0xff] %v6441_v62 }
  0x74   : > { %5102 = vmatmul.mubr.msk.f32.gmra.mrb[14].mxu1 %vm315_vm0, %v6418_v49 }
  0x75   : > { %5350 = vmatmul.mubr.msk.f32.gmra.mrb[30].mxu0 %vm315_vm0, %v6423_v59  ;;  %5104 = vmatprep.mubr.msk.f32.mxu1 %vm315_vm0, %v6426_v29  ;;  %v4652_v59 = vld [vmem:[%s7332_s1 + $0x100] sm:$0xff] }
  0x76   : > { %5360 = vmatprep.mubr.msk.f32.mxu0 %vm315_vm0, %v6303_v54  ;;  %v6461_v54 = vld [vmem:[%s5956_s24 + $0xe0] sm:$0xff]  ;;  %v6469_v57 = vpack.c.bf16 %v4653_v47, %v4652_v59  ;;  %v6493_v47 = vld [vmem:[%s5956_s24 + $0x110] sm:$0xff] }
  0x77   : > { %v6498_v59 = vld [vmem:[%s5956_s24 + $0x120] sm:$0xff] }
  0x78   : > { %5105 = vmatmul.mubr.msk.f32.gmra.mrb[16].mxu1 %vm315_vm0, %v6441_v62 }
  0x79   : > { %5361 = vmatmul.mubr.msk.f32.vlgmr.msra.gmra.mrb[0].mxu0 %vm315_vm0, %v6317_v36  ;;  %5107 = vmatprep.mubr.msk.f32.mxu1 %vm315_vm0, %v6446_v52 }
  0x7a   : > { %5579 = vmatpush3.bf16.msra.mxu0 %v6138_v61  ;;  %5363 = vmatprep.mubr.msk.f32.mxu0 %vm315_vm0, %v6325_v24  ;;  %v6478_v61 = vld [vmem:[%s5956_s24 + $0xf8] sm:$0xff]  ;;  %v6483_v24 = vld [vmem:[%s5956_s24 + $0x108] sm:$0xff] }
  0x7b   : > { %5581 = vmatprep.subr.bf16.mxu0 %v5580_v4 }
  0x7c   : > { %5108 = vmatmul.mubr.msk.f32.gmra.mrb[18].mxu1 %vm315_vm0, %v6461_v54 }
  0x7d   : > { %5364 = vmatmul.mubr.msk.f32.gmra.mrb[2].mxu0 %vm315_vm0, %v6338_v26  ;;  %5110 = vmatprep.mubr.msk.f32.mxu1 %vm315_vm0, %v6467_v12 }
  0x7e   : > { %5366 = vmatprep.mubr.msk.f32.mxu0 %vm315_vm0, %v6346_v32  ;;  %5583 = vmatpush3.bf16.msra.mxu0 %v5580_v4  ;;  %v6507_v4 = vld [vmem:[%s5956_s24 + $0x128] sm:$0xff] }
  0x7f   : > { %5585 = vmatprep.subr.bf16.mxu0 %v6469_v57  ;;  %v959_v32 = vld [vmem:[%s5956_s24 + $0xa] sm:$0xff] }
  0x80   : > { %5111 = vmatmul.mubr.msk.f32.gmra.mrb[20].mxu1 %vm315_vm0, %v6478_v61 }
  0x81   : > { %5367 = vmatmul.mubr.msk.f32.gmra.mrb[4].mxu0 %vm315_vm0, %v6358_v20  ;;  %5113 = vmatprep.mubr.msk.f32.mxu1 %vm315_vm0, %v6483_v24  ;;  %v6512_v20 = vld [vmem:[%s5956_s24 + $0x138] sm:$0xff] }
  0x82   : > { %5369 = vmatprep.mubr.msk.f32.mxu0 %vm315_vm0, %v6366_v16  ;;  %v6526_v16 = vld [vmem:[%s5956_s24 + $0x150] sm:$0xff] }
  0x84   : > { %5114 = vmatmul.mubr.msk.f32.gmra.mrb[22].mxu1 %vm315_vm0, %v6493_v47 }
  0x85   : > { %5370 = vmatmul.mubr.msk.f32.gmra.mrb[6].mxu0 %vm315_vm0, %v6378_v11  ;;  %5116 = vmatprep.mubr.msk.f32.mxu1 %vm315_vm0, %v6498_v59  ;;  %v6521_v11 = vld [vmem:[%s5956_s24 + $0x140] sm:$0xff] }
  0x86   : > { %5372 = vmatprep.mubr.msk.f32.mxu0 %vm315_vm0, %v6386_v6  ;;  %v6540_v6 = vld [vmem:[%s5956_s24 + $0x168] sm:$0xff] }
  0x88   : > { %5117 = vmatmul.mubr.msk.f32.gmra.mrb[24].mxu1 %vm315_vm0, %v6507_v4 }
  0x89   : > { %5373 = vmatmul.mubr.msk.f32.gmra.mrb[8].mxu0 %vm315_vm0, %v6398_v2  ;;  %5119 = vmatprep.mubr.msk.f32.mxu1 %vm315_vm0, %v6512_v20  ;;  %v6535_v2 = vld [vmem:[%s5956_s24 + $0x158] sm:$0xff] }
  0x8a   : > { %5375 = vmatprep.mubr.msk.f32.mxu0 %vm315_vm0, %v6406_v0  ;;  %v958_v0 = vld [vmem:[%s5956_s24 + $0x2] sm:$0xff] }
  0x8c   : > { %5120 = vmatmul.mubr.msk.f32.gmra.mrb[26].mxu1 %vm315_vm0, %v6521_v11 }
  0x8d   : > { %5376 = vmatmul.mubr.msk.f32.gmra.mrb[10].mxu0 %vm315_vm0, %v6418_v49  ;;  %5122 = vmatprep.mubr.msk.f32.mxu1 %vm315_vm0, %v6526_v16  ;;  %v6549_v49 = vld [vmem:[%s5956_s24 + $0x170] sm:$0xff] }
  0x8e   : > { %5378 = vmatprep.mubr.msk.f32.mxu0 %vm315_vm0, %v6426_v29  ;;  %v4314_v29 = vld [vmem:[%s7332_s1 + $0x70] sm:$0xff] }
  0x90   : > { %5123 = vmatmul.mubr.msk.f32.gmra.mrb[28].mxu1 %vm315_vm0, %v6535_v2 }
  0x91   : > { %5379 = vmatmul.mubr.msk.f32.gmra.mrb[12].mxu0 %vm315_vm0, %v6441_v62  ;;  %5125 = vmatprep.mubr.msk.f32.mxu1 %vm315_vm0, %v6540_v6  ;;  %v4315_v62 = vld [vmem:[%s7332_s1 + $0x78] sm:$0xff] }
  0x92   : > { %5381 = vmatprep.mubr.msk.f32.mxu0 %vm315_vm0, %v6446_v52  ;;  %v5548_v52 = vpack.c.bf16 %v4315_v62, %v4314_v29  ;;  %v4515_v62 = vld [vmem:[%s5956_s24 + $0x1a0] sm:$0xff]  ;;  %v4655_v29 = vld [vmem:[%s7332_s1 + $0x118] sm:$0xff] }
  0x94   : > { %5126 = vmatmul.mubr.msk.f32.gmra.mrb[30].mxu1 %vm315_vm0, %v6549_v49 }
  0x95   : > { %5382 = vmatmul.mubr.msk.f32.gmra.mrb[14].mxu0 %vm315_vm0, %v6461_v54  ;;  %5136 = vmatprep.mubr.msk.f32.mxu1 %vm315_vm0, %v958_v0  ;;  %v4654_v0 = vld [vmem:[%s7332_s1 + $0x110] sm:$0xff] }
  0x96   : > { %5384 = vmatprep.mubr.msk.f32.mxu0 %vm315_vm0, %v6467_v12 }
  0x98   : > { %5137 = vmatmul.mubr.msk.f32.vlgmr.msra.gmra.mrb[0].mxu1 %vm315_vm0, %v959_v32  ;;  %v7437_v32 = vld [vmem:[#allocation21_spill] sm:$0xff] }
  0x99   : > { %5385 = vmatmul.mubr.msk.f32.gmra.mrb[16].mxu0 %vm315_vm0, %v6478_v61  ;;  %5547 = vmatpush3.bf16.msra.mxu1 %v6308_v56  ;;  %v5588_v56 = vpack.c.bf16 %v4655_v29, %v4654_v0  ;;  %v7443_v0 = vld [vmem:[#allocation13_spill] sm:$0xff]  ;;  %v7444_v29 = vld [vmem:[#allocation24_spill] sm:$0xff] }
  0x9a   : > { %5139 = vmatprep.mubr.msk.f32.mxu1 %vm315_vm0, %v6087_v48  ;;  %5387 = vmatprep.mubr.msk.f32.mxu0 %vm315_vm0, %v6483_v24  ;;  %v6610_v48 = vld [vmem:[%s5956_s24 + $0x180] sm:$0xff] }
  0x9b   : > { %5549 = vmatprep.subr.bf16.mxu1 %v5548_v52 }
  0x9c   : > { %5140 = vmatmul.mubr.msk.f32.gmra.mrb[2].mxu1 %vm315_vm0, %v6104_v51  ;;  %v6621_v51 = vld [vmem:[%s5956_s24 + $0x188] sm:$0xff] }
  0x9d   : > { %5388 = vmatmul.mubr.msk.f32.gmra.mrb[18].mxu0 %vm315_vm0, %v6493_v47  ;;  %5142 = vmatprep.mubr.msk.f32.mxu1 %vm315_vm0, %v6110_v53 }
  0x9e   : > { %5390 = vmatprep.mubr.msk.f32.mxu0 %vm315_vm0, %v6498_v59  ;;  %5551 = vmatpush3.bf16.msra.mxu1 %v5548_v52  ;;  %v4514_v52 = vld [vmem:[%s5956_s24 + $0x198] sm:$0xff] }
  0x9f   : > { %5592 = vmatprep.subr.bf16.mxu1 %v5925_v7 }
  0xa0   : > { %5143 = vmatmul.mubr.msk.f32.gmra.mrb[4].mxu1 %vm315_vm0, %v6130_v58 }
  0xa1   : > { %5391 = vmatmul.mubr.msk.f32.gmra.mrb[20].mxu0 %vm315_vm0, %v6507_v4  ;;  %5145 = vmatprep.mubr.msk.f32.mxu1 %vm315_vm0, %v6136_v60 }
  0xa2   : > { %5393 = vmatprep.mubr.msk.f32.mxu0 %vm315_vm0, %v6512_v20 }
  0xa4   : > { %5146 = vmatmul.mubr.msk.f32.gmra.mrb[6].mxu1 %vm315_vm0, %v6152_v63 }
  0xa5   : > { %5394 = vmatmul.mubr.msk.f32.gmra.mrb[22].mxu0 %vm315_vm0, %v6521_v11  ;;  %5148 = vmatprep.mubr.msk.f32.mxu1 %vm315_vm0, %v6158_v1 }
  0xa6   : > { %5396 = vmatprep.mubr.msk.f32.mxu0 %vm315_vm0, %v6526_v16 }
  0xa8   : > { %5149 = vmatmul.mubr.msk.f32.gmra.mrb[8].mxu1 %vm315_vm0, %v6173_v3 }
  0xa9   : > { %5397 = vmatmul.mubr.msk.f32.gmra.mrb[24].mxu0 %vm315_vm0, %v6535_v2  ;;  %5151 = vmatprep.mubr.msk.f32.mxu1 %vm315_vm0, %v6179_v5 }
  0xaa   : > { %5399 = vmatprep.mubr.msk.f32.mxu0 %vm315_vm0, %v6540_v6 }
  0xac   : > { %5152 = vmatmul.mubr.msk.f32.gmra.mrb[10].mxu1 %vm315_vm0, %v6193_v8 }
  0xad   : > { %5400 = vmatmul.mubr.msk.f32.gmra.mrb[26].mxu0 %vm315_vm0, %v6549_v49  ;;  %5154 = vmatprep.mubr.msk.f32.mxu1 %vm315_vm0, %v6199_v10 }
  0xae   : > { %5402 = vmatprep.mubr.msk.f32.mxu0 %vm315_vm0, %v6610_v48 }
  0xb0   : > { %5155 = vmatmul.mubr.msk.f32.gmra.mrb[12].mxu1 %vm315_vm0, %v6213_v13 }
  0xb1   : > { %5403 = vmatmul.mubr.msk.f32.gmra.mrb[28].mxu0 %vm315_vm0, %v6621_v51  ;;  %5157 = vmatprep.mubr.msk.f32.mxu1 %vm315_vm0, %v6219_v15 }
  0xb2   : > { %5405 = vmatprep.mubr.msk.f32.mxu0 %vm315_vm0, %v4514_v52  ;;  %v7440_v52 = vld [vmem:[#allocation22_spill] sm:$0xff] }
  0xb4   : > { %5158 = vmatmul.mubr.msk.f32.gmra.mrb[14].mxu1 %vm315_vm0, %v6233_v17 }
  0xb5   : > { %5406 = vmatmul.mubr.msk.f32.gmra.mrb[30].mxu0 %vm315_vm0, %v4515_v62  ;;  %5160 = vmatprep.mubr.msk.f32.mxu1 %vm315_vm0, %v6239_v19  ;;  %v7442_v62 = vld [vmem:[#allocation23_spill] sm:$0xff] }
  0xb6   : > { %5416 = vmatprep.mubr.msk.f32.mxu0 %vm315_vm0, %v5979_v27  ;;  %v7424_v27 = vld [vmem:[#allocation3_spill] sm:$0xff] }
  0xb8   : > { %5161 = vmatmul.mubr.msk.f32.gmra.mrb[16].mxu1 %vm315_vm0, %v6253_v21 }
  0xb9   : > { %5417 = vmatmul.mubr.msk.f32.vlgmr.msra.gmra.mrb[0].mxu0 %vm315_vm0, %v5996_v33  ;;  %5163 = vmatprep.mubr.msk.f32.mxu1 %vm315_vm0, %v6257_v23  ;;  %v7425_v33 = vld [vmem:[#allocation27_spill] sm:$0xff] }
  0xba   : > { %5587 = vmatpush3.bf16.msra.mxu0 %v6469_v57  ;;  %5419 = vmatprep.mubr.msk.f32.mxu0 %vm315_vm0, %v6001_v34  ;;  %v7426_v34 = vld [vmem:[#allocation4_spill] sm:$0xff]  ;;  %v7438_v57 = vld [vmem:[#allocation10_spill] sm:$0xff] }
  0xbb   : > { %5589 = vmatprep.subr.bf16.mxu0 %v5588_v56 }
  0xbc   : > { %5164 = vmatmul.mubr.msk.f32.gmra.mrb[18].mxu1 %vm315_vm0, %v6274_v28 }
  0xbd   : > { %5420 = vmatmul.mubr.msk.f32.gmra.mrb[2].mxu0 %vm315_vm0, %v6013_v37  ;;  %5166 = vmatprep.mubr.msk.f32.mxu1 %vm315_vm0, %v6280_v30  ;;  %v7427_v37 = vld [vmem:[#allocation29_spill] sm:$0xff] }
  0xbe   : > { %5422 = vmatprep.mubr.msk.f32.mxu0 %vm315_vm0, %v6016_v38  ;;  %5591 = vmatpush3.bf16.msra.mxu0 %v5588_v56  ;;  %v7428_v38 = vld [vmem:[#allocation5_spill] sm:$0xff] }
  0xbf   : > { %v7446_v56 = vld [vmem:[#allocation25_spill] sm:$0xff] }
  0xc0   : > { %5167 = vmatmul.mubr.msk.f32.gmra.mrb[20].mxu1 %vm315_vm0, %v6300_v50 }
  0xc1   : > { %5423 = vmatmul.mubr.msk.f32.gmra.mrb[4].mxu0 %vm315_vm0, %v6028_v39  ;;  %5169 = vmatprep.mubr.msk.f32.mxu1 %vm315_vm0, %v6306_v55  ;;  %v7429_v39 = vld [vmem:[#allocation18_spill] sm:$0xff] }
  0xc2   : > { %5425 = vmatprep.mubr.msk.f32.mxu0 %vm315_vm0, %v6031_v40  ;;  %v7430_v40 = vld [vmem:[#allocation6_spill] sm:$0xff] }
  0xc4   : > { %5170 = vmatmul.mubr.msk.f32.gmra.mrb[22].mxu1 %vm315_vm0, %v6322_v22 }
  0xc5   : > { %5426 = vmatmul.mubr.msk.f32.gmra.mrb[6].mxu0 %vm315_vm0, %v6042_v41  ;;  %5172 = vmatprep.mubr.msk.f32.mxu1 %vm315_vm0, %v6328_v25  ;;  %v7431_v41 = vld [vmem:[#allocation19_spill] sm:$0xff] }
  0xc6   : > { %5428 = vmatprep.mubr.msk.f32.mxu0 %vm315_vm0, %v6045_v42  ;;  %v7432_v42 = vld [vmem:[#allocation7_spill] sm:$0xff] }
  0xc8   : > { %5173 = vmatmul.mubr.msk.f32.gmra.mrb[24].mxu1 %vm315_vm0, %v6343_v31 }
  0xc9   : > { %5429 = vmatmul.mubr.msk.f32.gmra.mrb[8].mxu0 %vm315_vm0, %v6056_v43  ;;  %5175 = vmatprep.mubr.msk.f32.mxu1 %vm315_vm0, %v6349_v35  ;;  %v7433_v43 = vld [vmem:[#allocation20_spill] sm:$0xff] }
  0xca   : > { %5431 = vmatprep.mubr.msk.f32.mxu0 %vm315_vm0, %v6059_v44  ;;  %v7434_v44 = vld [vmem:[#allocation8_spill] sm:$0xff] }
  0xcc   : > { %5176 = vmatmul.mubr.msk.f32.gmra.mrb[26].mxu1 %vm315_vm0, %v6363_v18 }
  0xcd   : > { %5432 = vmatmul.mubr.msk.f32.gmra.mrb[10].mxu0 %vm315_vm0, %v6070_v45  ;;  %5178 = vmatprep.mubr.msk.f32.mxu1 %vm315_vm0, %v6369_v14  ;;  %v7435_v45 = vld [vmem:[#allocation2_spill] sm:$0xff] }
  0xce   : > { %5434 = vmatprep.mubr.msk.f32.mxu0 %vm315_vm0, %v6073_v46  ;;  %v7436_v46 = vld [vmem:[#allocation9_spill] sm:$0xff] }
  0xd0   : > { %5179 = vmatmul.mubr.msk.f32.gmra.mrb[28].mxu1 %vm315_vm0, %v6383_v9 }
  0xd1   : > { %5435 = vmatmul.mubr.msk.f32.gmra.mrb[12].mxu0 %vm315_vm0, %v7424_v27  ;;  %5181 = vmatprep.mubr.msk.f32.mxu1 %vm315_vm0, %v7425_v33  ;;  %v7447_v27 = vld [vmem:[#allocation15_spill] sm:$0xff] }
  0xd2   : > { %5437 = vmatprep.mubr.msk.f32.mxu0 %vm315_vm0, %v7426_v34 }
  0xd4   : > { %5182 = vmatmul.mubr.msk.f32.gmra.mrb[30].mxu1 %vm315_vm0, %v7427_v37 }
  0xd5   : > { %5438 = vmatmul.mubr.msk.f32.gmra.mrb[14].mxu0 %vm315_vm0, %v7428_v38  ;;  %5192 = vmatprep.mubr.msk.f32.mxu1 %vm315_vm0, %v7429_v39  ;;  %v7448_v39 = vld [vmem:[#allocation26_spill] sm:$0xff] }
  0xd6   : > { %5440 = vmatprep.mubr.msk.f32.mxu0 %vm315_vm0, %v7430_v40 }
  0xd8   : > { %5193 = vmatmul.mubr.msk.f32.vlgmr.msra.gmra.mrb[0].mxu1 %vm315_vm0, %v7431_v41  ;;  %v7449_v41 = vld [vmem:[#allocation16_spill] sm:$0xff] }
  0xd9   : > { %5441 = vmatmul.mubr.msk.f32.gmra.mrb[16].mxu0 %vm315_vm0, %v7432_v42  ;;  %5594 = vmatpush3.bf16.msra.mxu1 %v5925_v7  ;;  %v7439_v7 = vld [vmem:[#allocation11_spill] sm:$0xff] }
  0xda   : > { %5195 = vmatprep.mubr.msk.f32.mxu1 %vm315_vm0, %v7433_v43  ;;  %5443 = vmatprep.mubr.msk.f32.mxu0 %vm315_vm0, %v7434_v44  ;;  %v6754_v43 = vld [vmem:[%s5956_s24 + $0x181] sm:$0xff] }
  0xdb   : > { %5593 = vmatprep.subr.bf16.mxu1 %v7435_v45 }
  0xdc   : > { %5196 = vmatmul.mubr.msk.f32.gmra.mrb[2].mxu1 %vm315_vm0, %v6317_v36  ;;  %v7441_v36 = vld [vmem:[#allocation12_spill] sm:$0xff] }
  0xdd   : > { %5444 = vmatmul.mubr.msk.f32.gmra.mrb[18].mxu0 %vm315_vm0, %v7436_v46  ;;  %5198 = vmatprep.mubr.msk.f32.mxu1 %vm315_vm0, %v7437_v32  ;;  %v7451_v32 = vld [vmem:[#allocation17_spill] sm:$0xff] }
  0xde   : > { %5446 = vmatprep.mubr.msk.f32.mxu0 %vm315_vm0, %v7438_v57  ;;  %5595 = vmatpush3.bf16.msra.mxu1 %v7435_v45  ;;  %v7450_v45 = vld [vmem:[#allocation28_spill] sm:$0xff] }
  0xe0   : > { %5199 = vmatmul.mubr.msk.f32.gmra.mrb[4].mxu1 %vm315_vm0, %v6338_v26  ;;  %v7445_v26 = vld [vmem:[#allocation14_spill] sm:$0xff] }
  0xe1   : > { %5447 = vmatmul.mubr.msk.f32.gmra.mrb[20].mxu0 %vm315_vm0, %v7439_v7  ;;  %5201 = vmatprep.mubr.msk.f32.mxu1 %vm315_vm0, %v7440_v52  ;;  %v7452_v52 = vld [vmem:[#allocation30_spill] sm:$0xff] }
  0xe2   : > { %5449 = vmatprep.mubr.msk.f32.mxu0 %vm315_vm0, %v7441_v36 }
  0xe4   : > { %5202 = vmatmul.mubr.msk.f32.gmra.mrb[6].mxu1 %vm315_vm0, %v7442_v62  ;;  %v6765_v62 = vld [vmem:[%s5956_s24 + $0x189] sm:$0xff] }
  0xe5   : > { %5450 = vmatmul.mubr.msk.f32.gmra.mrb[22].mxu0 %vm315_vm0, %v7443_v0  ;;  %5204 = vmatprep.mubr.msk.f32.mxu1 %vm315_vm0, %v7444_v29  ;;  %v4582_v29 = vld [vmem:[%s5956_s24 + $0x199] sm:$0xff] }
  0xe6   : > { %5452 = vmatprep.mubr.msk.f32.mxu0 %vm315_vm0, %v7445_v26 }
  0xe8   : > { %5205 = vmatmul.mubr.msk.f32.gmra.mrb[8].mxu1 %vm315_vm0, %v7446_v56  ;;  %v7453_v56 = vld [vmem:[#allocation32_spill] sm:$0xff] }
  0xe9   : > { %5453 = vmatmul.mubr.msk.f32.gmra.mrb[24].mxu0 %vm315_vm0, %v7447_v27  ;;  %5207 = vmatprep.mubr.msk.f32.mxu1 %vm315_vm0, %v7448_v39  ;;  %v7454_v39 = vld [vmem:[#allocation34_spill] sm:$0xff] }
  0xea   : > { %5455 = vmatprep.mubr.msk.f32.mxu0 %vm315_vm0, %v7449_v41 }
  0xec   : > { %5208 = vmatmul.mubr.msk.f32.gmra.mrb[10].mxu1 %vm315_vm0, %v7450_v45  ;;  %v4583_v45 = vld [vmem:[%s5956_s24 + $0x1a1] sm:$0xff] }
  0xed   : > { %5456 = vmatmul.mubr.msk.f32.gmra.mrb[26].mxu0 %vm315_vm0, %v7451_v32  ;;  %5210 = vmatprep.mubr.msk.f32.mxu1 %vm315_vm0, %v7452_v52  ;;  %v7455_v32 = vld [vmem:[#allocation35_spill] sm:$0xff]  ;;  %v7456_v52 = vld [vmem:[#allocation36_spill] sm:$0xff] }
  0xee   : > { %5458 = vmatprep.mubr.msk.f32.mxu0 %vm315_vm0, %v6754_v43 }
  0xf0   : > { %5211 = vmatmul.mubr.msk.f32.gmra.mrb[12].mxu1 %vm315_vm0, %v7453_v56 }
  0xf1   : > { %5459 = vmatmul.mubr.msk.f32.gmra.mrb[28].mxu0 %vm315_vm0, %v6765_v62  ;;  %5213 = vmatprep.mubr.msk.f32.mxu1 %vm315_vm0, %v7454_v39 }
  0xf2   : > { %5461 = vmatprep.mubr.msk.f32.mxu0 %vm315_vm0, %v4582_v29 }
  0xf4   : > { %5214 = vmatmul.mubr.msk.f32.gmra.mrb[14].mxu1 %vm315_vm0, %v7455_v32 }
  0xf5   : > { %5462 = vmatmul.mubr.msk.f32.gmra.mrb[30].mxu0 %vm315_vm0, %v4583_v45  ;;  %5216 = vmatprep.mubr.msk.f32.mxu1 %vm315_vm0, %v7456_v52 }
  0xf6   : > { %5472 = vmatprep.mubr.msk.f32.mxu0 %vm315_vm0, %v6110_v53  ;;  %v7457_v53 = vld [vmem:[#allocation31_spill] sm:$0xff] }
  0xf8   : > { %5217 = vmatmul.mubr.msk.f32.gmra.mrb[16].mxu1 %vm315_vm0, %v6461_v54 }
  0xf9   : > { %5473 = vmatmul.mubr.msk.f32.vlgmr.msra.gmra.mrb[0].mxu0 %vm315_vm0, %v6130_v58  ;;  %5219 = vmatprep.mubr.msk.f32.mxu1 %vm315_vm0, %v6467_v12  ;;  %v4650_v58 = vld [vmem:[%s5956_s24 + $0x19a] sm:$0xff] }
  0xfa   : > { %5475 = vmatprep.mubr.msk.f32.mxu0 %vm315_vm0, %v6136_v60  ;;  %v7458_v60 = vld [vmem:[#allocation17_spill] sm:$0xff] }
  0xfc   : > { %5220 = vmatmul.mubr.msk.f32.gmra.mrb[18].mxu1 %vm315_vm0, %v6478_v61 }
  0xfd   : > { %5476 = vmatmul.mubr.msk.f32.gmra.mrb[2].mxu0 %vm315_vm0, %v6152_v63  ;;  %5222 = vmatprep.mubr.msk.f32.mxu1 %vm315_vm0, %v6483_v24  ;;  %v7459_v63 = vld [vmem:[#allocation33_spill] sm:$0xff] }
  0xfe   : > { %5478 = vmatprep.mubr.msk.f32.mxu0 %vm315_vm0, %v6158_v1  ;;  %v4651_v1 = vld [vmem:[%s5956_s24 + $0x1a2] sm:$0xff] }
 0x100   : > { %5223 = vmatmul.mubr.msk.f32.gmra.mrb[20].mxu1 %vm315_vm0, %v6493_v47 }
 0x101   : > { %5479 = vmatmul.mubr.msk.f32.gmra.mrb[4].mxu0 %vm315_vm0, %v6173_v3  ;;  %5225 = vmatprep.mubr.msk.f32.mxu1 %vm315_vm0, %v6498_v59 }
 0x102   : > { %5481 = vmatprep.mubr.msk.f32.mxu0 %vm315_vm0, %v6179_v5 }
 0x104   : > { %5226 = vmatmul.mubr.msk.f32.gmra.mrb[22].mxu1 %vm315_vm0, %v6507_v4 }
 0x105   : > { %5482 = vmatmul.mubr.msk.f32.gmra.mrb[6].mxu0 %vm315_vm0, %v6193_v8  ;;  %5228 = vmatprep.mubr.msk.f32.mxu1 %vm315_vm0, %v6512_v20 }
 0x106   : > { %5484 = vmatprep.mubr.msk.f32.mxu0 %vm315_vm0, %v6199_v10 }
 0x108   : > { %5229 = vmatmul.mubr.msk.f32.gmra.mrb[24].mxu1 %vm315_vm0, %v6521_v11 }
 0x109   : > { %5485 = vmatmul.mubr.msk.f32.gmra.mrb[8].mxu0 %vm315_vm0, %v6213_v13  ;;  %5231 = vmatprep.mubr.msk.f32.mxu1 %vm315_vm0, %v6526_v16 }
 0x10a   : > { %5487 = vmatprep.mubr.msk.f32.mxu0 %vm315_vm0, %v6219_v15 }
 0x10c   : > { %5232 = vmatmul.mubr.msk.f32.gmra.mrb[26].mxu1 %vm315_vm0, %v6535_v2 }
 0x10d   : > { %5488 = vmatmul.mubr.msk.f32.gmra.mrb[10].mxu0 %vm315_vm0, %v6233_v17  ;;  %5234 = vmatprep.mubr.msk.f32.mxu1 %vm315_vm0, %v6540_v6 }
 0x10e   : > { %5490 = vmatprep.mubr.msk.f32.mxu0 %vm315_vm0, %v6239_v19 }
 0x110   : > { %5235 = vmatmul.mubr.msk.f32.gmra.mrb[28].mxu1 %vm315_vm0, %v6549_v49 }
 0x111   : > { %5491 = vmatmul.mubr.msk.f32.gmra.mrb[12].mxu0 %vm315_vm0, %v6253_v21  ;;  %5237 = vmatprep.mubr.msk.f32.mxu1 %vm315_vm0, %v6610_v48 }
 0x112   : > { %5493 = vmatprep.mubr.msk.f32.mxu0 %vm315_vm0, %v6257_v23  ;;  %v6926_v23 = vld [vmem:[%s7333_s2] ss:$0 sm:$0xff] }
 0x114   : > { %5238 = vmatmul.mubr.msk.f32.gmra.mrb[30].mxu1 %vm315_vm0, %v6621_v51 }
 0x115   : > { %5494 = vmatmul.mubr.msk.f32.gmra.mrb[14].mxu0 %vm315_vm0, %v6274_v28  ;;  %5272 = vmatprep.mubr.msk.f32.mxu1 %vm315_vm0, %v7426_v34 }
 0x116   : > { %5496 = vmatprep.mubr.msk.f32.mxu0 %vm315_vm0, %v6280_v30 }
 0x118   : > { %5273 = vmatmul.mubr.msk.f32.vlgmr.msra.gmra.mrb[16].mxu1 %vm315_vm0, %v7428_v38 }
 0x119   : > { %5497 = vmatmul.mubr.msk.f32.gmra.mrb[16].mxu0 %vm315_vm0, %v6300_v50  ;;  %5275 = vmatprep.mubr.msk.f32.mxu1 %vm315_vm0, %v7430_v40 }
 0x11a   : > { %5499 = vmatprep.mubr.msk.f32.mxu0 %vm315_vm0, %v6306_v55 }
 0x11c   : > { %5276 = vmatmul.mubr.msk.f32.gmra.mrb[18].mxu1 %vm315_vm0, %v7432_v42 }
 0x11d   : > { %5500 = vmatmul.mubr.msk.f32.gmra.mrb[18].mxu0 %vm315_vm0, %v6322_v22  ;;  %5278 = vmatprep.mubr.msk.f32.mxu1 %vm315_vm0, %v7434_v44 }
 0x11e   : > { %5502 = vmatprep.mubr.msk.f32.mxu0 %vm315_vm0, %v6328_v25 }
 0x120   : > { %5279 = vmatmul.mubr.msk.f32.gmra.mrb[20].mxu1 %vm315_vm0, %v7436_v46 }
 0x121   : > { %5503 = vmatmul.mubr.msk.f32.gmra.mrb[20].mxu0 %vm315_vm0, %v6343_v31  ;;  %5281 = vmatprep.mubr.msk.f32.mxu1 %vm315_vm0, %v7438_v57 }
 0x122   : > { %5505 = vmatprep.mubr.msk.f32.mxu0 %vm315_vm0, %v6349_v35 }
 0x124   : > { %5282 = vmatmul.mubr.msk.f32.gmra.mrb[22].mxu1 %vm315_vm0, %v7439_v7 }
 0x125   : > { %5506 = vmatmul.mubr.msk.f32.gmra.mrb[22].mxu0 %vm315_vm0, %v6363_v18  ;;  %5284 = vmatprep.mubr.msk.f32.mxu1 %vm315_vm0, %v7441_v36 }
 0x126   : > { %5508 = vmatprep.mubr.msk.f32.mxu0 %vm315_vm0, %v6369_v14 }
 0x128   : > { %5285 = vmatmul.mubr.msk.f32.gmra.mrb[24].mxu1 %vm315_vm0, %v7443_v0 }
 0x129   : > { %5509 = vmatmul.mubr.msk.f32.gmra.mrb[24].mxu0 %vm315_vm0, %v6383_v9  ;;  %5287 = vmatprep.mubr.msk.f32.mxu1 %vm315_vm0, %v7445_v26 }
 0x12a   : > { %5511 = vmatprep.mubr.msk.f32.mxu0 %vm315_vm0, %v7425_v33 }
 0x12c   : > { %5288 = vmatmul.mubr.msk.f32.gmra.mrb[26].mxu1 %vm315_vm0, %v7447_v27 }
 0x12d   : > { %5512 = vmatmul.mubr.msk.f32.gmra.mrb[26].mxu0 %vm315_vm0, %v7427_v37  ;;  %5290 = vmatprep.mubr.msk.f32.mxu1 %vm315_vm0, %v7449_v41 }
 0x12e   : > { %5514 = vmatprep.mubr.msk.f32.mxu0 %vm315_vm0, %v7457_v53 }
 0x130   : > { %5291 = vmatmul.mubr.msk.f32.gmra.mrb[28].mxu1 %vm315_vm0, %v7458_v60 }
 0x131   : > { %5515 = vmatmul.mubr.msk.f32.gmra.mrb[28].mxu0 %vm315_vm0, %v7459_v63  ;;  %5293 = vmatprep.mubr.msk.f32.mxu1 %vm315_vm0, %v6754_v43 }
 0x132   : > { %5517 = vmatprep.mubr.msk.f32.mxu0 %vm315_vm0, %v4650_v58 }
 0x134   : > { %5294 = vmatmul.mubr.msk.f32.gmra.mrb[30].mxu1 %vm315_vm0, %v6765_v62 }
 0x135   : > { %5518 = vmatmul.mubr.msk.f32.gmra.mrb[30].mxu0 %vm315_vm0, %v4651_v1 }
 0x1ab   : > { %v5194_v2 = vpop.f32.mrb[0].mxu1 }
 0x1ac   : > { %v1548_v3 = vpop.f32.mrb[1].mxu1 }
 0x1af   : > { %v5197_v5 = vpop.f32.mrb[2].mxu1 }
 0x1b0   : > { %v1558_v6 = vpop.f32.mrb[3].mxu1 }
 0x1b3   : > { %v5200_v8 = vpop.f32.mrb[4].mxu1 }
 0x1b4   : > { %v1568_v9 = vpop.f32.mrb[5].mxu1 }
 0x1b7   : > { %v5203_v10 = vpop.f32.mrb[6].mxu1 }
 0x1b8   : > { %v1578_v11 = vpop.f32.mrb[7].mxu1 }
 0x1bb   : > { %v6907_v13 = vpop.f32.mrb[8].mxu1 }
 0x1bc   : > { %v6909_v14 = vpop.f32.mrb[9].mxu1 }
 0x1bf   : > { %v6911_v15 = vpop.f32.mrb[10].mxu1 }
 0x1c0   : > { %v6913_v16 = vpop.f32.mrb[11].mxu1 }
 0x1c3   : > { %v6915_v17 = vpop.f32.mrb[12].mxu1 }
 0x1c4   : > { %v6917_v18 = vpop.f32.mrb[13].mxu1 }
 0x1c7   : > { %v6919_v19 = vpop.f32.mrb[14].mxu1 }
 0x1c8   : > { %v6921_v20 = vpop.f32.mrb[15].mxu1 }
 0x1cc   : > { %v5474_v21 = vpop.f32.mrb[0].mxu0 }
 0x1cd   : > { %v5596_v28 = vadd.f32 %v5474_v21, %v5194_v2  ;;  %v3499_v30 = vpop.f32.mrb[1].mxu0 }
 0x1ce   : > { %v5597_v49 = vadd.f32 %v3499_v30, %v1548_v3 }
 0x1cf   : > { %v3698_v50 = vadd.f32 %v5596_v28, %v6926_v23 }
 0x1d0   : > { %v3697_v54 = vadd.f32 %v5597_v49, %v6926_v23  ;;  %v5477_v55 = vpop.f32.mrb[2].mxu0 }
 0x1d1   : > { %vm3730_vm1 = vcmp.ge.f32.partialorder %v3698_v50, 0.0  ;;  %v3762_v22 = vmul.f32 0.2, %v3698_v50  ;;  %v5598_v24 = vadd.f32 %v5477_v55, %v5197_v5  ;;  %v3509_v25 = vpop.f32.mrb[3].mxu0 }
 0x1d2   : > { %vm3729_vm2 = vcmp.ge.f32.partialorder %v3697_v54, 0.0  ;;  %v3761_v31 = vmul.f32 0.2, %v3697_v54  ;;  %v5599_v35 = vadd.f32 %v3509_v25, %v1558_v6 }
 0x1d3   : > { %v6936_v12 = vsel %vm3730_vm1, %v3698_v50, %v3762_v22  ;;  %v3700_v61 = vadd.f32 %v5598_v24, %v6926_v23 }
 0x1d4   : > { %3826 = vst.msk [vmem:[%s6934_s8 + $0x8] sm:$0xff] %vm315_vm0, %v6936_v12  ;;  %v3858_v47 = vsel %vm315_vm0, %v6936_v12, 0.0  ;;  %v6944_v59 = vsel %vm3729_vm2, %v3697_v54, %v3761_v31  ;;  %v3699_v4 = vadd.f32 %v5599_v35, %v6926_v23  ;;  %v5480_v48 = vpop.f32.mrb[4].mxu0 }
 0x1d5   : > { %3825 = vst.msk [vmem:[%s6934_s8] sm:$0xff] %vm315_vm0, %v6944_v59  ;;  %v3857_v51 = vsel %vm315_vm0, %v6944_v59, 0.0  ;;  %vm3732_vm3 = vcmp.ge.f32.partialorder %v3700_v61, 0.0  ;;  %v3764_v33 = vmul.f32 0.2, %v3700_v61  ;;  %v5600_v34 = vadd.f32 %v5480_v48, %v5200_v8  ;;  %v3519_v37 = vpop.f32.mrb[5].mxu0 }
 0x1d6   : > { %vm3731_vm4 = vcmp.ge.f32.partialorder %v3699_v4, 0.0  ;;  %v3763_v38 = vmul.f32 0.2, %v3699_v4  ;;  %v5601_v40 = vadd.f32 %v3519_v37, %v1568_v9  ;;  %v3859_v46 = vadd.f32 %v3858_v47, %v3857_v51 }
 0x1d7   : > { %v6952_v42 = vsel %vm3732_vm3, %v3700_v61, %v3764_v33  ;;  %v3702_v44 = vadd.f32 %v5600_v34, %v6926_v23 }
 0x1d8   : > { %3828 = vst.msk [vmem:[%s6934_s8 + $0x18] sm:$0xff] %vm315_vm0, %v6952_v42  ;;  %v6958_v57 = vsel %vm3731_vm4, %v3699_v4, %v3763_v38  ;;  %v3701_v7 = vadd.f32 %v5601_v40, %v6926_v23  ;;  %v5483_v36 = vpop.f32.mrb[6].mxu0  ;;  %v3862_v29 = vsel %vm315_vm0, %v6952_v42, 0.0 }
 0x1d9   : > { %3827 = vst.msk [vmem:[%s6934_s8 + $0x10] sm:$0xff] %vm315_vm0, %v6958_v57  ;;  %v3860_v0 = vsel %vm315_vm0, %v6958_v57, 0.0  ;;  %vm3734_vm5 = vcmp.ge.f32.partialorder %v3702_v44, 0.0  ;;  %v3766_v26 = vmul.f32 0.2, %v3702_v44  ;;  %v5602_v27 = vadd.f32 %v5483_v36, %v5203_v10  ;;  %v3529_v41 = vpop.f32.mrb[7].mxu0 }
 0x1da   : > { %v3861_v43 = vadd.f32 %v3860_v0, %v3859_v46  ;;  %vm3733_vm6 = vcmp.ge.f32.partialorder %v3701_v7, 0.0  ;;  %v3765_v32 = vmul.f32 0.2, %v3701_v7  ;;  %v5603_v62 = vadd.f32 %v3529_v41, %v1578_v11 }
 0x1db   : > { %v6968_v56 = vsel %vm3734_vm5, %v3702_v44, %v3766_v26  ;;  %v3704_v39 = vadd.f32 %v5602_v27, %v6926_v23 }
 0x1dc   : > { %3830 = vst.msk [vmem:[%s6934_s8 + $0x28] sm:$0xff] %vm315_vm0, %v6968_v56  ;;  %v6974_v45 = vsel %vm3733_vm6, %v3701_v7, %v3765_v32  ;;  %v3863_v52 = vadd.f32 %v3862_v29, %v3861_v43  ;;  %v3703_v53 = vadd.f32 %v5603_v62, %v6926_v23  ;;  %v5486_v58 = vpop.f32.mrb[8].mxu0  ;;  %v3866_v8 = vsel %vm315_vm0, %v6968_v56, 0.0 }
 0x1dd   : > { %3829 = vst.msk [vmem:[%s6934_s8 + $0x20] sm:$0xff] %vm315_vm0, %v6974_v45  ;;  %v3864_v60 = vsel %vm315_vm0, %v6974_v45, 0.0  ;;  %vm3736_vm7 = vcmp.ge.f32.partialorder %v3704_v39, 0.0  ;;  %v3768_v63 = vmul.f32 0.2, %v3704_v39  ;;  %v5604_v1 = vadd.f32 %v5486_v58, %v6907_v13  ;;  %v3539_v2 = vpop.f32.mrb[9].mxu0 }
 0x1de   : > { %v3865_v3 = vadd.f32 %v3864_v60, %v3863_v52  ;;  %vm3735_vm8 = vcmp.ge.f32.partialorder %v3703_v53, 0.0  ;;  %v3767_v5 = vmul.f32 0.2, %v3703_v53  ;;  %v5605_v6 = vadd.f32 %v3539_v2, %v6909_v14 }
 0x1df   : > { %v6986_v9 = vsel %vm3736_vm7, %v3704_v39, %v3768_v63  ;;  %v3706_v10 = vadd.f32 %v5604_v1, %v6926_v23 }
 0x1e0   : > { %3832 = vst.msk [vmem:[%s6934_s8 + $0x38] sm:$0xff] %vm315_vm0, %v6986_v9  ;;  %v6992_v11 = vsel %vm3735_vm8, %v3703_v53, %v3767_v5  ;;  %v3867_v21 = vadd.f32 %v3866_v8, %v3865_v3  ;;  %v3705_v13 = vadd.f32 %v5605_v6, %v6926_v23  ;;  %v5489_v28 = vpop.f32.mrb[10].mxu0  ;;  %v3870_v24 = vsel %vm315_vm0, %v6986_v9, 0.0 }
 0x1e1   : > { %3831 = vst.msk [vmem:[%s6934_s8 + $0x30] sm:$0xff] %vm315_vm0, %v6992_v11  ;;  %v3868_v14 = vsel %vm315_vm0, %v6992_v11, 0.0  ;;  %vm3738_vm9 = vcmp.ge.f32.partialorder %v3706_v10, 0.0  ;;  %v3770_v30 = vmul.f32 0.2, %v3706_v10  ;;  %v5606_v49 = vadd.f32 %v5489_v28, %v6911_v15  ;;  %v3549_v50 = vpop.f32.mrb[11].mxu0 }
 0x1e2   : > { %v3869_v54 = vadd.f32 %v3868_v14, %v3867_v21  ;;  %vm3737_vm10 = vcmp.ge.f32.partialorder %v3705_v13, 0.0  ;;  %v3769_v55 = vmul.f32 0.2, %v3705_v13  ;;  %v5607_v22 = vadd.f32 %v3549_v50, %v6913_v16 }
 0x1e3   : > { %v7004_v25 = vsel %vm3738_vm9, %v3706_v10, %v3770_v30  ;;  %v3708_v31 = vadd.f32 %v5606_v49, %v6926_v23 }
 0x1e4   : > { %3834 = vst.msk [vmem:[%s6934_s8 + $0x48] sm:$0xff] %vm315_vm0, %v7004_v25  ;;  %v7010_v35 = vsel %vm3737_vm10, %v3705_v13, %v3769_v55  ;;  %v3871_v61 = vadd.f32 %v3870_v24, %v3869_v54  ;;  %v3707_v15 = vadd.f32 %v5607_v22, %v6926_v23  ;;  %v5492_v47 = vpop.f32.mrb[12].mxu0  ;;  %v3874_v38 = vsel %vm315_vm0, %v7004_v25, 0.0 }
 0x1e5   : > { %3833 = vst.msk [vmem:[%s6934_s8 + $0x40] sm:$0xff] %vm315_vm0, %v7010_v35  ;;  %v3872_v16 = vsel %vm315_vm0, %v7010_v35, 0.0  ;;  %vm3740_vm11 = vcmp.ge.f32.partialorder %v3708_v31, 0.0  ;;  %v3772_v4 = vmul.f32 0.2, %v3708_v31  ;;  %v5608_v48 = vadd.f32 %v5492_v47, %v6915_v17  ;;  %v3559_v51 = vpop.f32.mrb[13].mxu0 }
 0x1e6   : > { %v3873_v33 = vadd.f32 %v3872_v16, %v3871_v61  ;;  %vm3739_vm12 = vcmp.ge.f32.partialorder %v3707_v15, 0.0  ;;  %v3771_v34 = vmul.f32 0.2, %v3707_v15  ;;  %v5609_v37 = vadd.f32 %v3559_v51, %v6917_v18 }
 0x1e7   : > { %v7022_v40 = vsel %vm3740_vm11, %v3708_v31, %v3772_v4  ;;  %v3710_v44 = vadd.f32 %v5608_v48, %v6926_v23 }
 0x1e8   : > { %3836 = vst.msk [vmem:[%s6934_s8 + $0x58] sm:$0xff] %vm315_vm0, %v7022_v40  ;;  %v7028_v46 = vsel %vm3739_vm12, %v3707_v15, %v3771_v34  ;;  %v3875_v7 = vadd.f32 %v3874_v38, %v3873_v33  ;;  %v3709_v17 = vadd.f32 %v5609_v37, %v6926_v23  ;;  %v5495_v36 = vpop.f32.mrb[14].mxu0  ;;  %v3878_v62 = vsel %vm315_vm0, %v7022_v40, 0.0 }
 0x1e9   : > { %3835 = vst.msk [vmem:[%s6934_s8 + $0x50] sm:$0xff] %vm315_vm0, %v7028_v46  ;;  %v3876_v18 = vsel %vm315_vm0, %v7028_v46, 0.0  ;;  %vm3742_vm13 = vcmp.ge.f32.partialorder %v3710_v44, 0.0  ;;  %v3774_v0 = vmul.f32 0.2, %v3710_v44  ;;  %v5610_v26 = vadd.f32 %v5495_v36, %v6919_v19  ;;  %v3569_v27 = vpop.f32.mrb[15].mxu0 }
 0x1ea   : > { %v3877_v41 = vadd.f32 %v3876_v18, %v3875_v7  ;;  %vm3741_vm14 = vcmp.ge.f32.partialorder %v3709_v17, 0.0  ;;  %v3773_v43 = vmul.f32 0.2, %v3709_v17  ;;  %v5611_v32 = vadd.f32 %v3569_v27, %v6921_v20 }
 0x1eb   : > { %v7040_v29 = vsel %vm3742_vm13, %v3710_v44, %v3774_v0  ;;  %v3712_v39 = vadd.f32 %v5610_v26, %v6926_v23  ;;  %v5274_v52 = vpop.f32.mrb[16].mxu1 }
 0x1ec   : > { %3838 = vst.msk [vmem:[%s6934_s8 + $0x68] sm:$0xff] %vm315_vm0, %v7040_v29  ;;  %v7046_v53 = vsel %vm3741_vm14, %v3709_v17, %v3773_v43  ;;  %v3879_v19 = vadd.f32 %v3878_v62, %v3877_v41  ;;  %v3711_v58 = vadd.f32 %v5611_v32, %v6926_v23  ;;  %v5498_v60 = vpop.f32.mrb[16].mxu0  ;;  %v2018_v63 = vpop.f32.mrb[17].mxu1  ;;  %v3882_v10 = vsel %vm315_vm0, %v7040_v29, 0.0 }
 0x1ed   : > { %3837 = vst.msk [vmem:[%s6934_s8 + $0x60] sm:$0xff] %vm315_vm0, %v7046_v53  ;;  %v3880_v20 = vsel %vm315_vm0, %v7046_v53, 0.0  ;;  %vm3744_vm15 = vcmp.ge.f32.partialorder %v3712_v39, 0.0  ;;  %v3776_v1 = vmul.f32 0.2, %v3712_v39  ;;  %v5612_v2 = vadd.f32 %v5498_v60, %v5274_v52  ;;  %v3579_v3 = vpop.f32.mrb[17].mxu0 }
 0x1ee   : > { %v3881_v5 = vadd.f32 %v3880_v20, %v3879_v19  ;;  %vm3743_vm1 = vcmp.ge.f32.partialorder %v3711_v58, 0.0  ;;  %v3775_v6 = vmul.f32 0.2, %v3711_v58  ;;  %v5613_v8 = vadd.f32 %v3579_v3, %v2018_v63 }
 0x1ef   : > { %v7056_v21 = vsel %vm3744_vm15, %v3712_v39, %v3776_v1  ;;  %v3714_v13 = vadd.f32 %v5612_v2, %v6926_v23  ;;  %v5277_v28 = vpop.f32.mrb[18].mxu1 }
 0x1f0   : > { %3840 = vst.msk [vmem:[%s6934_s8 + $0x78] sm:$0xff] %vm315_vm0, %v7056_v21  ;;  %v7062_v14 = vsel %vm3743_vm1, %v3711_v58, %v3775_v6  ;;  %v3883_v30 = vadd.f32 %v3882_v10, %v3881_v5  ;;  %v3713_v49 = vadd.f32 %v5613_v8, %v6926_v23  ;;  %v5501_v50 = vpop.f32.mrb[18].mxu0  ;;  %v2028_v54 = vpop.f32.mrb[19].mxu1  ;;  %v3886_v16 = vsel %vm315_vm0, %v7056_v21, 0.0 }
 0x1f1   : > { %3839 = vst.msk [vmem:[%s6934_s8 + $0x70] sm:$0xff] %vm315_vm0, %v7062_v14  ;;  %v3884_v55 = vsel %vm315_vm0, %v7062_v14, 0.0  ;;  %vm3746_vm2 = vcmp.ge.f32.partialorder %v3714_v13, 0.0  ;;  %v3778_v22 = vmul.f32 0.2, %v3714_v13  ;;  %v5614_v24 = vadd.f32 %v5501_v50, %v5277_v28  ;;  %v3589_v31 = vpop.f32.mrb[19].mxu0 }
 0x1f2   : > { %v3885_v61 = vadd.f32 %v3884_v55, %v3883_v30  ;;  %vm3745_vm3 = vcmp.ge.f32.partialorder %v3713_v49, 0.0  ;;  %v3777_v15 = vmul.f32 0.2, %v3713_v49  ;;  %v5615_v47 = vadd.f32 %v3589_v31, %v2028_v54 }
 0x1f3   : > { %v7072_v4 = vsel %vm3746_vm2, %v3714_v13, %v3778_v22  ;;  %v3716_v48 = vadd.f32 %v5614_v24, %v6926_v23  ;;  %v5280_v51 = vpop.f32.mrb[20].mxu1 }
 0x1f4   : > { %3842 = vst.msk [vmem:[%s6934_s8 + $0x88] sm:$0xff] %vm315_vm0, %v7072_v4  ;;  %v7078_v33 = vsel %vm3745_vm3, %v3713_v49, %v3777_v15  ;;  %v3887_v34 = vadd.f32 %v3886_v16, %v3885_v61  ;;  %v3715_v37 = vadd.f32 %v5615_v47, %v6926_v23  ;;  %v5504_v38 = vpop.f32.mrb[20].mxu0  ;;  %v2038_v44 = vpop.f32.mrb[21].mxu1  ;;  %v3890_v41 = vsel %vm315_vm0, %v7072_v4, 0.0 }
 0x1f5   : > { %3841 = vst.msk [vmem:[%s6934_s8 + $0x80] sm:$0xff] %vm315_vm0, %v7078_v33  ;;  %v3888_v7 = vsel %vm315_vm0, %v7078_v33, 0.0  ;;  %vm3748_vm4 = vcmp.ge.f32.partialorder %v3716_v48, 0.0  ;;  %v3780_v17 = vmul.f32 0.2, %v3716_v48  ;;  %v5616_v36 = vadd.f32 %v5504_v38, %v5280_v51  ;;  %v3599_v18 = vpop.f32.mrb[21].mxu0 }
 0x1f6   : > { %v3889_v0 = vadd.f32 %v3888_v7, %v3887_v34  ;;  %vm3747_vm5 = vcmp.ge.f32.partialorder %v3715_v37, 0.0  ;;  %v3779_v26 = vmul.f32 0.2, %v3715_v37  ;;  %v5617_v27 = vadd.f32 %v3599_v18, %v2038_v44 }
 0x1f7   : > { %v7088_v43 = vsel %vm3748_vm4, %v3716_v48, %v3780_v17  ;;  %v3718_v32 = vadd.f32 %v5616_v36, %v6926_v23  ;;  %v5283_v62 = vpop.f32.mrb[22].mxu1  ;;  %vm3926_vm3 = vcmask 253952  }
 0x1f8   : > { %3844 = vst.msk [vmem:[%s6934_s8 + $0x98] sm:$0xff] %vm315_vm0, %v7088_v43  ;;  %v7094_v39 = vsel %vm3747_vm5, %v3715_v37, %v3779_v26  ;;  %v3891_v52 = vadd.f32 %v3890_v41, %v3889_v0  ;;  %v3717_v19 = vadd.f32 %v5617_v27, %v6926_v23  ;;  %v5507_v58 = vpop.f32.mrb[22].mxu0  ;;  %v2048_v60 = vpop.f32.mrb[23].mxu1  ;;  %v3894_v8 = vsel %vm315_vm0, %v7088_v43, 0.0 }
 0x1f9   : > { %3843 = vst.msk [vmem:[%s6934_s8 + $0x90] sm:$0xff] %vm315_vm0, %v7094_v39  ;;  %v3892_v63 = vsel %vm315_vm0, %v7094_v39, 0.0  ;;  %vm3750_vm6 = vcmp.ge.f32.partialorder %v3718_v32, 0.0  ;;  %v3782_v20 = vmul.f32 0.2, %v3718_v32  ;;  %v5618_v1 = vadd.f32 %v5507_v58, %v5283_v62  ;;  %v3609_v2 = vpop.f32.mrb[23].mxu0 }
 0x1fa   : > { %v3893_v3 = vadd.f32 %v3892_v63, %v3891_v52  ;;  %vm3749_vm7 = vcmp.ge.f32.partialorder %v3717_v19, 0.0  ;;  %v3781_v5 = vmul.f32 0.2, %v3717_v19  ;;  %v5619_v6 = vadd.f32 %v3609_v2, %v2048_v60 }
 0x1fb   : > { %v7104_v10 = vsel %vm3750_vm6, %v3718_v32, %v3782_v20  ;;  %v3720_v13 = vadd.f32 %v5618_v1, %v6926_v23  ;;  %v5286_v28 = vpop.f32.mrb[24].mxu1 }
 0x1fc   : > { %3846 = vst.msk [vmem:[%s6934_s8 + $0xa8] sm:$0xff] %vm315_vm0, %v7104_v10  ;;  %v7110_v30 = vsel %vm3749_vm7, %v3717_v19, %v3781_v5  ;;  %v3895_v49 = vadd.f32 %v3894_v8, %v3893_v3  ;;  %v3719_v50 = vadd.f32 %v5619_v6, %v6926_v23  ;;  %v5510_v54 = vpop.f32.mrb[24].mxu0  ;;  %v2058_v55 = vpop.f32.mrb[25].mxu1  ;;  %v3898_v48 = vsel %vm315_vm0, %v7104_v10, 0.0 }
 0x1fd   : > { %3845 = vst.msk [vmem:[%s6934_s8 + $0xa0] sm:$0xff] %vm315_vm0, %v7110_v30  ;;  %v3896_v22 = vsel %vm315_vm0, %v7110_v30, 0.0  ;;  %vm3752_vm8 = vcmp.ge.f32.partialorder %v3720_v13, 0.0  ;;  %v3784_v24 = vmul.f32 0.2, %v3720_v13  ;;  %v5620_v31 = vadd.f32 %v5510_v54, %v5286_v28  ;;  %v3619_v61 = vpop.f32.mrb[25].mxu0 }
 0x1fe   : > { %v3897_v15 = vadd.f32 %v3896_v22, %v3895_v49  ;;  %vm3751_vm9 = vcmp.ge.f32.partialorder %v3719_v50, 0.0  ;;  %v3783_v47 = vmul.f32 0.2, %v3719_v50  ;;  %v5621_v16 = vadd.f32 %v3619_v61, %v2058_v55 }
 0x1ff   : > { %v7120_v51 = vsel %vm3752_vm8, %v3720_v13, %v3784_v24  ;;  %v3722_v34 = vadd.f32 %v5620_v31, %v6926_v23  ;;  %v5289_v37 = vpop.f32.mrb[26].mxu1 }
 0x200   : > { %3848 = vst.msk [vmem:[%s6934_s8 + $0xb8] sm:$0xff] %vm315_vm0, %v7120_v51  ;;  %v7126_v38 = vsel %vm3751_vm9, %v3719_v50, %v3783_v47  ;;  %v3899_v44 = vadd.f32 %v3898_v48, %v3897_v15  ;;  %v3721_v7 = vadd.f32 %v5621_v16, %v6926_v23  ;;  %v5513_v17 = vpop.f32.mrb[26].mxu0  ;;  %v2068_v36 = vpop.f32.mrb[27].mxu1  ;;  %v3902_v52 = vsel %vm315_vm0, %v7120_v51, 0.0 }
 0x201   : > { %3847 = vst.msk [vmem:[%s6934_s8 + $0xb0] sm:$0xff] %vm315_vm0, %v7126_v38  ;;  %v3900_v18 = vsel %vm315_vm0, %v7126_v38, 0.0  ;;  %vm3754_vm10 = vcmp.ge.f32.partialorder %v3722_v34, 0.0  ;;  %v3786_v0 = vmul.f32 0.2, %v3722_v34  ;;  %v5622_v26 = vadd.f32 %v5513_v17, %v5289_v37  ;;  %v3629_v27 = vpop.f32.mrb[27].mxu0 }
 0x202   : > { %v3901_v41 = vadd.f32 %v3900_v18, %v3899_v44  ;;  %vm3753_vm11 = vcmp.ge.f32.partialorder %v3721_v7, 0.0  ;;  %v3785_v32 = vmul.f32 0.2, %v3721_v7  ;;  %v5623_v62 = vadd.f32 %v3629_v27, %v2068_v36 }
 0x203   : > { %v7136_v19 = vsel %vm3754_vm10, %v3722_v34, %v3786_v0  ;;  %v3724_v58 = vadd.f32 %v5622_v26, %v6926_v23  ;;  %v5292_v60 = vpop.f32.mrb[28].mxu1 }
 0x204   : > { %3850 = vst.msk [vmem:[%s6934_s8 + $0xc8] sm:$0xff] %vm315_vm0, %v7136_v19  ;;  %v7142_v63 = vsel %vm3753_vm11, %v3721_v7, %v3785_v32  ;;  %v3903_v20 = vadd.f32 %v3902_v52, %v3901_v41  ;;  %v3723_v1 = vadd.f32 %v5623_v62, %v6926_v23  ;;  %v5516_v2 = vpop.f32.mrb[28].mxu0  ;;  %v2078_v3 = vpop.f32.mrb[29].mxu1  ;;  %v3906_v54 = vsel %vm315_vm0, %v7136_v19, 0.0 }
 0x205   : > { %3849 = vst.msk [vmem:[%s6934_s8 + $0xc0] sm:$0xff] %vm315_vm0, %v7142_v63  ;;  %v3904_v5 = vsel %vm315_vm0, %v7142_v63, 0.0  ;;  %vm3756_vm12 = vcmp.ge.f32.partialorder %v3724_v58, 0.0  ;;  %v3788_v6 = vmul.f32 0.2, %v3724_v58  ;;  %v5624_v8 = vadd.f32 %v5516_v2, %v5292_v60  ;;  %v3639_v13 = vpop.f32.mrb[29].mxu0 }
 0x206   : > { %v3905_v28 = vadd.f32 %v3904_v5, %v3903_v20  ;;  %vm3755_vm13 = vcmp.ge.f32.partialorder %v3723_v1, 0.0  ;;  %v3787_v49 = vmul.f32 0.2, %v3723_v1  ;;  %v5625_v50 = vadd.f32 %v3639_v13, %v2078_v3 }
 0x207   : > { %v7152_v55 = vsel %vm3756_vm12, %v3724_v58, %v3788_v6  ;;  %v3726_v22 = vadd.f32 %v5624_v8, %v6926_v23  ;;  %v5295_v24 = vpop.f32.mrb[30].mxu1 }
 0x208   : > { %3852 = vst.msk [vmem:[%s6934_s8 + $0xd8] sm:$0xff] %vm315_vm0, %v7152_v55  ;;  %v7158_v31 = vsel %vm3755_vm13, %v3723_v1, %v3787_v49  ;;  %v3907_v61 = vadd.f32 %v3906_v54, %v3905_v28  ;;  %v3725_v15 = vadd.f32 %v5625_v50, %v6926_v23  ;;  %v5519_v47 = vpop.f32.mrb[30].mxu0  ;;  %v2088_v16 = vpop.f32.mrb[31].mxu1  ;;  %v3910_v18 = vsel %vm315_vm0, %v7152_v55, 0.0 }
 0x209   : > { %3851 = vst.msk [vmem:[%s6934_s8 + $0xd0] sm:$0xff] %vm315_vm0, %v7158_v31  ;;  %v3908_v48 = vsel %vm315_vm0, %v7158_v31, 0.0  ;;  %vm3758_vm14 = vcmp.ge.f32.partialorder %v3726_v22, 0.0  ;;  %v3790_v34 = vmul.f32 0.2, %v3726_v22  ;;  %v5626_v37 = vadd.f32 %v5519_v47, %v5295_v24  ;;  %v3649_v44 = vpop.f32.mrb[31].mxu0 }
 0x20a   : > { %v3909_v7 = vadd.f32 %v3908_v48, %v3907_v61  ;;  %vm3757_vm15 = vcmp.ge.f32.partialorder %v3725_v15, 0.0  ;;  %v3789_v17 = vmul.f32 0.2, %v3725_v15  ;;  %v5627_v36 = vadd.f32 %v3649_v44, %v2088_v16 }
 0x20b   : > { %v3822_v0 = vsel %vm3758_vm14, %v3726_v22, %v3790_v34  ;;  %v3728_v26 = vadd.f32 %v5626_v37, %v6926_v23 }
 0x20c   : > { %3854 = vst.msk [vmem:[%s6934_s8 + $0xe8] sm:$0xff] %vm315_vm0, %v3822_v0  ;;  %v3821_v27 = vsel %vm3757_vm15, %v3725_v15, %v3789_v17  ;;  %v3911_v41 = vadd.f32 %v3910_v18, %v3909_v7  ;;  %v3727_v32 = vadd.f32 %v5627_v36, %v6926_v23  ;;  %v3914_v20 = vsel %vm315_vm0, %v3822_v0, 0.0 }
 0x20d   : > { %3853 = vst.msk [vmem:[%s6934_s8 + $0xe0] sm:$0xff] %vm315_vm0, %v3821_v27  ;;  %v3912_v62 = vsel %vm315_vm0, %v3821_v27, 0.0  ;;  %vm3760_vm1 = vcmp.ge.f32.partialorder %v3728_v26, 0.0  ;;  %v3792_v52 = vmul.f32 0.2, %v3728_v26 }
 0x20e   : > { %v3913_v58 = vadd.f32 %v3912_v62, %v3911_v41  ;;  %vm3759_vm2 = vcmp.ge.f32.partialorder %v3727_v32, 0.0  ;;  %v3791_v60 = vmul.f32 0.2, %v3727_v32 }
 0x20f   : > { %v3824_v1 = vsel %vm3760_vm1, %v3728_v26, %v3792_v52 }
 0x210   : > { %3856 = vst.msk [vmem:[%s6934_s8 + $0xf8] sm:$0xff] %vm315_vm0, %v3824_v1  ;;  %v3823_v2 = vsel %vm3759_vm2, %v3727_v32, %v3791_v60  ;;  %v3915_v3 = vadd.f32 %v3914_v20, %v3913_v58  ;;  %v3918_v6 = vsel %vm315_vm0, %v3824_v1, 0.0 }
 0x211   : > { %3855 = vst.msk [vmem:[%s6934_s8 + $0xf0] sm:$0xff] %vm315_vm0, %v3823_v2  ;;  %v3916_v23 = vsel %vm315_vm0, %v3823_v2, 0.0 }
 0x212   : > { %v3917_v5 = vadd.f32 %v3916_v23, %v3915_v3 }
 0x214   : > { %v3919_v8 = vadd.f32 %v3918_v6, %v3917_v5 }
 0x216   : > { %v3920_v13 = vrot.slane %v3919_v8, 4 }
 0x218   : > { %v3921_v28 = vadd.f32 %v3920_v13, %v3919_v8 }
 0x21a   : > { %v3922_v49 = vrot.slane %v3921_v28, 2 }
 0x21c   : > { %v3923_v50 = vadd.f32 %v3922_v49, %v3921_v28 }
 0x21e   : > { %v3924_v54 = vrot.slane %v3923_v50, 1 }
 0x220   : > { %v3925_v22 = vadd.f32 %v3924_v54, %v3923_v50 }
 0x222   : > { %3927 = vst.msk [vmem:[%s238_s11] sm:$0x1] %vm3926_vm3, %v3925_v22  ;;  %v3928_v24 = vmul.f32 0.00390625, %v3925_v22 }
 0x224   : > { %v3939_v61 = vsub.f32 %v7028_v46, %v3928_v24  ;;  %v3940_v15 = vsub.f32 %v7022_v40, %v3928_v24  ;;  %v3941_v47 = vsub.f32 %v7046_v53, %v3928_v24  ;;  %v7191_v16 = vsub.f32 %v7040_v29, %v3928_v24 }
 0x225   : > { %v7194_v48 = vsub.f32 %v7062_v14, %v3928_v24  ;;  %v7197_v34 = vsub.f32 %v7056_v21, %v3928_v24  ;;  %v7200_v37 = vsub.f32 %v7078_v33, %v3928_v24  ;;  %v7203_v44 = vsub.f32 %v7072_v4, %v3928_v24 }
 0x226   : > { %v7206_v46 = vsub.f32 %v7094_v39, %v3928_v24  ;;  %v7209_v40 = vsub.f32 %v7088_v43, %v3928_v24  ;;  %v7212_v29 = vsub.f32 %v7110_v30, %v3928_v24  ;;  %v7215_v53 = vsub.f32 %v7104_v10, %v3928_v24 }
 0x227   : > { %v7218_v21 = vsub.f32 %v7126_v38, %v3928_v24  ;;  %v7221_v14 = vsub.f32 %v7120_v51, %v3928_v24  ;;  %v7224_v4 = vsub.f32 %v7142_v63, %v3928_v24  ;;  %v7227_v33 = vsub.f32 %v7136_v19, %v3928_v24 }
 0x228   : > { %v7230_v43 = vsub.f32 %v7158_v31, %v3928_v24  ;;  %v7233_v39 = vsub.f32 %v7152_v55, %v3928_v24  ;;  %v7235_v10 = vsub.f32 %v3821_v27, %v3928_v24  ;;  %v7237_v30 = vsub.f32 %v3822_v0, %v3928_v24 }
 0x229   : > { %v7239_v38 = vsub.f32 %v3823_v2, %v3928_v24  ;;  %v7241_v51 = vsub.f32 %v3824_v1, %v3928_v24  ;;  %v3929_v63 = vsub.f32 %v6944_v59, %v3928_v24  ;;  %v3930_v7 = vsub.f32 %v6936_v12, %v3928_v24 }
 0x22a   : > { %v3931_v19 = vsub.f32 %v6958_v57, %v3928_v24  ;;  %v3932_v31 = vsub.f32 %v6952_v42, %v3928_v24  ;;  %v3933_v55 = vsub.f32 %v6974_v45, %v3928_v24  ;;  %v3934_v0 = vsub.f32 %v6968_v56, %v3928_v24 }
 0x22b   : > { %v3961_v17 = vmul.f32 %v3929_v63, %v3929_v63  ;;  %v3962_v36 = vmul.f32 %v3930_v7, %v3930_v7  ;;  %v3935_v59 = vsub.f32 %v6992_v11, %v3928_v24  ;;  %v3936_v42 = vsub.f32 %v6986_v9, %v3928_v24 }
 0x22c   : > { %v3963_v18 = vmul.f32 %v3931_v19, %v3931_v19  ;;  %v3964_v26 = vmul.f32 %v3932_v31, %v3932_v31  ;;  %v3965_v12 = vmul.f32 %v3933_v55, %v3933_v55  ;;  %v3966_v52 = vmul.f32 %v3934_v0, %v3934_v0 }
 0x22d   : > { %v3993_v27 = vsel %vm315_vm0, %v3961_v17, 0.0  ;;  %v3994_v41 = vsel %vm315_vm0, %v3962_v36, 0.0  ;;  %v3937_v56 = vsub.f32 %v7010_v35, %v3928_v24  ;;  %v3967_v60 = vmul.f32 %v3935_v59, %v3935_v59 }
 0x22e   : > { %v3995_v32 = vadd.f32 %v3994_v41, %v3993_v27  ;;  %v3996_v57 = vsel %vm315_vm0, %v3963_v18, 0.0  ;;  %v3998_v45 = vsel %vm315_vm0, %v3964_v26, 0.0  ;;  %v4000_v20 = vsel %vm315_vm0, %v3965_v12, 0.0 }
 0x22f   : > { %v3938_v2 = vsub.f32 %v7004_v25, %v3928_v24  ;;  %v3968_v3 = vmul.f32 %v3936_v42, %v3936_v42  ;;  %v4002_v11 = vsel %vm315_vm0, %v3966_v52, 0.0  ;;  %v3969_v5 = vmul.f32 %v3937_v56, %v3937_v56 }
 0x230   : > { %v3997_v62 = vadd.f32 %v3996_v57, %v3995_v32  ;;  %v4004_v6 = vsel %vm315_vm0, %v3967_v60, 0.0  ;;  %v3971_v49 = vmul.f32 %v3939_v61, %v3939_v61  ;;  %v3972_v54 = vmul.f32 %v3940_v15, %v3940_v15 }
 0x231   : > { %v3970_v8 = vmul.f32 %v3938_v2, %v3938_v2  ;;  %v4006_v13 = vsel %vm315_vm0, %v3968_v3, 0.0  ;;  %v4008_v35 = vsel %vm315_vm0, %v3969_v5, 0.0  ;;  %v3973_v24 = vmul.f32 %v3941_v47, %v3941_v47 }
 0x232   : > { %v3999_v58 = vadd.f32 %v3998_v45, %v3997_v62  ;;  %v4012_v63 = vsel %vm315_vm0, %v3971_v49, 0.0  ;;  %v3974_v19 = vmul.f32 %v7191_v16, %v7191_v16  ;;  %v4014_v31 = vsel %vm315_vm0, %v3972_v54, 0.0 }
 0x233   : > { %v4010_v22 = vsel %vm315_vm0, %v3970_v8, 0.0  ;;  %v3975_v61 = vmul.f32 %v7194_v48, %v7194_v48  ;;  %v4016_v36 = vsel %vm315_vm0, %v3973_v24, 0.0  ;;  %v3976_v15 = vmul.f32 %v7197_v34, %v7197_v34 }
 0x234   : > { %v4001_v1 = vadd.f32 %v4000_v20, %v3999_v58  ;;  %v4018_v47 = vsel %vm315_vm0, %v3974_v19, 0.0  ;;  %v3977_v0 = vmul.f32 %v7200_v37, %v7200_v37  ;;  %v3978_v27 = vmul.f32 %v7203_v44, %v7203_v44 }
 0x235   : > { %v4020_v16 = vsel %vm315_vm0, %v3975_v61, 0.0  ;;  %v4022_v48 = vsel %vm315_vm0, %v3976_v15, 0.0  ;;  %v3979_v32 = vmul.f32 %v7206_v46, %v7206_v46  ;;  %v3980_v12 = vmul.f32 %v7209_v40, %v7209_v40 }
 0x236   : > { %v4003_v23 = vadd.f32 %v4002_v11, %v4001_v1  ;;  %v4024_v34 = vsel %vm315_vm0, %v3977_v0, 0.0  ;;  %v4026_v37 = vsel %vm315_vm0, %v3978_v27, 0.0  ;;  %v3981_v62 = vmul.f32 %v7212_v29, %v7212_v29 }
 0x237   : > { %v4028_v44 = vsel %vm315_vm0, %v3979_v32, 0.0  ;;  %v3982_v52 = vmul.f32 %v7215_v53, %v7215_v53  ;;  %v4030_v46 = vsel %vm315_vm0, %v3980_v12, 0.0  ;;  %v3983_v58 = vmul.f32 %v7218_v21, %v7218_v21 }
 0x238   : > { %v4005_v9 = vadd.f32 %v4004_v6, %v4003_v23  ;;  %v4032_v40 = vsel %vm315_vm0, %v3981_v62, 0.0  ;;  %v3984_v60 = vmul.f32 %v7221_v14, %v7221_v14  ;;  %v3985_v1 = vmul.f32 %v7224_v4, %v7224_v4 }
 0x239   : > { %v4034_v29 = vsel %vm315_vm0, %v3982_v52, 0.0  ;;  %v4036_v53 = vsel %vm315_vm0, %v3983_v58, 0.0  ;;  %v3986_v3 = vmul.f32 %v7227_v33, %v7227_v33  ;;  %v3987_v23 = vmul.f32 %v7230_v43, %v7230_v43 }
 0x23a   : > { %v4007_v28 = vadd.f32 %v4006_v13, %v4005_v9  ;;  %v4038_v21 = vsel %vm315_vm0, %v3984_v60, 0.0  ;;  %v4040_v14 = vsel %vm315_vm0, %v3985_v1, 0.0  ;;  %v3988_v6 = vmul.f32 %v7233_v39, %v7233_v39 }
 0x23b   : > { %v4042_v4 = vsel %vm315_vm0, %v3986_v3, 0.0  ;;  %v3989_v8 = vmul.f32 %v7235_v10, %v7235_v10  ;;  %v4044_v33 = vsel %vm315_vm0, %v3987_v23, 0.0  ;;  %v3992_v54 = vmul.f32 %v7241_v51, %v7241_v51 }
 0x23c   : > { %v4009_v50 = vadd.f32 %v4008_v35, %v4007_v28  ;;  %v3990_v28 = vmul.f32 %v7237_v30, %v7237_v30  ;;  %v4046_v43 = vsel %vm315_vm0, %v3988_v6, 0.0  ;;  %v3991_v35 = vmul.f32 %v7239_v38, %v7239_v38 }
 0x23d   : > { %v4048_v39 = vsel %vm315_vm0, %v3989_v8, 0.0  ;;  %v4054_v30 = vsel %vm315_vm0, %v3992_v54, 0.0 }
 0x23e   : > { %v4011_v25 = vadd.f32 %v4010_v22, %v4009_v50  ;;  %v4050_v10 = vsel %vm315_vm0, %v3990_v28, 0.0 }
 0x240   : > { %v4013_v7 = vadd.f32 %v4012_v63, %v4011_v25  ;;  %v4052_v25 = vsel %vm315_vm0, %v3991_v35, 0.0 }
 0x242   : > { %v4015_v17 = vadd.f32 %v4014_v31, %v4013_v7 }
 0x244   : > { %v4017_v55 = vadd.f32 %v4016_v36, %v4015_v17 }
 0x246   : > { %v4019_v18 = vadd.f32 %v4018_v47, %v4017_v55 }
 0x248   : > { %v4021_v26 = vadd.f32 %v4020_v16, %v4019_v18 }
 0x24a   : > { %v4023_v41 = vadd.f32 %v4022_v48, %v4021_v26 }
 0x24c   : > { %v4025_v59 = vadd.f32 %v4024_v34, %v4023_v41 }
 0x24e   : > { %v4027_v57 = vadd.f32 %v4026_v37, %v4025_v59 }
 0x250   : > { %v4029_v42 = vadd.f32 %v4028_v44, %v4027_v57 }
 0x252   : > { %v4031_v45 = vadd.f32 %v4030_v46, %v4029_v42 }
 0x254   : > { %v4033_v56 = vadd.f32 %v4032_v40, %v4031_v45 }
 0x256   : > { %v4035_v20 = vadd.f32 %v4034_v29, %v4033_v56 }
 0x258   : > { %v4037_v2 = vadd.f32 %v4036_v53, %v4035_v20 }
 0x25a   : > { %v4039_v11 = vadd.f32 %v4038_v21, %v4037_v2 }
 0x25c   : > { %v4041_v5 = vadd.f32 %v4040_v14, %v4039_v11 }
 0x25e   : > { %v4043_v9 = vadd.f32 %v4042_v4, %v4041_v5 }
 0x260   : > { %v4045_v13 = vadd.f32 %v4044_v33, %v4043_v9 }
 0x262   : > { %v4047_v49 = vadd.f32 %v4046_v43, %v4045_v13 }
 0x264   : > { %v4049_v50 = vadd.f32 %v4048_v39, %v4047_v49 }
 0x266   : > { %v4051_v22 = vadd.f32 %v4050_v10, %v4049_v50 }
 0x268   : > { %v4053_v24 = vadd.f32 %v4052_v25, %v4051_v22 }
 0x26a   : > { %v4055_v63 = vadd.f32 %v4054_v30, %v4053_v24 }
 0x26c   : > { %v4056_v7 = vrot.slane %v4055_v63, 4 }
 0x26e   : > { %v4057_v19 = vadd.f32 %v4056_v7, %v4055_v63 }
 0x270   : > { %v4058_v31 = vrot.slane %v4057_v19, 2 }
 0x272   : > { %v4059_v17 = vadd.f32 %v4058_v31, %v4057_v19 }
 0x274   : > { %v4060_v38 = vrot.slane %v4059_v17, 1 }
 0x276   : > { %v4061_v61 = vadd.f32 %v4060_v38, %v4059_v17 }
 0x278   : > { %4062 = vst.msk [vmem:[%s241_s14] sm:$0x1] %vm3926_vm3, %v4061_v61 }
 0x279 PF: > { %s16_s18 = sadd.s32 1, %s5867_s18  }
 0x27a   : > { %p13_p4 = scmp.ge.s32.totalorder %s16_s18, 4  }
 0x27c   :  { %15 = sbr.rel (!%p13_p4) target bundleno = 1 (0x1), region = 96 }

</bundles_post_ra>
